<compile_context>
chip_gen: v7x
topology: tpu7x:2x2x1
jax: 0.10.0
libtpu: 0.0.40
codegen_flags: <defaults>
</compile_context>

<pallas_src>
import jax
import jax.numpy as jnp
from jax import lax
from jax.experimental import pallas as pl
from jax.experimental.pallas import tpu as pltpu

# ---------------- config (small synthetic sizes) ----------------
VOCAB_SIZE = 16
HIDDEN = 32          # NOTE: lane-sparse (32 < 128) stores only matter if H=32 is real;
                     # production H (e.g. 768) makes the output lane-dense automatically.
MAX_POS = 32
TYPE_VOCAB = 2
PAD_TOKEN_ID = 1
LN_EPS = 1e-12
B, S = 2, 8
BLK_M = 256          # rows (B*S) per grid step; sweep 256/512/1024 at production sizes


def _round_up(x, m):
    return ((x + m - 1) // m) * m


# ---------------- Pallas kernel ----------------
def _make_kernel(word_off, pos_off, type_off, ortho_off, pocket_off,
                 xyz_off, bias_row, gamma_row, beta_row, fused_v, ln_eps):
    def kernel(rows_ref, tab_ref, out_ref):
        blk = rows_ref.shape[0]
        rows = rows_ref[...]                              # (blk, 8) f32 packed stream

        # integer id columns were stored as exact small f32 values
        ids = rows[:, 0:1].astype(jnp.int32)
        posid = rows[:, 1:2].astype(jnp.int32)
        ttype = rows[:, 2:3].astype(jnp.int32)
        ortho = rows[:, 3:4].astype(jnp.int32)
        pocket = rows[:, 4:5].astype(jnp.int32)
        xyz = rows[:, 5:8]                                # (blk, 3) f32

        # Single (blk, fused_v) selector: 5 disjoint one-hots + xyz values in 3 columns
        # + a ones column for the xyz bias.  gamma/beta rows get zero selector weight
        # (they are read directly for the LayerNorm below).
        col = lax.broadcasted_iota(jnp.int32, (blk, fused_v), 1)
        hit = ((col == ids + word_off)
               | (col == posid + pos_off)
               | (col == ttype + type_off)
               | (col == ortho + ortho_off)
               | (col == pocket + pocket_off)
               | (col == bias_row))
        sel = hit.astype(jnp.float32)
        sel = sel + jnp.where(col == xyz_off, xyz[:, 0:1], 0.0)
        sel = sel + jnp.where(col == xyz_off + 1, xyz[:, 1:2], 0.0)
        sel = sel + jnp.where(col == xyz_off + 2, xyz[:, 2:3], 0.0)

        # One fused MXU matmul = word + pos + type + ortho + pocket lookups
        #                        + xyz @ W^T + bias, accumulated in f32.
        emb = jnp.dot(sel, tab_ref[...], preferred_element_type=jnp.float32)

        # LayerNorm over the hidden (lane) axis; gamma fused into the scale.
        mu = jnp.mean(emb, axis=-1, keepdims=True)
        xc = emb - mu
        var = jnp.mean(xc * xc, axis=-1, keepdims=True)
        gamma = tab_ref[gamma_row:gamma_row + 1, :]
        beta = tab_ref[beta_row:beta_row + 1, :]
        out_ref[...] = (xc * (lax.rsqrt(var + ln_eps) * gamma) + beta).astype(out_ref.dtype)
        # TODO(synk): dropout(hidden_dropout_prob) is identity here (eval mode); training
        # dropout would need pltpu.prng_seed / pltpu.prng_random_bits masking.
    return kernel


# ---------------- wrapper ----------------
def residue_roberta_embeddings(input_ids, token_type_ids, xyz_position,
                               orthosteric_position, pocket_position, params,
                               blk_m=BLK_M):
    assert blk_m % 8 == 0
    bsz, seq = input_ids.shape
    hid = params['word'].shape[1]
    max_pos = params['pos'].shape[0]
    m = bsz * seq

    # create_position_ids_from_input_ids (trivial int cumsum, outside the kernel),
    # clamped to the position table size (PyTorch would raise on OOB; we clamp).
    mask = (input_ids != PAD_TOKEN_ID).astype(jnp.int32)
    pos_ids = jnp.cumsum(mask, axis=1) * mask + PAD_TOKEN_ID
    pos_ids = jnp.minimum(pos_ids, max_pos - 1)

    # ---- fused lookup table: [word | pos | type | ortho | pocket | xyz_W^T | xyz_b | gamma | beta]
    word_off = 0
    pos_off = word_off + params['word'].shape[0]
    type_off = pos_off + max_pos
    ortho_off = type_off + params['type'].shape[0]
    pocket_off = ortho_off + params['ortho'].shape[0]
    xyz_off = pocket_off + params['pocket'].shape[0]
    bias_row = xyz_off + 3
    gamma_row = bias_row + 1
    beta_row = gamma_row + 1
    fused_raw = beta_row + 1
    fused_v = _round_up(fused_raw, 8)

    fused_tab = jnp.concatenate([
        params['word'], params['pos'], params['type'],
        params['ortho'], params['pocket'],
        params['xyz_w'],                 # (3, H) = W^T of nn.Linear(3, H)
        params['xyz_b'][None, :],
        params['gamma'][None, :],
        params['beta'][None, :],
    ], axis=0).astype(jnp.float32)
    fused_tab = jnp.pad(fused_tab, ((0, fused_v - fused_raw), (0, 0)))
    # TODO(synk): at production vocab sizes (e.g. 50k x 768) the word rows must NOT live
    # in this VMEM-resident fused table — keep the word table in HBM (memory_space=pl.ANY)
    # and row-gather via scalar-prefetched ids / manual double-buffered DMA instead
    # (mandatory on v7x's 64 MiB VMEM).  bf16 tables/output (f32 accumulate in-kernel)
    # roughly halve HBM traffic at production sizes, most valuable on v5e.

    # ---- single packed per-row stream: (m_pad, 8) f32 = [ids, pos, type, ortho, pocket, x, y, z]
    n_blocks = int(pl.cdiv(m, blk_m))
    if n_blocks % 2:
        n_blocks += 1        # even block count -> balanced across v7x's 2 TensorCores
    m_pad = n_blocks * blk_m
    pad = m_pad - m

    def one_col(x, fill):
        x = x.reshape(m).astype(jnp.float32)
        if pad:
            x = jnp.concatenate([x, jnp.full((pad,), float(fill), jnp.float32)])
        return x[:, None]

    xyz_flat = xyz_position.reshape(m, 3).astype(jnp.float32)
    if pad:
        xyz_flat = jnp.concatenate([xyz_flat, jnp.zeros((pad, 3), jnp.float32)], axis=0)

    packed = jnp.concatenate([
        one_col(input_ids, PAD_TOKEN_ID),
        one_col(pos_ids, PAD_TOKEN_ID),
        one_col(token_type_ids, 0),
        one_col(orthosteric_position, 0),
        one_col(pocket_position, 0),
        xyz_flat,
    ], axis=1)                                            # (m_pad, 8) f32

    kernel = _make_kernel(word_off, pos_off, type_off, ortho_off, pocket_off,
                          xyz_off, bias_row, gamma_row, beta_row, fused_v, LN_EPS)

    out = pl.pallas_call(
        kernel,
        out_shape=jax.ShapeDtypeStruct((m_pad, hid), jnp.float32),
        grid=(n_blocks,),
        in_specs=[
            pl.BlockSpec((blk_m, 8), lambda i: (i, 0)),        # packed row stream
            pl.BlockSpec((fused_v, hid), lambda i: (0, 0)),    # fused table (grid-invariant)
        ],
        out_specs=pl.BlockSpec((blk_m, hid), lambda i: (i, 0)),
        compiler_params=pltpu.CompilerParams(
            dimension_semantics=("parallel",),
            vmem_limit_bytes=32 * 1024 * 1024),   # above v5e's 16 MiB default scoped limit
    )(packed, fused_tab)

    return out[:m].reshape(bsz, seq, hid)


# ---------------- pure-JAX reference (for verification only) ----------------
def reference(input_ids, token_type_ids, xyz_position, ortho, pocket, params):
    mask = (input_ids != PAD_TOKEN_ID).astype(jnp.int32)
    pos_ids = jnp.cumsum(mask, axis=1) * mask + PAD_TOKEN_ID
    pos_ids = jnp.minimum(pos_ids, params['pos'].shape[0] - 1)
    emb = params['word'][input_ids]
    emb = emb + params['type'][token_type_ids]
    emb = emb + params['pos'][pos_ids]
    emb = emb + xyz_position @ params['xyz_w'] + params['xyz_b']
    emb = emb + params['ortho'][ortho]
    emb = emb + params['pocket'][pocket]
    mu = emb.mean(-1, keepdims=True)
    var = ((emb - mu) ** 2).mean(-1, keepdims=True)
    return (emb - mu) / jnp.sqrt(var + LN_EPS) * params['gamma'] + params['beta']


# ---------------- main ----------------
if __name__ == "__main__":
    key = jax.random.PRNGKey(0)
    keys = jax.random.split(key, 10)

    # deterministic synthetic parameters (nn.Embedding padding_idx rows zeroed)
    word = 0.02 * jax.random.normal(keys[0], (VOCAB_SIZE, HIDDEN), jnp.float32)
    word = word.at[PAD_TOKEN_ID].set(0.0)
    pos = 0.02 * jax.random.normal(keys[1], (MAX_POS, HIDDEN), jnp.float32)
    pos = pos.at[PAD_TOKEN_ID].set(0.0)
    typ = 0.02 * jax.random.normal(keys[2], (TYPE_VOCAB, HIDDEN), jnp.float32)
    ortho_tab = 0.02 * jax.random.normal(keys[3], (3, HIDDEN), jnp.float32)
    ortho_tab = ortho_tab.at[0].set(0.0)
    pocket_tab = 0.02 * jax.random.normal(keys[4], (3, HIDDEN), jnp.float32)
    pocket_tab = pocket_tab.at[0].set(0.0)
    xyz_w = 0.1 * jax.random.normal(keys[5], (3, HIDDEN), jnp.float32)   # = W^T of nn.Linear(3, H)
    xyz_b = 0.1 * jax.random.normal(keys[6], (HIDDEN,), jnp.float32)
    gamma = jnp.ones((HIDDEN,), jnp.float32)
    beta = jnp.zeros((HIDDEN,), jnp.float32)

    params = dict(word=word, pos=pos, type=typ, ortho=ortho_tab,
                  pocket=pocket_tab, xyz_w=xyz_w, xyz_b=xyz_b,
                  gamma=gamma, beta=beta)

    # deterministic synthetic inputs
    input_ids = jax.random.randint(keys[7], (B, S), 0, VOCAB_SIZE, jnp.int32)
    input_ids = input_ids.at[1, -2:].set(PAD_TOKEN_ID)   # some padding tokens
    token_type_ids = jnp.zeros((B, S), jnp.int32)         # buffered token_type_ids (all zeros)
    xyz_position = jax.random.normal(keys[8], (B, S, 3), jnp.float32)
    ortho_pos = jax.random.randint(keys[9], (B, S), 0, 3, jnp.int32)
    pocket_pos = jax.random.randint(jax.random.fold_in(key, 99), (B, S), 0, 3, jnp.int32)

    out = residue_roberta_embeddings(input_ids, token_type_ids, xyz_position,
                                     ortho_pos, pocket_pos, params)
    out = jax.block_until_ready(out)

    ref = reference(input_ids, token_type_ids, xyz_position, ortho_pos,
                    pocket_pos, params)
    assert out.shape == (B, S, HIDDEN)
    assert jnp.allclose(out, ref, atol=2e-4, rtol=2e-4), "mismatch vs reference"

    print("KERNEL_OK")
</pallas_src>

<mosaic_0001>
module attributes {stable_mosaic.version = 11 : i64} {
  func.func @kernel(%arg0: i32, %arg1: memref<256x8xf32, #tpu.memory_space<vmem>>, %arg2: memref<64x32xf32, #tpu.memory_space<vmem>>, %arg3: memref<256x32xf32, #tpu.memory_space<vmem>>) attributes {dimension_semantics = [#tpu.dimension_semantics<parallel>], iteration_bounds = array<i64: 2>, scalar_prefetch = 0 : i64, scratch_operands = 0 : i64, tpu.core_type = #tpu.core_type<tc>, window_params = [{transform_indices = @transform_0, window_bounds = array<i64: 256, 8>}, {pipeline_mode = #tpu.pipeline_mode<synchronous>, transform_indices = @transform_1, window_bounds = array<i64: 64, 32>}, {transform_indices = @transform_2, window_bounds = array<i64: 256, 32>}]} {
    %c0 = arith.constant 0 : index
    %c0_0 = arith.constant 0 : index
    %0 = vector.load %arg1[%c0, %c0_0] : memref<256x8xf32, #tpu.memory_space<vmem>>, vector<256x8xf32>
    %1 = vector.extract_strided_slice %0 {offsets = [0, 0], sizes = [256, 1], strides = [1, 1]} : vector<256x8xf32> to vector<256x1xf32>
    %2 = arith.fptosi %1 : vector<256x1xf32> to vector<256x1xi32>
    %3 = vector.extract_strided_slice %0 {offsets = [0, 1], sizes = [256, 1], strides = [1, 1]} : vector<256x8xf32> to vector<256x1xf32>
    %4 = arith.fptosi %3 : vector<256x1xf32> to vector<256x1xi32>
    %5 = vector.extract_strided_slice %0 {offsets = [0, 2], sizes = [256, 1], strides = [1, 1]} : vector<256x8xf32> to vector<256x1xf32>
    %6 = arith.fptosi %5 : vector<256x1xf32> to vector<256x1xi32>
    %7 = vector.extract_strided_slice %0 {offsets = [0, 3], sizes = [256, 1], strides = [1, 1]} : vector<256x8xf32> to vector<256x1xf32>
    %8 = arith.fptosi %7 : vector<256x1xf32> to vector<256x1xi32>
    %9 = vector.extract_strided_slice %0 {offsets = [0, 4], sizes = [256, 1], strides = [1, 1]} : vector<256x8xf32> to vector<256x1xf32>
    %10 = arith.fptosi %9 : vector<256x1xf32> to vector<256x1xi32>
    %11 = vector.extract_strided_slice %0 {offsets = [0, 5], sizes = [256, 3], strides = [1, 1]} : vector<256x8xf32> to vector<256x3xf32>
    %12 = tpu.iota {dimensions = array<i32: 1>} : vector<256x64xi32>
    %c0_i32 = arith.constant 0 : i32
    %13 = vector.broadcast %c0_i32 : i32 to vector<256x1xi32>
    %14 = arith.addi %2, %13 : vector<256x1xi32>
    %15 = vector.broadcast %14 : vector<256x1xi32> to vector<256x64xi32>
    %16 = arith.cmpi eq, %12, %15 : vector<256x64xi32>
    %c16_i32 = arith.constant 16 : i32
    %17 = vector.broadcast %c16_i32 : i32 to vector<256x1xi32>
    %18 = arith.addi %4, %17 : vector<256x1xi32>
    %19 = vector.broadcast %18 : vector<256x1xi32> to vector<256x64xi32>
    %20 = arith.cmpi eq, %12, %19 : vector<256x64xi32>
    %21 = arith.ori %16, %20 : vector<256x64xi1>
    %c48_i32 = arith.constant 48 : i32
    %22 = vector.broadcast %c48_i32 : i32 to vector<256x1xi32>
    %23 = arith.addi %6, %22 : vector<256x1xi32>
    %24 = vector.broadcast %23 : vector<256x1xi32> to vector<256x64xi32>
    %25 = arith.cmpi eq, %12, %24 : vector<256x64xi32>
    %26 = arith.ori %21, %25 : vector<256x64xi1>
    %c50_i32 = arith.constant 50 : i32
    %27 = vector.broadcast %c50_i32 : i32 to vector<256x1xi32>
    %28 = arith.addi %8, %27 : vector<256x1xi32>
    %29 = vector.broadcast %28 : vector<256x1xi32> to vector<256x64xi32>
    %30 = arith.cmpi eq, %12, %29 : vector<256x64xi32>
    %31 = arith.ori %26, %30 : vector<256x64xi1>
    %c53_i32 = arith.constant 53 : i32
    %32 = vector.broadcast %c53_i32 : i32 to vector<256x1xi32>
    %33 = arith.addi %10, %32 : vector<256x1xi32>
    %34 = vector.broadcast %33 : vector<256x1xi32> to vector<256x64xi32>
    %35 = arith.cmpi eq, %12, %34 : vector<256x64xi32>
    %36 = arith.ori %31, %35 : vector<256x64xi1>
    %c59_i32 = arith.constant 59 : i32
    %37 = vector.broadcast %c59_i32 : i32 to vector<256x64xi32>
    %38 = arith.cmpi eq, %12, %37 : vector<256x64xi32>
    %39 = arith.ori %36, %38 : vector<256x64xi1>
    %40 = arith.extui %39 : vector<256x64xi1> to vector<256x64xi32>
    %41 = arith.sitofp %40 : vector<256x64xi32> to vector<256x64xf32>
    %c56_i32 = arith.constant 56 : i32
    %42 = vector.broadcast %c56_i32 : i32 to vector<256x64xi32>
    %43 = arith.cmpi eq, %12, %42 : vector<256x64xi32>
    %44 = vector.extract_strided_slice %11 {offsets = [0, 0], sizes = [256, 1], strides = [1, 1]} : vector<256x3xf32> to vector<256x1xf32>
    %cst = arith.constant 0.000000e+00 : f32
    %45 = vector.shape_cast %44 : vector<256x1xf32> to vector<256x1xf32>
    %46 = vector.broadcast %45 : vector<256x1xf32> to vector<256x64xf32>
    %47 = vector.broadcast %cst : f32 to vector<256x64xf32>
    %48 = arith.select %43, %46, %47 : vector<256x64xi1>, vector<256x64xf32>
    %49 = arith.addf %41, %48 : vector<256x64xf32>
    %c57_i32 = arith.constant 57 : i32
    %50 = vector.broadcast %c57_i32 : i32 to vector<256x64xi32>
    %51 = arith.cmpi eq, %12, %50 : vector<256x64xi32>
    %52 = vector.extract_strided_slice %11 {offsets = [0, 1], sizes = [256, 1], strides = [1, 1]} : vector<256x3xf32> to vector<256x1xf32>
    %cst_1 = arith.constant 0.000000e+00 : f32
    %53 = vector.shape_cast %52 : vector<256x1xf32> to vector<256x1xf32>
    %54 = vector.broadcast %53 : vector<256x1xf32> to vector<256x64xf32>
    %55 = vector.broadcast %cst_1 : f32 to vector<256x64xf32>
    %56 = arith.select %51, %54, %55 : vector<256x64xi1>, vector<256x64xf32>
    %57 = arith.addf %49, %56 : vector<256x64xf32>
    %c58_i32 = arith.constant 58 : i32
    %58 = vector.broadcast %c58_i32 : i32 to vector<256x64xi32>
    %59 = arith.cmpi eq, %12, %58 : vector<256x64xi32>
    %60 = vector.extract_strided_slice %11 {offsets = [0, 2], sizes = [256, 1], strides = [1, 1]} : vector<256x3xf32> to vector<256x1xf32>
    %cst_2 = arith.constant 0.000000e+00 : f32
    %61 = vector.shape_cast %60 : vector<256x1xf32> to vector<256x1xf32>
    %62 = vector.broadcast %61 : vector<256x1xf32> to vector<256x64xf32>
    %63 = vector.broadcast %cst_2 : f32 to vector<256x64xf32>
    %64 = arith.select %59, %62, %63 : vector<256x64xi1>, vector<256x64xf32>
    %65 = arith.addf %57, %64 : vector<256x64xf32>
    %c0_3 = arith.constant 0 : index
    %c0_4 = arith.constant 0 : index
    %66 = vector.load %arg2[%c0_3, %c0_4] : memref<64x32xf32, #tpu.memory_space<vmem>>, vector<64x32xf32>
    %cst_5 = arith.constant dense<0.000000e+00> : vector<256x32xf32>
    %67 = tpu.matmul %65, %66, %cst_5 {dimension_numbers = #tpu.dot_dimension_numbers<[1], [0], [0], [1], [0, 0, 1, 1], [], []>} : vector<256x64xf32>, vector<64x32xf32>, vector<256x32xf32> -> vector<256x32xf32>
    %cst_6 = arith.constant dense<0.000000e+00> : vector<256xf32>
    %68 = vector.multi_reduction <add>, %67, %cst_6 [1] : vector<256x32xf32> to vector<256xf32>
    %69 = vector.shape_cast %68 : vector<256xf32> to vector<256x1xf32>
    %cst_7 = arith.constant 3.200000e+01 : f32
    %70 = vector.broadcast %cst_7 : f32 to vector<256x1xf32>
    %71 = arith.divf %69, %70 : vector<256x1xf32>
    %72 = vector.broadcast %71 : vector<256x1xf32> to vector<256x32xf32>
    %73 = arith.subf %67, %72 : vector<256x32xf32>
    %74 = arith.mulf %73, %73 : vector<256x32xf32>
    %cst_8 = arith.constant dense<0.000000e+00> : vector<256xf32>
    %75 = vector.multi_reduction <add>, %74, %cst_8 [1] : vector<256x32xf32> to vector<256xf32>
    %76 = vector.shape_cast %75 : vector<256xf32> to vector<256x1xf32>
    %cst_9 = arith.constant 3.200000e+01 : f32
    %77 = vector.broadcast %cst_9 : f32 to vector<256x1xf32>
    %78 = arith.divf %76, %77 : vector<256x1xf32>
    %c60 = arith.constant 60 : index
    %c0_10 = arith.constant 0 : index
    %79 = vector.load %arg2[%c60, %c0_10] : memref<64x32xf32, #tpu.memory_space<vmem>>, vector<1x32xf32>
    %c61 = arith.constant 61 : index
    %c0_11 = arith.constant 0 : index
    %80 = vector.load %arg2[%c61, %c0_11] : memref<64x32xf32, #tpu.memory_space<vmem>>, vector<1x32xf32>
    %cst_12 = arith.constant 9.99999996E-13 : f32
    %81 = vector.broadcast %cst_12 : f32 to vector<256x1xf32>
    %82 = arith.addf %78, %81 : vector<256x1xf32>
    %83 = math.rsqrt %82 : vector<256x1xf32>
    %84 = vector.broadcast %83 : vector<256x1xf32> to vector<256x32xf32>
    %85 = vector.broadcast %79 : vector<1x32xf32> to vector<256x32xf32>
    %86 = arith.mulf %84, %85 : vector<256x32xf32>
    %87 = arith.mulf %73, %86 : vector<256x32xf32>
    %88 = vector.broadcast %80 : vector<1x32xf32> to vector<256x32xf32>
    %89 = arith.addf %87, %88 : vector<256x32xf32>
    %c0_13 = arith.constant 0 : index
    %c0_14 = arith.constant 0 : index
    %90 = vector.load %arg3[%c0_13, %c0_14] : memref<256x32xf32, #tpu.memory_space<vmem>>, vector<256x32xf32>
    tpu.vector_store %arg3[%c0_13, %c0_14], %89 {strides = array<i32>} : memref<256x32xf32, #tpu.memory_space<vmem>>, vector<256x32xf32>,
    return
  }
  func.func @transform_0(%arg0: i32) -> (i32, i32) {
    %c0_i32 = arith.constant 0 : i32
    %c0_i32_0 = arith.constant 0 : i32
    return %arg0, %c0_i32 : i32, i32
  }
  func.func @transform_1(%arg0: i32) -> (i32, i32) {
    %c0_i32 = arith.constant 0 : i32
    %c0_i32_0 = arith.constant 0 : i32
    %c0_i32_1 = arith.constant 0 : i32
    return %c0_i32, %c0_i32_0 : i32, i32
  }
  func.func @transform_2(%arg0: i32) -> (i32, i32) {
    %c0_i32 = arith.constant 0 : i32
    %c0_i32_0 = arith.constant 0 : i32
    return %arg0, %c0_i32 : i32, i32
  }
}

</mosaic_0001>

<bundles_post_ra>
// kernel: tpu_custom_call.1
= control target key start
LH: loop header
LB: loop body
LE: loop exit
PB: predicated region body
PF: predicated region fallthrough
CT: control target
= control target key end

     0   :  { %s3188_s9 = smov 0   ;;  %s5637_s0 = inlined_call_operand.vmem [shape: f32[512,8], index: 0, kind: input, shape index: {}]   ;;  %s5638_s1 = inlined_call_operand.vmem [shape: f32[64,32], index: 1, kind: input, shape index: {}]   ;;  %s5639_s2 = inlined_call_operand.vmem [shape: f32[512,32], index: 2, kind: output, shape index: {}]  }
   0x1 LB: > { %s2727_s10 = sadd.s32 4294967295, %s3162_s9   ;;  %p2731_p0 = scmp.ge.s32.totalorder %s3162_s9, 1  ;;  %s3162_s9 = sphi %s3188_s9, %s12_s9  }
   0x2   : > { %p113_p1 = scmp.lt.s32.totalorder %s3162_s9, 3 }
   0x4   : > { %p114_p2 = pnand %p2731_p0, %p113_p1 }
   0x6   : > { %117 = sbr.rel (%p114_p2) target bundleno = 1326 (0x52e), region = 28 }
   0xd   : > { %s2732_s11 = sshll.u32 %s2727_s10, 5  ;;  %v3164_v0 = vmov 0  }
   0xe   : > { %3014 = vset.pattern.permute.xlu1 %v3164_v0  ;;  %3013 = vset.pattern.permute.xlu0 %v3164_v0  ;;  %p136_p3 = scmp.lt.s32.totalorder %s2732_s11, 63 }
  0x10   : > { %s6181_s11 = smov (!%p136_p3, %s2732_s11), 63 }
  0x11   : > { %s2733_s12 = sshll.u32 %s6181_s11, 3 }
  0x12   : > { %s3204_s15 = scalar_lea.vmem %s5637_s0, %s2733_s12  ;;  %s5475_s13 = scalar_lea.vmem %s5639_s2, %s2733_s12 }
  0x13   : > { %v3207_v1 = vld [vmem:[%s3204_s15 + $0x10] sm:$0xff]  ;;  %v3210_v2 = vld [vmem:[%s3204_s15] sm:$0xff]  ;;  %v3213_v3 = vld [vmem:[%s3204_s15 + $0x18] sm:$0xff] }
  0x14   : > { %v2936_v4 = vtrunc.f32 %v3207_v1  ;;  %v2932_v5 = vtrunc.f32 %v3210_v2  ;;  %v2938_v6 = vtrunc.f32 %v3213_v3  ;;  %v3219_v7 = vld [vmem:[%s3204_s15 + $0x8] sm:$0xff]  ;;  %v3226_v10 = vld [vmem:[%s3204_s15 + $0x20] sm:$0xff]  ;;  %v3241_v17 = vld [vmem:[%s3204_s15 + $0x38] sm:$0xff] }
  0x15   : > { %v2934_v8 = vtrunc.f32 %v3219_v7  ;;  %v3223_v9 = vld [vmem:[%s3204_s15 + $0x28] sm:$0xff]  ;;  %v2940_v16 = vtrunc.f32 %v3226_v10  ;;  %v3244_v18 = vld [vmem:[%s3204_s15 + $0x30] sm:$0xff]  ;;  %v2946_v21 = vtrunc.f32 %v3241_v17  ;;  %v3258_v24 = vld [vmem:[%s3204_s15 + $0x40] sm:$0xff] }
  0x16   : > { %v3228_v11 = vcvt.f32.s32 %v2936_v4  ;;  %v3230_v12 = vcvt.f32.s32 %v2932_v5  ;;  %v3234_v13 = vcvt.f32.s32 %v2938_v6  ;;  %v2942_v15 = vtrunc.f32 %v3223_v9  ;;  %v3255_v23 = vld [vmem:[%s3204_s15 + $0x48] sm:$0xff]  ;;  %v3269_v29 = vld [vmem:[%s3204_s15 + $0x58] sm:$0xff]  ;;  %v157_v30 = vld [vmem:[%s3204_s15 + $0x50] sm:$0xff] }
  0x17   : > { %v3236_v14 = vcvt.f32.s32 %v2934_v8  ;;  %v3250_v20 = vcvt.f32.s32 %v2940_v16  ;;  %v2944_v22 = vtrunc.f32 %v3244_v18  ;;  %v3262_v25 = vcvt.f32.s32 %v2946_v21  ;;  %v160_v35 = vld [vmem:[%s3204_s15 + $0x68] sm:$0xff]  ;;  %v3281_v36 = vld [vmem:[%s3204_s15 + $0x60] sm:$0xff]  ;;  %v3291_v41 = vld [vmem:[%s3204_s15 + $0x78] sm:$0xff] }
  0x18   : > { %220 = vperm.xlu1 %3014, %v3228_v11   ;;  %214 = vperm.xlu0 %3013, %v3230_v12   ;;  %v3248_v19 = vcvt.f32.s32 %v2942_v15  ;;  %v2950_v27 = vtrunc.f32 %v3255_v23  ;;  %v2948_v28 = vtrunc.f32 %v3258_v24  ;;  %v2954_v33 = vtrunc.f32 %v3269_v29  ;;  %v161_v42 = vld [vmem:[%s3204_s15 + $0x70] sm:$0xff]  ;;  %v3302_v47 = vld [vmem:[%s3204_s15 + $0x88] sm:$0xff]  ;;  %v3305_v48 = vld [vmem:[%s3204_s15 + $0x80] sm:$0xff] }
  0x19   : > { %v3264_v26 = vcvt.f32.s32 %v2944_v22  ;;  %v2952_v34 = vtrunc.f32 %v157_v30  ;;  %v2958_v39 = vtrunc.f32 %v160_v35  ;;  %v2956_v40 = vtrunc.f32 %v3281_v36  ;;  %v3316_v53 = vld [vmem:[%s3204_s15 + $0x98] sm:$0xff]  ;;  %v3319_v54 = vld [vmem:[%s3204_s15 + $0x90] sm:$0xff]  ;;  %v168_v59 = vld [vmem:[%s3204_s15 + $0xa8] sm:$0xff] }
  0x1a   : > { %v3274_v31 = vcvt.f32.s32 %v2950_v27  ;;  %v3276_v32 = vcvt.f32.s32 %v2948_v28  ;;  %v3285_v37 = vcvt.f32.s32 %v2954_v33  ;;  %v2962_v45 = vtrunc.f32 %v3291_v41  ;;  %v167_v60 = vld [vmem:[%s3204_s15 + $0xa0] sm:$0xff]  ;;  %v170_v4 = vld [vmem:[%s3204_s15 + $0xb8] sm:$0xff]  ;;  %v169_v5 = vld [vmem:[%s3204_s15 + $0xb0] sm:$0xff] }
  0x1b   : > { %v3287_v38 = vcvt.f32.s32 %v2952_v34  ;;  %v3296_v43 = vcvt.f32.s32 %v2958_v39  ;;  %v3298_v44 = vcvt.f32.s32 %v2956_v40  ;;  %v2960_v46 = vtrunc.f32 %v161_v42  ;;  %v172_v21 = vld [vmem:[%s3204_s15 + $0xc8] sm:$0xff]  ;;  %v171_v22 = vld [vmem:[%s3204_s15 + $0xc0] sm:$0xff]  ;;  %v174_v34 = vld [vmem:[%s3204_s15 + $0xd8] sm:$0xff] }
  0x1c   : > { %223 = vperm.xlu1 %3014, %v3234_v13   ;;  %217 = vperm.xlu0 %3013, %v3236_v14   ;;  %v3309_v49 = vcvt.f32.s32 %v2962_v45  ;;  %v2966_v51 = vtrunc.f32 %v3302_v47  ;;  %v2964_v52 = vtrunc.f32 %v3305_v48  ;;  %v2970_v57 = vtrunc.f32 %v3316_v53  ;;  %v3355_v35 = vld [vmem:[%s3204_s15 + $0xd0] sm:$0xff] }
  0x1d   : > { %v3311_v50 = vcvt.f32.s32 %v2960_v46  ;;  %v2968_v58 = vtrunc.f32 %v3319_v54  ;;  %v2974_v63 = vtrunc.f32 %v168_v59  ;;  %v2972_v0 = vtrunc.f32 %v167_v60  ;;  %v3365_v46 = vld [vmem:[%s3204_s15 + $0xe8] sm:$0xff]  ;;  %v178_v60 = vld [vmem:[%s3204_s15 + $0xf8] sm:$0xff] }
  0x1e   : > { %v3323_v55 = vcvt.f32.s32 %v2966_v51  ;;  %v3325_v56 = vcvt.f32.s32 %v2964_v52  ;;  %v3333_v61 = vcvt.f32.s32 %v2970_v57  ;;  %v2978_v15 = vtrunc.f32 %v170_v4  ;;  %v175_v51 = vld [vmem:[%s3204_s15 + $0xe0] sm:$0xff] }
  0x1f   : > { %v3335_v62 = vcvt.f32.s32 %v2968_v58  ;;  %v3341_v6 = vcvt.f32.s32 %v2974_v63  ;;  %v3343_v8 = vcvt.f32.s32 %v2972_v0  ;;  %v2976_v16 = vtrunc.f32 %v169_v5  ;;  %v3377_v63 = vld [vmem:[%s3204_s15 + $0xf0] sm:$0xff] }
  0x20   : > { %229 = vperm.xlu1 %3014, %v3248_v19   ;;  %226 = vperm.xlu0 %3013, %v3250_v20   ;;  %v3349_v27 = vcvt.f32.s32 %v2978_v15  ;;  %v2982_v30 = vtrunc.f32 %v172_v21  ;;  %v2980_v33 = vtrunc.f32 %v171_v22  ;;  %v2986_v42 = vtrunc.f32 %v174_v34 }
  0x21   : > { %v3351_v28 = vcvt.f32.s32 %v2976_v16  ;;  %v2984_v45 = vtrunc.f32 %v3355_v35  ;;  %v2990_v58 = vtrunc.f32 %v3365_v46  ;;  %v2988_v59 = vtrunc.f32 %v175_v51 }
  0x22   : > { %v3359_v39 = vcvt.f32.s32 %v2982_v30  ;;  %v3361_v40 = vcvt.f32.s32 %v2980_v33  ;;  %v3370_v52 = vcvt.f32.s32 %v2986_v42  ;;  %v2994_v5 = vtrunc.f32 %v178_v60 }
  0x23   : > { %v3372_v57 = vcvt.f32.s32 %v2984_v45  ;;  %v3381_v0 = vcvt.f32.s32 %v2990_v58  ;;  %v3383_v4 = vcvt.f32.s32 %v2988_v59  ;;  %v2992_v15 = vtrunc.f32 %v3377_v63 }
  0x24   : > { %235 = vperm.xlu1 %3014, %v3262_v25   ;;  %232 = vperm.xlu0 %3013, %v3264_v26   ;;  %v3388_v16 = vcvt.f32.s32 %v2994_v5  ;;  %v342_v22 = vadd.s32 16, %v3236_v14  ;;  %v341_v30 = vadd.s32 16, %v3230_v12  ;;  %v3165_v33 = vmov 1  }
  0x25   : > { %v3390_v21 = vcvt.f32.s32 %v2992_v15  ;;  %v343_v34 = vadd.s32 16, %v3228_v11  ;;  %v344_v42 = vadd.s32 16, %v3234_v13  ;;  %v345_v45 = vadd.s32 16, %v3250_v20 }
  0x26   : > { %v346_v51 = vadd.s32 16, %v3248_v19  ;;  %v347_v58 = vadd.s32 16, %v3264_v26  ;;  %v348_v59 = vadd.s32 16, %v3262_v25  ;;  %v349_v60 = vadd.s32 16, %v3276_v32 }
  0x27   : > { %v350_v5 = vadd.s32 16, %v3274_v31  ;;  %v351_v15 = vadd.s32 16, %v3287_v38 }
  0x28   : > { %241 = vperm.xlu1 %3014, %v3274_v31   ;;  %238 = vperm.xlu0 %3013, %v3276_v32  }
  0x2c   : > { %247 = vperm.xlu1 %3014, %v3285_v37   ;;  %244 = vperm.xlu0 %3013, %v3287_v38  }
  0x30   : > { %253 = vperm.xlu1 %3014, %v3296_v43   ;;  %250 = vperm.xlu0 %3013, %v3298_v44  }
  0x34   : > { %259 = vperm.xlu1 %3014, %v3309_v49   ;;  %256 = vperm.xlu0 %3013, %v3311_v50  }
  0x38   : > { %265 = vperm.xlu1 %3014, %v3323_v55   ;;  %262 = vperm.xlu0 %3013, %v3325_v56  }
  0x3c   : > { %271 = vperm.xlu1 %3014, %v3333_v61   ;;  %268 = vperm.xlu0 %3013, %v3335_v62  }
  0x40   : > { %277 = vperm.xlu1 %3014, %v3341_v6   ;;  %274 = vperm.xlu0 %3013, %v3343_v8  }
  0x44   : > { %283 = vperm.xlu1 %3014, %v3349_v27   ;;  %280 = vperm.xlu0 %3013, %v3351_v28  }
  0x48   : > { %289 = vperm.xlu1 %3014, %v3359_v39   ;;  %286 = vperm.xlu0 %3013, %v3361_v40  }
  0x4c   : > { %295 = vperm.xlu1 %3014, %v3370_v52   ;;  %292 = vperm.xlu0 %3013, %v3372_v57  }
  0x50   : > { %301 = vperm.xlu1 %3014, %v3381_v0   ;;  %298 = vperm.xlu0 %3013, %v3383_v4  }
  0x54   : > { %307 = vperm.xlu1 %3014, %v3388_v16   ;;  %304 = vperm.xlu0 %3013, %v3390_v21  }
  0x58   : > { %3016 = vset.pattern.permute.xlu1 %v3165_v33  ;;  %3015 = vset.pattern.permute.xlu0 %v3165_v33  ;;  %v354_v33 = vadd.s32 16, %v3296_v43 }
  0x59   : > { %377 = vperm.xlu1 %3016, %v342_v22   ;;  %374 = vperm.xlu0 %3015, %v341_v30   ;;  %v352_v22 = vadd.s32 16, %v3285_v37  ;;  %v353_v30 = vadd.s32 16, %v3298_v44 }
  0x5d   : > { %380 = vperm.xlu1 %3016, %v343_v34   ;;  %383 = vperm.xlu0 %3015, %v344_v42   ;;  %v355_v34 = vadd.s32 16, %v3311_v50  ;;  %v356_v42 = vadd.s32 16, %v3309_v49 }
  0x61   : > { %386 = vperm.xlu1 %3016, %v345_v45   ;;  %389 = vperm.xlu0 %3015, %v346_v51   ;;  %v357_v45 = vadd.s32 16, %v3325_v56  ;;  %v358_v51 = vadd.s32 16, %v3323_v55 }
  0x65   : > { %392 = vperm.xlu1 %3016, %v347_v58   ;;  %395 = vperm.xlu0 %3015, %v348_v59   ;;  %v359_v58 = vadd.s32 16, %v3335_v62  ;;  %v360_v59 = vadd.s32 16, %v3333_v61 }
  0x69   : > { %398 = vperm.xlu1 %3016, %v349_v60   ;;  %401 = vperm.xlu0 %3015, %v350_v5   ;;  %v361_v60 = vadd.s32 16, %v3343_v8  ;;  %v362_v5 = vadd.s32 16, %v3341_v6 }
  0x6d   : > { %404 = vperm.xlu1 %3016, %v351_v15   ;;  %407 = vperm.xlu0 %3015, %v352_v22   ;;  %v363_v15 = vadd.s32 16, %v3351_v28  ;;  %v364_v22 = vadd.s32 16, %v3349_v27 }
  0x71   : > { %410 = vperm.xlu1 %3016, %v353_v30   ;;  %413 = vperm.xlu0 %3015, %v354_v33   ;;  %v365_v30 = vadd.s32 16, %v3361_v40  ;;  %v366_v33 = vadd.s32 16, %v3359_v39 }
  0x75   : > { %416 = vperm.xlu1 %3016, %v355_v34   ;;  %419 = vperm.xlu0 %3015, %v356_v42   ;;  %v367_v34 = vadd.s32 16, %v3372_v57  ;;  %v368_v42 = vadd.s32 16, %v3370_v52 }
  0x79   : > { %422 = vperm.xlu1 %3016, %v357_v45   ;;  %425 = vperm.xlu0 %3015, %v358_v51   ;;  %v369_v45 = vadd.s32 16, %v3383_v4  ;;  %v370_v51 = vadd.s32 16, %v3381_v0 }
  0x7d   : > { %428 = vperm.xlu1 %3016, %v359_v58   ;;  %431 = vperm.xlu0 %3015, %v360_v59   ;;  %v371_v58 = vadd.s32 16, %v3390_v21  ;;  %v372_v59 = vadd.s32 16, %v3388_v16 }
  0x81   : > { %434 = vperm.xlu1 %3016, %v361_v60   ;;  %437 = vperm.xlu0 %3015, %v362_v5   ;;  %v533_v60 = vadd.s32 48, %v3230_v12  ;;  %v534_v5 = vadd.s32 48, %v3236_v14 }
  0x85   : > { %440 = vperm.xlu1 %3016, %v363_v15   ;;  %443 = vperm.xlu0 %3015, %v364_v22  }
  0x89   : > { %446 = vperm.xlu1 %3016, %v365_v30   ;;  %449 = vperm.xlu0 %3015, %v366_v33   ;;  %v3166_v30 = vmov 2   ;;  %v535_v33 = vadd.s32 48, %v3228_v11 }
  0x8d   : > { %452 = vperm.xlu1 %3016, %v367_v34   ;;  %455 = vperm.xlu0 %3015, %v368_v42   ;;  %v537_v34 = vadd.s32 48, %v3250_v20 }
  0x91   : > { %458 = vperm.xlu1 %3016, %v369_v45   ;;  %461 = vperm.xlu0 %3015, %v370_v51   ;;  %v536_v51 = vadd.s32 48, %v3234_v13 }
  0x95   : > { %464 = vperm.xlu1 %3016, %v371_v58   ;;  %467 = vperm.xlu0 %3015, %v372_v59   ;;  %v539_v58 = vadd.s32 48, %v3264_v26 }
  0x97   : > { %v3428_v15 = vpop.permute.xlu1 %220  ;;  %v3430_v22 = vpop.permute.xlu0 %214 }
  0x98   : > { %5662 = vst [vmem:[#allocation2_spill] sm:$0xff] %v3428_v15 }
  0x99   : > { %3017 = vset.pattern.permute.xlu1 %v3166_v30  ;;  %3018 = vset.pattern.permute.xlu0 %v3166_v30 }
  0x9a   : > { %566 = vperm.xlu1 %3017, %v533_v60   ;;  %569 = vperm.xlu0 %3018, %v534_v5   ;;  %v538_v60 = vadd.s32 48, %v3248_v19  ;;  %v541_v5 = vadd.s32 48, %v3276_v32 }
  0x9b   : > { %v3434_v42 = vpop.permute.xlu1 %223  ;;  %v3436_v45 = vpop.permute.xlu0 %217 }
  0x9c   : > { %5663 = vst [vmem:[#allocation3_spill] sm:$0xff] %v3434_v42  ;;  %5664 = vst [vmem:[#allocation4_spill] sm:$0xff] %v3436_v45 }
  0x9e   : > { %572 = vperm.xlu1 %3017, %v535_v33   ;;  %578 = vperm.xlu0 %3018, %v537_v34   ;;  %v540_v33 = vadd.s32 48, %v3262_v25  ;;  %v543_v34 = vadd.s32 48, %v3287_v38 }
  0x9f   : > { %v3440_v59 = vpop.permute.xlu1 %229  ;;  %v3442_v15 = vpop.permute.xlu0 %226 }
  0xa0   : > { %5665 = vst [vmem:[#allocation5_spill] sm:$0xff] %v3440_v59  ;;  %5666 = vst [vmem:[#allocation6_spill] sm:$0xff] %v3442_v15 }
  0xa2   : > { %575 = vperm.xlu1 %3017, %v536_v51   ;;  %584 = vperm.xlu0 %3018, %v539_v58   ;;  %v542_v51 = vadd.s32 48, %v3274_v31  ;;  %v545_v58 = vadd.s32 48, %v3298_v44 }
  0xa3   : > { %v3446_v30 = vpop.permute.xlu1 %235  ;;  %v3448_v42 = vpop.permute.xlu0 %232 }
  0xa4   : > { %5667 = vst [vmem:[#allocation7_spill] sm:$0xff] %v3446_v30  ;;  %5668 = vst [vmem:[#allocation8_spill] sm:$0xff] %v3448_v42 }
  0xa6   : > { %581 = vperm.xlu1 %3017, %v538_v60   ;;  %590 = vperm.xlu0 %3018, %v541_v5   ;;  %v544_v60 = vadd.s32 48, %v3285_v37  ;;  %v547_v5 = vadd.s32 48, %v3311_v50 }
  0xa7   : > { %v3452_v45 = vpop.permute.xlu1 %241  ;;  %v3454_v59 = vpop.permute.xlu0 %238 }
  0xa8   : > { %5669 = vst [vmem:[#allocation9_spill] sm:$0xff] %v3452_v45  ;;  %5670 = vst [vmem:[#allocation10_spill] sm:$0xff] %v3454_v59 }
  0xaa   : > { %587 = vperm.xlu1 %3017, %v540_v33   ;;  %596 = vperm.xlu0 %3018, %v543_v34   ;;  %v546_v33 = vadd.s32 48, %v3296_v43  ;;  %v549_v34 = vadd.s32 48, %v3325_v56 }
  0xab   : > { %v3458_v15 = vpop.permute.xlu1 %247  ;;  %v3460_v30 = vpop.permute.xlu0 %244 }
  0xac   : > { %5671 = vst [vmem:[#allocation11_spill] sm:$0xff] %v3458_v15  ;;  %5672 = vst [vmem:[#allocation12_spill] sm:$0xff] %v3460_v30 }
  0xae   : > { %593 = vperm.xlu1 %3017, %v542_v51   ;;  %602 = vperm.xlu0 %3018, %v545_v58   ;;  %v548_v51 = vadd.s32 48, %v3309_v49  ;;  %v551_v58 = vadd.s32 48, %v3335_v62 }
  0xaf   : > { %v3464_v42 = vpop.permute.xlu1 %253  ;;  %v3466_v45 = vpop.permute.xlu0 %250 }
  0xb0   : > { %5673 = vst [vmem:[#allocation13_spill] sm:$0xff] %v3464_v42  ;;  %5674 = vst [vmem:[#allocation14_spill] sm:$0xff] %v3466_v45 }
  0xb2   : > { %599 = vperm.xlu1 %3017, %v544_v60   ;;  %608 = vperm.xlu0 %3018, %v547_v5   ;;  %v550_v60 = vadd.s32 48, %v3323_v55  ;;  %v553_v5 = vadd.s32 48, %v3343_v8 }
  0xb3   : > { %v3470_v59 = vpop.permute.xlu1 %259  ;;  %v3472_v15 = vpop.permute.xlu0 %256 }
  0xb4   : > { %5675 = vst [vmem:[#allocation15_spill] sm:$0xff] %v3470_v59  ;;  %5676 = vst [vmem:[#allocation16_spill] sm:$0xff] %v3472_v15 }
  0xb6   : > { %605 = vperm.xlu1 %3017, %v546_v33   ;;  %614 = vperm.xlu0 %3018, %v549_v34   ;;  %v552_v33 = vadd.s32 48, %v3333_v61  ;;  %v555_v34 = vadd.s32 48, %v3351_v28 }
  0xb7   : > { %v3476_v30 = vpop.permute.xlu1 %265  ;;  %v3478_v42 = vpop.permute.xlu0 %262 }
  0xb8   : > { %5677 = vst [vmem:[#allocation17_spill] sm:$0xff] %v3476_v30  ;;  %5678 = vst [vmem:[#allocation18_spill] sm:$0xff] %v3478_v42 }
  0xba   : > { %611 = vperm.xlu1 %3017, %v548_v51   ;;  %620 = vperm.xlu0 %3018, %v551_v58   ;;  %v554_v51 = vadd.s32 48, %v3341_v6  ;;  %v557_v58 = vadd.s32 48, %v3361_v40 }
  0xbb   : > { %v3482_v45 = vpop.permute.xlu1 %271  ;;  %v3484_v59 = vpop.permute.xlu0 %268 }
  0xbc   : > { %5679 = vst [vmem:[#allocation19_spill] sm:$0xff] %v3482_v45  ;;  %5680 = vst [vmem:[#allocation20_spill] sm:$0xff] %v3484_v59 }
  0xbe   : > { %617 = vperm.xlu1 %3017, %v550_v60   ;;  %626 = vperm.xlu0 %3018, %v553_v5   ;;  %v556_v60 = vadd.s32 48, %v3349_v27  ;;  %v559_v5 = vadd.s32 48, %v3372_v57 }
  0xbf   : > { %v3488_v15 = vpop.permute.xlu1 %277  ;;  %v3490_v30 = vpop.permute.xlu0 %274 }
  0xc0   : > { %5681 = vst [vmem:[#allocation21_spill] sm:$0xff] %v3488_v15  ;;  %5682 = vst [vmem:[#allocation22_spill] sm:$0xff] %v3490_v30 }
  0xc2   : > { %623 = vperm.xlu1 %3017, %v552_v33   ;;  %632 = vperm.xlu0 %3018, %v555_v34   ;;  %v558_v33 = vadd.s32 48, %v3359_v39  ;;  %v561_v34 = vadd.s32 48, %v3383_v4 }
  0xc3   : > { %v3494_v42 = vpop.permute.xlu1 %283  ;;  %v3496_v45 = vpop.permute.xlu0 %280 }
  0xc4   : > { %5683 = vst [vmem:[#allocation23_spill] sm:$0xff] %v3494_v42  ;;  %5684 = vst [vmem:[#allocation24_spill] sm:$0xff] %v3496_v45 }
  0xc6   : > { %629 = vperm.xlu1 %3017, %v554_v51   ;;  %638 = vperm.xlu0 %3018, %v557_v58   ;;  %v560_v51 = vadd.s32 48, %v3370_v52  ;;  %v563_v58 = vadd.s32 48, %v3390_v21 }
  0xc7   : > { %v3500_v59 = vpop.permute.xlu1 %289  ;;  %v3502_v15 = vpop.permute.xlu0 %286 }
  0xc8   : > { %5685 = vst [vmem:[#allocation25_spill] sm:$0xff] %v3500_v59  ;;  %5686 = vst [vmem:[#allocation26_spill] sm:$0xff] %v3502_v15 }
  0xca   : > { %635 = vperm.xlu1 %3017, %v556_v60   ;;  %644 = vperm.xlu0 %3018, %v559_v5   ;;  %v562_v60 = vadd.s32 48, %v3381_v0 }
  0xcb   : > { %v3506_v30 = vpop.permute.xlu1 %295  ;;  %v3508_v42 = vpop.permute.xlu0 %292 }
  0xcc   : > { %5687 = vst [vmem:[#allocation27_spill] sm:$0xff] %v3506_v30  ;;  %5688 = vst [vmem:[#allocation28_spill] sm:$0xff] %v3508_v42  ;;  %v725_v30 = vadd.s32 50, %v3230_v12 }
  0xce   : > { %641 = vperm.xlu1 %3017, %v558_v33   ;;  %650 = vperm.xlu0 %3018, %v561_v34   ;;  %v3167_v33 = vmov 3   ;;  %v564_v34 = vadd.s32 48, %v3388_v16 }
  0xcf   : > { %v3512_v45 = vpop.permute.xlu1 %301  ;;  %v3514_v59 = vpop.permute.xlu0 %298 }
  0xd0   : > { %5689 = vst [vmem:[#allocation29_spill] sm:$0xff] %v3512_v45  ;;  %5690 = vst [vmem:[#allocation30_spill] sm:$0xff] %v3514_v59  ;;  %v728_v45 = vadd.s32 50, %v3234_v13  ;;  %v732_v59 = vadd.s32 50, %v3262_v25 }
  0xd2   : > { %647 = vperm.xlu1 %3017, %v560_v51   ;;  %656 = vperm.xlu0 %3018, %v563_v58   ;;  %v726_v58 = vadd.s32 50, %v3236_v14 }
  0xd3   : > { %v3517_v5 = vpop.permute.xlu1 %307  ;;  %v3519_v15 = vpop.permute.xlu0 %304 }
  0xd4   : > { %5691 = vst [vmem:[#allocation31_spill] sm:$0xff] %v3517_v5  ;;  %5692 = vst [vmem:[#allocation32_spill] sm:$0xff] %v3519_v15  ;;  %v730_v5 = vadd.s32 50, %v3248_v19 }
  0xd6   : > { %653 = vperm.xlu1 %3017, %v562_v60   ;;  %3019 = vset.pattern.permute.xlu0 %v3167_v33 }
  0xd7   : > { %758 = vperm.xlu0 %3019, %v725_v30   ;;  %v727_v30 = vadd.s32 50, %v3228_v11 }
  0xd8   : > { %v3524_v42 = vpop.permute.xlu1 %377  ;;  %v3526_v51 = vpop.permute.xlu0 %374 }
  0xd9   : > { %5693 = vst [vmem:[#allocation33_spill] sm:$0xff] %v3524_v42  ;;  %5694 = vst [vmem:[#allocation34_spill] sm:$0xff] %v3526_v51 }
  0xda   : > { %659 = vperm.xlu1 %3017, %v564_v34   ;;  %v734_v34 = vadd.s32 50, %v3274_v31 }
  0xdb   : > { %767 = vperm.xlu0 %3019, %v728_v45   ;;  %v729_v45 = vadd.s32 50, %v3250_v20 }
  0xdc   : > { %v3530_v15 = vpop.permute.xlu1 %380  ;;  %v3532_v60 = vpop.permute.xlu0 %383 }
  0xdd   : > { %5695 = vst [vmem:[#allocation35_spill] sm:$0xff] %v3530_v15  ;;  %5696 = vst [vmem:[#allocation36_spill] sm:$0xff] %v3532_v60 }
  0xde   : > { %3020 = vset.pattern.permute.xlu1 %v3167_v33  ;;  %v736_v33 = vadd.s32 50, %v3285_v37 }
  0xdf   : > { %761 = vperm.xlu1 %3020, %v726_v58   ;;  %773 = vperm.xlu0 %3019, %v730_v5   ;;  %v731_v5 = vadd.s32 50, %v3264_v26 }
  0xe0   : > { %v3536_v42 = vpop.permute.xlu1 %386  ;;  %v3538_v51 = vpop.permute.xlu0 %389 }
  0xe1   : > { %5697 = vst [vmem:[#allocation37_spill] sm:$0xff] %v3536_v42  ;;  %5698 = vst [vmem:[#allocation38_spill] sm:$0xff] %v3538_v51 }
  0xe3   : > { %764 = vperm.xlu1 %3020, %v727_v30   ;;  %779 = vperm.xlu0 %3019, %v732_v59   ;;  %v733_v59 = vadd.s32 50, %v3276_v32  ;;  %v738_v30 = vadd.s32 50, %v3296_v43 }
  0xe4   : > { %v3542_v15 = vpop.permute.xlu1 %392  ;;  %v3544_v60 = vpop.permute.xlu0 %395 }
  0xe5   : > { %5699 = vst [vmem:[#allocation39_spill] sm:$0xff] %v3542_v15  ;;  %5700 = vst [vmem:[#allocation40_spill] sm:$0xff] %v3544_v60 }
  0xe7   : > { %770 = vperm.xlu1 %3020, %v729_v45   ;;  %785 = vperm.xlu0 %3019, %v734_v34   ;;  %v735_v45 = vadd.s32 50, %v3287_v38  ;;  %v740_v34 = vadd.s32 50, %v3309_v49 }
  0xe8   : > { %v3548_v58 = vpop.permute.xlu1 %398  ;;  %v3550_v42 = vpop.permute.xlu0 %401 }
  0xe9   : > { %5701 = vst [vmem:[#allocation41_spill] sm:$0xff] %v3548_v58  ;;  %5702 = vst [vmem:[#allocation42_spill] sm:$0xff] %v3550_v42 }
  0xeb   : > { %776 = vperm.xlu1 %3020, %v731_v5   ;;  %791 = vperm.xlu0 %3019, %v736_v33   ;;  %v737_v5 = vadd.s32 50, %v3298_v44  ;;  %v742_v33 = vadd.s32 50, %v3323_v55 }
  0xec   : > { %v3554_v51 = vpop.permute.xlu1 %404  ;;  %v3556_v15 = vpop.permute.xlu0 %407 }
  0xed   : > { %5703 = vst [vmem:[#allocation43_spill] sm:$0xff] %v3554_v51  ;;  %5704 = vst [vmem:[#allocation44_spill] sm:$0xff] %v3556_v15 }
  0xef   : > { %782 = vperm.xlu1 %3020, %v733_v59   ;;  %797 = vperm.xlu0 %3019, %v738_v30   ;;  %v739_v59 = vadd.s32 50, %v3311_v50  ;;  %v744_v30 = vadd.s32 50, %v3333_v61 }
  0xf0   : > { %v3560_v60 = vpop.permute.xlu1 %410  ;;  %v3562_v58 = vpop.permute.xlu0 %413 }
  0xf1   : > { %5705 = vst [vmem:[#allocation45_spill] sm:$0xff] %v3560_v60  ;;  %5706 = vst [vmem:[#allocation46_spill] sm:$0xff] %v3562_v58 }
  0xf3   : > { %788 = vperm.xlu1 %3020, %v735_v45   ;;  %803 = vperm.xlu0 %3019, %v740_v34   ;;  %v741_v45 = vadd.s32 50, %v3325_v56  ;;  %v746_v34 = vadd.s32 50, %v3341_v6 }
  0xf4   : > { %v3566_v42 = vpop.permute.xlu1 %416  ;;  %v3568_v51 = vpop.permute.xlu0 %419 }
  0xf5   : > { %5707 = vst [vmem:[#allocation47_spill] sm:$0xff] %v3566_v42  ;;  %5708 = vst [vmem:[#allocation48_spill] sm:$0xff] %v3568_v51 }
  0xf7   : > { %794 = vperm.xlu1 %3020, %v737_v5   ;;  %809 = vperm.xlu0 %3019, %v742_v33   ;;  %v743_v5 = vadd.s32 50, %v3335_v62  ;;  %v748_v33 = vadd.s32 50, %v3349_v27 }
  0xf8   : > { %v3572_v15 = vpop.permute.xlu1 %422  ;;  %v3574_v60 = vpop.permute.xlu0 %425 }
  0xf9   : > { %5709 = vst [vmem:[#allocation49_spill] sm:$0xff] %v3572_v15  ;;  %5710 = vst [vmem:[#allocation50_spill] sm:$0xff] %v3574_v60 }
  0xfb   : > { %800 = vperm.xlu1 %3020, %v739_v59   ;;  %815 = vperm.xlu0 %3019, %v744_v30   ;;  %v745_v59 = vadd.s32 50, %v3343_v8  ;;  %v750_v30 = vadd.s32 50, %v3359_v39 }
  0xfc   : > { %v3578_v58 = vpop.permute.xlu1 %428  ;;  %v3580_v42 = vpop.permute.xlu0 %431 }
  0xfd   : > { %5711 = vst [vmem:[#allocation51_spill] sm:$0xff] %v3578_v58  ;;  %5712 = vst [vmem:[#allocation52_spill] sm:$0xff] %v3580_v42 }
  0xff   : > { %806 = vperm.xlu1 %3020, %v741_v45   ;;  %821 = vperm.xlu0 %3019, %v746_v34   ;;  %v747_v45 = vadd.s32 50, %v3351_v28  ;;  %v752_v34 = vadd.s32 50, %v3370_v52 }
 0x100   : > { %v3584_v51 = vpop.permute.xlu1 %434  ;;  %v3586_v15 = vpop.permute.xlu0 %437 }
 0x101   : > { %5713 = vst [vmem:[#allocation53_spill] sm:$0xff] %v3584_v51  ;;  %5714 = vst [vmem:[#allocation54_spill] sm:$0xff] %v3586_v15 }
 0x103   : > { %812 = vperm.xlu1 %3020, %v743_v5   ;;  %827 = vperm.xlu0 %3019, %v748_v33   ;;  %v749_v5 = vadd.s32 50, %v3361_v40  ;;  %v754_v33 = vadd.s32 50, %v3381_v0 }
 0x104   : > { %v3590_v60 = vpop.permute.xlu1 %440  ;;  %v3592_v58 = vpop.permute.xlu0 %443 }
 0x105   : > { %5715 = vst [vmem:[#allocation55_spill] sm:$0xff] %v3590_v60  ;;  %5716 = vst [vmem:[#allocation56_spill] sm:$0xff] %v3592_v58 }
 0x107   : > { %818 = vperm.xlu1 %3020, %v745_v59   ;;  %833 = vperm.xlu0 %3019, %v750_v30   ;;  %v751_v59 = vadd.s32 50, %v3372_v57  ;;  %v756_v30 = vadd.s32 50, %v3388_v16 }
 0x108   : > { %v3596_v42 = vpop.permute.xlu1 %446  ;;  %v3598_v51 = vpop.permute.xlu0 %449 }
 0x109   : > { %5717 = vst [vmem:[#allocation57_spill] sm:$0xff] %v3596_v42  ;;  %5718 = vst [vmem:[#allocation58_spill] sm:$0xff] %v3598_v51 }
 0x10b   : > { %824 = vperm.xlu1 %3020, %v747_v45   ;;  %839 = vperm.xlu0 %3019, %v752_v34   ;;  %v753_v45 = vadd.s32 50, %v3383_v4 }
 0x10c   : > { %v3602_v15 = vpop.permute.xlu1 %452  ;;  %v3604_v60 = vpop.permute.xlu0 %455 }
 0x10d   : > { %5719 = vst [vmem:[#allocation59_spill] sm:$0xff] %v3602_v15  ;;  %5720 = vst [vmem:[#allocation60_spill] sm:$0xff] %v3604_v60  ;;  %v918_v60 = vadd.s32 53, %v3236_v14 }
 0x10f   : > { %830 = vperm.xlu1 %3020, %v749_v5   ;;  %845 = vperm.xlu0 %3019, %v754_v33   ;;  %v3168_v5 = vmov 4   ;;  %v755_v33 = vadd.s32 50, %v3390_v21 }
 0x110   : > { %v3608_v58 = vpop.permute.xlu1 %458  ;;  %v3610_v42 = vpop.permute.xlu0 %461 }
 0x111   : > { %5721 = vst [vmem:[#allocation61_spill] sm:$0xff] %v3608_v58  ;;  %5722 = vst [vmem:[#allocation62_spill] sm:$0xff] %v3610_v42  ;;  %v921_v58 = vadd.s32 53, %v3250_v20  ;;  %v925_v20 = vadd.s32 53, %v3276_v32  ;;  %v929_v32 = vadd.s32 53, %v3298_v44  ;;  %v933_v44 = vadd.s32 53, %v3325_v56 }
 0x112   : > { %v937_v56 = vadd.s32 53, %v3343_v8  ;;  %v941_v8 = vadd.s32 53, %v3361_v40  ;;  %v945_v40 = vadd.s32 53, %v3383_v4 }
 0x113   : > { %836 = vperm.xlu1 %3020, %v751_v59   ;;  %851 = vperm.xlu0 %3019, %v756_v30   ;;  %v917_v30 = vadd.s32 53, %v3230_v12  ;;  %v920_v12 = vadd.s32 53, %v3234_v13  ;;  %v924_v13 = vadd.s32 53, %v3262_v25  ;;  %v928_v25 = vadd.s32 53, %v3285_v37 }
 0x114   : > { %v3613_v34 = vpop.permute.xlu1 %464  ;;  %v3615_v51 = vpop.permute.xlu0 %467  ;;  %v932_v37 = vadd.s32 53, %v3309_v49  ;;  %v936_v49 = vadd.s32 53, %v3333_v61  ;;  %v940_v61 = vadd.s32 53, %v3349_v27  ;;  %v944_v27 = vadd.s32 53, %v3370_v52 }
 0x115   : > { %5723 = vst [vmem:[#allocation63_spill] sm:$0xff] %v3613_v34  ;;  %5724 = vst [vmem:[#allocation64_spill] sm:$0xff] %v3615_v51  ;;  %v923_v51 = vadd.s32 53, %v3264_v26  ;;  %v927_v26 = vadd.s32 53, %v3287_v38  ;;  %v931_v38 = vadd.s32 53, %v3311_v50  ;;  %v935_v50 = vadd.s32 53, %v3335_v62 }
 0x116   : > { %v939_v62 = vadd.s32 53, %v3351_v28  ;;  %v943_v28 = vadd.s32 53, %v3372_v57  ;;  %v947_v57 = vadd.s32 53, %v3390_v21 }
 0x117   : > { %842 = vperm.xlu1 %3020, %v753_v45   ;;  %3022 = vset.pattern.permute.xlu0 %v3168_v5 }
 0x118   : > { %953 = vperm.xlu0 %3022, %v918_v60   ;;  %v919_v60 = vadd.s32 53, %v3228_v11  ;;  %v922_v11 = vadd.s32 53, %v3248_v19  ;;  %v926_v19 = vadd.s32 53, %v3274_v31  ;;  %v930_v31 = vadd.s32 53, %v3296_v43 }
 0x119   : > { %v3620_v15 = vpop.permute.xlu1 %566  ;;  %v3622_v59 = vpop.permute.xlu0 %569  ;;  %v934_v43 = vadd.s32 53, %v3323_v55  ;;  %v938_v55 = vadd.s32 53, %v3341_v6  ;;  %v942_v6 = vadd.s32 53, %v3359_v39 }
 0x11b   : > { %848 = vperm.xlu1 %3020, %v755_v33  }
 0x11c   : > { %962 = vperm.xlu0 %3022, %v921_v58  }
 0x11d   : > { %v3626_v34 = vpop.permute.xlu1 %572  ;;  %v3628_v14 = vpop.permute.xlu0 %578 }
 0x11f   : > { %3021 = vset.pattern.permute.xlu1 %v3168_v5 }
 0x120   : > { %950 = vperm.xlu1 %3021, %v917_v30   ;;  %968 = vperm.xlu0 %3022, %v923_v51  }
 0x121   : > { %v3632_v45 = vpop.permute.xlu1 %575  ;;  %v3634_v42 = vpop.permute.xlu0 %584 }
 0x124   : > { %956 = vperm.xlu1 %3021, %v919_v60   ;;  %974 = vperm.xlu0 %3022, %v925_v20  }
 0x125   : > { %v3638_v58 = vpop.permute.xlu1 %581  ;;  %v3640_v33 = vpop.permute.xlu0 %590 }
 0x126   : > { %5725 = vst [vmem:[#allocation65_spill] sm:$0xff] %v3640_v33 }
 0x128   : > { %959 = vperm.xlu1 %3021, %v920_v12   ;;  %980 = vperm.xlu0 %3022, %v927_v26  }
 0x129   : > { %v3644_v51 = vpop.permute.xlu1 %587  ;;  %v3646_v5 = vpop.permute.xlu0 %596 }
 0x12a   : > { %5726 = vst [vmem:[#allocation66_spill] sm:$0xff] %v3644_v51  ;;  %5727 = vst [vmem:[#allocation67_spill] sm:$0xff] %v3646_v5  ;;  %v3136_v5 = vld [vmem:[%s3204_s15 + $0xa0] sm:$0xff]  ;;  %v211_v51 = vlaneseq }
 0x12c   : > { %965 = vperm.xlu1 %3021, %v922_v11   ;;  %986 = vperm.xlu0 %3022, %v929_v32  }
 0x12d   : > { %v3650_v30 = vpop.permute.xlu1 %593  ;;  %v3652_v60 = vpop.permute.xlu0 %602 }
 0x12e   : > { %5728 = vst [vmem:[#allocation68_spill] sm:$0xff] %v3650_v30  ;;  %5729 = vst [vmem:[#allocation69_spill] sm:$0xff] %v3652_v60  ;;  %v3140_v30 = vld [vmem:[%s3204_s15 + $0x28] sm:$0xff] }
 0x130   : > { %971 = vperm.xlu1 %3021, %v924_v13   ;;  %992 = vperm.xlu0 %3022, %v931_v38  }
 0x131   : > { %v3656_v20 = vpop.permute.xlu1 %599  ;;  %v3658_v12 = vpop.permute.xlu0 %608 }
 0x132   : > { %5730 = vst [vmem:[#allocation70_spill] sm:$0xff] %v3656_v20  ;;  %5731 = vst [vmem:[#allocation71_spill] sm:$0xff] %v3658_v12  ;;  %v1820_v12 = vld [vmem:[%s5638_s1 + $0x18] sm:$0xff]  ;;  %v5765_v20 = vmov 5  }
 0x134   : > { %977 = vperm.xlu1 %3021, %v926_v19   ;;  %998 = vperm.xlu0 %3022, %v933_v44  }
 0x135   : > { %v3662_v26 = vpop.permute.xlu1 %605  ;;  %v3664_v11 = vpop.permute.xlu0 %614 }
 0x136   : > { %5732 = vst [vmem:[#allocation72_spill] sm:$0xff] %v3662_v26 }
 0x138   : > { %983 = vperm.xlu1 %3021, %v928_v25   ;;  %1004 = vperm.xlu0 %3022, %v935_v50  }
 0x139   : > { %v3668_v32 = vpop.permute.xlu1 %611  ;;  %v3670_v13 = vpop.permute.xlu0 %620 }
 0x13a   : > { %5733 = vst [vmem:[#allocation73_spill] sm:$0xff] %v3668_v32 }
 0x13c   : > { %989 = vperm.xlu1 %3021, %v930_v31   ;;  %1010 = vperm.xlu0 %3022, %v937_v56  }
 0x13d   : > { %v3674_v38 = vpop.permute.xlu1 %617  ;;  %v3676_v19 = vpop.permute.xlu0 %626 }
 0x140   : > { %995 = vperm.xlu1 %3021, %v932_v37   ;;  %1016 = vperm.xlu0 %3022, %v939_v62  }
 0x141   : > { %v3680_v44 = vpop.permute.xlu1 %623  ;;  %v3682_v25 = vpop.permute.xlu0 %632 }
 0x142   : > { %5734 = vst [vmem:[#allocation74_spill] sm:$0xff] %v3682_v25  ;;  %v3995_v25 = vld [vmem:[%s3204_s15 + $0xf8] sm:$0xff] }
 0x143   : > { %5791 = vst [vmem:[#allocation128_spill] sm:$0xff] %v3995_v25 }
 0x144   : > { %1001 = vperm.xlu1 %3021, %v934_v43   ;;  %1022 = vperm.xlu0 %3022, %v941_v8  }
 0x145   : > { %v3686_v50 = vpop.permute.xlu1 %629  ;;  %v3688_v31 = vpop.permute.xlu0 %638 }
 0x146   : > { %5735 = vst [vmem:[#allocation75_spill] sm:$0xff] %v3688_v31 }
 0x148   : > { %1007 = vperm.xlu1 %3021, %v936_v49   ;;  %1028 = vperm.xlu0 %3022, %v943_v28   ;;  %v5643_v49 = vmov 5  }
 0x149   : > { %v3692_v56 = vpop.permute.xlu1 %635  ;;  %v3694_v37 = vpop.permute.xlu0 %644 }
 0x14a   : > { %5736 = vst [vmem:[#allocation76_spill] sm:$0xff] %v3692_v56  ;;  %5737 = vst [vmem:[#allocation77_spill] sm:$0xff] %v3694_v37  ;;  %v5767_v37 = vmov 7   ;;  %v3970_v56 = vld [vmem:[%s3204_s15 + $0x58] sm:$0xff] }
 0x14c   : > { %1013 = vperm.xlu1 %3021, %v938_v55   ;;  %1034 = vperm.xlu0 %3022, %v945_v40   ;;  %v946_v55 = vadd.s32 53, %v3381_v0 }
 0x14d   : > { %v3698_v62 = vpop.permute.xlu1 %641  ;;  %v3700_v43 = vpop.permute.xlu0 %650 }
 0x14e   : > { %5738 = vst [vmem:[#allocation78_spill] sm:$0xff] %v3698_v62  ;;  %5739 = vst [vmem:[#allocation79_spill] sm:$0xff] %v3700_v43  ;;  %v3815_v43 = vld [vmem:[%s3204_s15 + $0x18] sm:$0xff] }
 0x150   : > { %1019 = vperm.xlu1 %3021, %v940_v61   ;;  %1040 = vperm.xlu0 %3022, %v947_v57   ;;  %v948_v61 = vadd.s32 53, %v3388_v16 }
 0x151   : > { %v3703_v8 = vpop.permute.xlu1 %647  ;;  %v3705_v4 = vpop.permute.xlu0 %656 }
 0x152   : > { %5740 = vst [vmem:[#allocation80_spill] sm:$0xff] %v3703_v8  ;;  %5741 = vst [vmem:[#allocation81_spill] sm:$0xff] %v3705_v4  ;;  %v3134_v8 = vld [vmem:[%s3204_s15 + $0x98] sm:$0xff] }
 0x154   : > { %1025 = vperm.xlu1 %3021, %v942_v6   ;;  %3023 = vset.pattern.permute.xlu0 %v5643_v49 }
 0x155   : > { %v3709_v28 = vpop.permute.xlu1 %653  ;;  %1209 = vperm.xlu0 %3023, %v3210_v2  }
 0x156   : > { %5742 = vst [vmem:[#allocation82_spill] sm:$0xff] %v3709_v28  ;;  %v3712_v21 = vpop.permute.xlu0 %758 }
 0x158   : > { %1031 = vperm.xlu1 %3021, %v944_v27   ;;  %v5645_v27 = vmov 6  }
 0x159   : > { %v3715_v39 = vpop.permute.xlu1 %659  ;;  %1224 = vperm.xlu0 %3023, %v3213_v3  }
 0x15a   : > { %5743 = vst [vmem:[#allocation83_spill] sm:$0xff] %v3715_v39  ;;  %v3718_v40 = vpop.permute.xlu0 %767 }
 0x15c   : > { %1037 = vperm.xlu1 %3021, %v946_v55  }
 0x15d   : > { %1234 = vperm.xlu0 %3023, %v3223_v9  }
 0x15e   : > { %v3722_v52 = vpop.permute.xlu1 %761  ;;  %v3724_v57 = vpop.permute.xlu0 %773 }
 0x160   : > { %1043 = vperm.xlu1 %3021, %v948_v61  }
 0x161   : > { %1244 = vperm.xlu0 %3023, %v3241_v17  }
 0x162   : > { %v3727_v2 = vpop.permute.xlu1 %764  ;;  %v3729_v0 = vpop.permute.xlu0 %779 }
 0x163   : > { %5744 = vst [vmem:[#allocation84_spill] sm:$0xff] %v3729_v0 }
 0x164   : > { %3024 = vset.pattern.permute.xlu1 %v5643_v49  ;;  %v3126_v49 = vld [vmem:[%s3204_s15 + $0x8] sm:$0xff] }
 0x165   : > { %1214 = vperm.xlu1 %3024, %v3219_v7   ;;  %1254 = vperm.xlu0 %3023, %v3255_v23  }
 0x166   : > { %v3734_v3 = vpop.permute.xlu1 %770  ;;  %v3736_v9 = vpop.permute.xlu0 %785 }
 0x167   : > { %5745 = vst [vmem:[#allocation85_spill] sm:$0xff] %v3736_v9 }
 0x169   : > { %1219 = vperm.xlu1 %3024, %v3207_v1   ;;  %1294 = vperm.xlu0 %3023, %v3302_v47  }
 0x16a   : > { %v3740_v16 = vpop.permute.xlu1 %776  ;;  %v3742_v17 = vpop.permute.xlu0 %791 }
 0x16b   : > { %5746 = vst [vmem:[#allocation86_spill] sm:$0xff] %v3742_v17 }
 0x16d   : > { %1229 = vperm.xlu1 %3024, %v3226_v10   ;;  %1299 = vperm.xlu0 %3023, %v3319_v54  }
 0x16e   : > { %v3746_v6 = vpop.permute.xlu1 %782  ;;  %v3748_v7 = vpop.permute.xlu0 %797 }
 0x16f   : > { %5747 = vst [vmem:[#allocation87_spill] sm:$0xff] %v3746_v6  ;;  %5748 = vst [vmem:[#allocation88_spill] sm:$0xff] %v3748_v7  ;;  %v3889_v6 = vld [vmem:[%s3204_s15 + $0x60] sm:$0xff] }
 0x170   : > { %5769 = vst [vmem:[#allocation106_spill] sm:$0xff] %v3889_v6 }
 0x171   : > { %1239 = vperm.xlu1 %3024, %v3244_v18   ;;  %1304 = vperm.xlu0 %3023, %v3316_v53  }
 0x172   : > { %v3752_v1 = vpop.permute.xlu1 %788  ;;  %v3754_v23 = vpop.permute.xlu0 %803 }
 0x173   : > { %5749 = vst [vmem:[#allocation89_spill] sm:$0xff] %v3752_v1  ;;  %5750 = vst [vmem:[#allocation90_spill] sm:$0xff] %v3754_v23 }
 0x175   : > { %1249 = vperm.xlu1 %3024, %v3258_v24   ;;  %1339 = vperm.xlu0 %3023, %v3355_v35   ;;  %v3125_v24 = vld [vmem:[%s3204_s15] sm:$0xff] }
 0x176   : > { %v3758_v10 = vpop.permute.xlu1 %794  ;;  %v3760_v54 = vpop.permute.xlu0 %809 }
 0x177   : > { %5751 = vst [vmem:[#allocation91_spill] sm:$0xff] %v3758_v10  ;;  %v1821_v10 = vld [vmem:[%s5638_s1 + $0x20] sm:$0xff] }
 0x179   : > { %1289 = vperm.xlu1 %3024, %v3305_v48   ;;  %1264 = vperm.xlu0 %3023, %v3269_v29  }
 0x17a   : > { %v3764_v18 = vpop.permute.xlu1 %800  ;;  %v3766_v53 = vpop.permute.xlu0 %815 }
 0x17b   : > { %5752 = vst [vmem:[#allocation92_spill] sm:$0xff] %v3764_v18  ;;  %v5755_v18 = vmov 6  }
 0x17d   : > { %3025 = vset.pattern.permute.xlu1 %v5645_v27  ;;  %1269 = vperm.xlu0 %3023, %v3281_v36   ;;  %v1817_v36 = vld [vmem:[%s5638_s1] sm:$0xff]  ;;  %v1818_v27 = vld [vmem:[%s5638_s1 + $0x8] sm:$0xff] }
 0x17e   : > { %1433 = vperm.xlu1 %3025, %v3125_v24   ;;  %v3771_v55 = vpop.permute.xlu1 %806  ;;  %v3773_v61 = vpop.permute.xlu0 %821  ;;  %v2908_v32 = vpack.c.bf16 %v1818_v27, %v1817_v36 }
 0x180   : > { %2909 = vmatprep.subr.bf16.mxu0 %v2908_v32  ;;  %2924 = vmatprep.subr.bf16.mxu1 %v2908_v32 }
 0x181   : > { %1359 = vperm.xlu0 %3023, %v3377_v63   ;;  %2911 = vmatpush3.bf16.msra.mxu0 %v2908_v32 }
 0x182   : > { %1437 = vperm.xlu1 %3025, %v3126_v49   ;;  %v3777_v29 = vpop.permute.xlu1 %812  ;;  %v3779_v23 = vpop.permute.xlu0 %827  ;;  %2928 = vmatpush3.bf16.msra.mxu1 %v2908_v32 }
 0x183   : > { %5753 = vst [vmem:[#allocation93_spill] sm:$0xff] %v3779_v23 }
 0x185   : > { %1284 = vperm.xlu0 %3023, %v3291_v41   ;;  %v1819_v41 = vld [vmem:[%s5638_s1 + $0x10] sm:$0xff] }
 0x186   : > { %1501 = vperm.xlu1 %3025, %v3302_v47   ;;  %v3789_v39 = vpop.permute.xlu1 %818  ;;  %v3791_v4 = vpop.permute.xlu0 %833  ;;  %v5647_v47 = vmov 7   ;;  %v2912_v36 = vpack.c.bf16 %v1820_v12, %v1819_v41  ;;  %v1824_v41 = vld [vmem:[%s5638_s1 + $0x38] sm:$0xff] }
 0x187   : > { %5754 = vst [vmem:[#allocation94_spill] sm:$0xff] %v3791_v4 }
 0x188   : > { %2913 = vmatprep.subr.bf16.mxu0 %v2912_v36  ;;  %2925 = vmatprep.subr.bf16.mxu1 %v2912_v36 }
 0x189   : > { %3055 = vset.pattern.permute.xlu0 %v5755_v18  ;;  %2915 = vmatpush3.bf16.msra.mxu0 %v2912_v36 }
 0x18a   : > { %3026 = vset.pattern.permute.xlu1 %v5647_v47  ;;  %v3801_v28 = vpop.permute.xlu1 %824  ;;  %1497 = vperm.xlu0 %3055, %v3305_v48   ;;  %v3804_v27 = vpop.permute.xlu0 %839  ;;  %v1822_v47 = vld [vmem:[%s5638_s1 + $0x28] sm:$0xff] }
 0x18b   : > { %5756 = vst [vmem:[#allocation95_spill] sm:$0xff] %v3801_v28  ;;  %5757 = vst [vmem:[#allocation96_spill] sm:$0xff] %v3804_v27  ;;  %1626 = vperm.xlu1 %3026, %v3125_v24   ;;  %v2916_v32 = vpack.c.bf16 %v1822_v47, %v1821_v10  ;;  %2929 = vmatpush3.bf16.msra.mxu1 %v2912_v36  ;;  %v1823_v24 = vld [vmem:[%s5638_s1 + $0x30] sm:$0xff]  ;;  %v3838_v36 = vld [vmem:[%s3204_s15 + $0xa8] sm:$0xff] }
 0x18c   : > { %v2920_v10 = vpack.c.bf16 %v1824_v41, %v1823_v24  ;;  %v3848_v24 = vld [vmem:[%s3204_s15 + $0x30] sm:$0xff] }
 0x18d   : > { %2917 = vmatprep.subr.bf16.mxu0 %v2916_v32  ;;  %2926 = vmatprep.subr.bf16.mxu1 %v2916_v32  ;;  %v3985_v28 = vld [vmem:[%s3204_s15 + $0x70] sm:$0xff] }
 0x18e   : > { %v3812_v7 = vpop.permute.xlu1 %830  ;;  %1445 = vperm.xlu0 %3055, %v3815_v43   ;;  %v3818_v12 = vpop.permute.xlu0 %845  ;;  %2919 = vmatpush3.bf16.msra.mxu0 %v2916_v32  ;;  %5790 = vst [vmem:[#allocation127_spill] sm:$0xff] %v3985_v28 }
 0x18f   : > { %5758 = vst [vmem:[#allocation97_spill] sm:$0xff] %v3812_v7  ;;  %5759 = vst [vmem:[#allocation98_spill] sm:$0xff] %v3818_v12  ;;  %1690 = vperm.xlu1 %3026, %v3305_v48   ;;  %v3830_v12 = vld [vmem:[%s3204_s15 + $0x20] sm:$0xff]  ;;  %2930 = vmatpush3.bf16.msra.mxu1 %v2916_v32 }
 0x190   : > { %2921 = vmatprep.subr.bf16.mxu0 %v2920_v10  ;;  %2927 = vmatprep.subr.bf16.mxu1 %v2920_v10 }
 0x192   : > { %v3827_v26 = vpop.permute.xlu1 %836  ;;  %1449 = vperm.xlu0 %3055, %v3830_v12   ;;  %v3833_v48 = vpop.permute.xlu0 %851  ;;  %2923 = vmatpush3.bf16.msra.mxu0 %v2920_v10 }
 0x193   : > { %5760 = vst [vmem:[#allocation99_spill] sm:$0xff] %v3827_v26  ;;  %5761 = vst [vmem:[#allocation100_spill] sm:$0xff] %v3833_v48  ;;  %1630 = vperm.xlu1 %3026, %v3126_v49   ;;  %2931 = vmatpush3.bf16.msra.mxu1 %v2920_v10  ;;  %v3130_v49 = vld [vmem:[%s3204_s15 + $0x10] sm:$0xff]  ;;  %v3874_v26 = vld [vmem:[%s3204_s15 + $0xc8] sm:$0xff] }
 0x194   : > { %v3132_v48 = vld [vmem:[%s3204_s15 + $0x90] sm:$0xff] }
 0x196   : > { %v3835_v47 = vpop.permute.xlu1 %842  ;;  %1517 = vperm.xlu0 %3055, %v3838_v36  }
 0x197   : > { %5762 = vst [vmem:[#allocation101_spill] sm:$0xff] %v3835_v47  ;;  %3027 = vset.pattern.permute.xlu1 %v5755_v18  ;;  %v3842_v60 = vpop.permute.xlu0 %953  ;;  %v3855_v47 = vld [vmem:[%s3204_s15 + $0xb8] sm:$0xff] }
 0x198   : > { %1441 = vperm.xlu1 %3027, %v3130_v49  }
 0x19a   : > { %v3845_v32 = vpop.permute.xlu1 %848  ;;  %1457 = vperm.xlu0 %3055, %v3848_v24  }
 0x19b   : > { %5763 = vst [vmem:[#allocation102_spill] sm:$0xff] %v3845_v32  ;;  %v3851_v41 = vpop.permute.xlu0 %962  ;;  %v3864_v32 = vld [vmem:[%s3204_s15 + $0x40] sm:$0xff] }
 0x19c   : > { %1505 = vperm.xlu1 %3027, %v3132_v48  }
 0x19e   : > { %1525 = vperm.xlu0 %3055, %v3855_v47  }
 0x19f   : > { %v3858_v27 = vpop.permute.xlu1 %950  ;;  %v3860_v10 = vpop.permute.xlu0 %968 }
 0x1a0   : > { %1509 = vperm.xlu1 %3027, %v3134_v8  }
 0x1a2   : > { %1465 = vperm.xlu0 %3055, %v3864_v32  }
 0x1a3   : > { %v3867_v1 = vpop.permute.xlu1 %956  ;;  %v3869_v17 = vpop.permute.xlu0 %974 }
 0x1a4   : > { %5764 = vst [vmem:[#allocation103_spill] sm:$0xff] %v3869_v17  ;;  %3028 = vset.pattern.permute.xlu1 %v5765_v20 }
 0x1a5   : > { %1309 = vperm.xlu1 %3028, %v3136_v5  }
 0x1a6   : > { %1533 = vperm.xlu0 %3055, %v3874_v26  }
 0x1a7   : > { %v3877_v4 = vpop.permute.xlu1 %959  ;;  %v3879_v62 = vpop.permute.xlu0 %980 }
 0x1a8   : > { %5766 = vst [vmem:[#allocation104_spill] sm:$0xff] %v3879_v62 }
 0x1a9   : > { %3029 = vset.pattern.permute.xlu1 %v5767_v37 }
 0x1aa   : > { %1698 = vperm.xlu1 %3029, %v3132_v48   ;;  %1537 = vperm.xlu0 %3055, %v3355_v35  }
 0x1ab   : > { %v3883_v7 = vpop.permute.xlu1 %965  ;;  %v3885_v17 = vpop.permute.xlu0 %986 }
 0x1ac   : > { %5768 = vst [vmem:[#allocation105_spill] sm:$0xff] %v3885_v17 }
 0x1ae   : > { %3030 = vset.pattern.permute.xlu1 %v5765_v20  ;;  %1481 = vperm.xlu0 %3055, %v3889_v6  }
 0x1af   : > { %1314 = vperm.xlu1 %3030, %v3838_v36   ;;  %v3893_v9 = vpop.permute.xlu1 %971  ;;  %v3895_v62 = vpop.permute.xlu0 %992 }
 0x1b0   : > { %5770 = vst [vmem:[#allocation107_spill] sm:$0xff] %v3893_v9  ;;  %5771 = vst [vmem:[#allocation108_spill] sm:$0xff] %v3895_v62  ;;  %v3139_v62 = vld [vmem:[%s3204_s15 + $0x88] sm:$0xff] }
 0x1b2   : > { %1549 = vperm.xlu0 %3055, %v3365_v46  }
 0x1b3   : > { %3031 = vset.pattern.permute.xlu1 %v5767_v37  ;;  %v3899_v35 = vpop.permute.xlu1 %977  ;;  %v3901_v48 = vpop.permute.xlu0 %998 }
 0x1b4   : > { %5772 = vst [vmem:[#allocation109_spill] sm:$0xff] %v3899_v35  ;;  %1702 = vperm.xlu1 %3031, %v3134_v8  }
 0x1b6   : > { %1553 = vperm.xlu0 %3055, %v3377_v63  }
 0x1b7   : > { %v3904_v17 = vpop.permute.xlu1 %983  ;;  %v3906_v31 = vpop.permute.xlu0 %1004 }
 0x1b8   : > { %5773 = vst [vmem:[#allocation110_spill] sm:$0xff] %v3904_v17  ;;  %3032 = vset.pattern.permute.xlu1 %v5755_v18  ;;  %v3141_v17 = vld [vmem:[%s3204_s15 + $0xb0] sm:$0xff] }
 0x1b9   : > { %1513 = vperm.xlu1 %3032, %v3136_v5  }
 0x1ba   : > { %3059 = vset.pattern.permute.xlu0 %v5767_v37 }
 0x1bb   : > { %v3910_v46 = vpop.permute.xlu1 %989  ;;  %1694 = vperm.xlu0 %3059, %v3139_v62   ;;  %v3913_v35 = vpop.permute.xlu0 %1010 }
 0x1bc   : > { %5774 = vst [vmem:[#allocation111_spill] sm:$0xff] %v3910_v46 }
 0x1bd   : > { %1453 = vperm.xlu1 %3032, %v3140_v30  }
 0x1bf   : > { %v3916_v8 = vpop.permute.xlu1 %995  ;;  %1634 = vperm.xlu0 %3059, %v3130_v49   ;;  %v3918_v63 = vpop.permute.xlu0 %1016 }
 0x1c0   : > { %5775 = vst [vmem:[#allocation112_spill] sm:$0xff] %v3916_v8  ;;  %5776 = vst [vmem:[#allocation113_spill] sm:$0xff] %v3918_v63 }
 0x1c1   : > { %3033 = vset.pattern.permute.xlu1 %v5765_v20 }
 0x1c2   : > { %1319 = vperm.xlu1 %3033, %v3141_v17  }
 0x1c3   : > { %v3922_v33 = vpop.permute.xlu1 %1001  ;;  %1638 = vperm.xlu0 %3059, %v3815_v43   ;;  %v3925_v46 = vpop.permute.xlu0 %1022 }
 0x1c4   : > { %5777 = vst [vmem:[#allocation114_spill] sm:$0xff] %v3925_v46 }
 0x1c6   : > { %3034 = vset.pattern.permute.xlu1 %v5767_v37 }
 0x1c7   : > { %1706 = vperm.xlu1 %3034, %v3136_v5   ;;  %v3928_v62 = vpop.permute.xlu1 %1007  ;;  %1642 = vperm.xlu0 %3059, %v3830_v12   ;;  %v3931_v49 = vpop.permute.xlu0 %1028 }
 0x1c8   : > { %5778 = vst [vmem:[#allocation115_spill] sm:$0xff] %v3931_v49  ;;  %v3142_v49 = vld [vmem:[%s3204_s15 + $0x38] sm:$0xff] }
 0x1cb   : > { %3035 = vset.pattern.permute.xlu1 %v5765_v20  ;;  %v3934_v8 = vpop.permute.xlu1 %1013  ;;  %1646 = vperm.xlu0 %3059, %v3140_v30   ;;  %v3936_v23 = vpop.permute.xlu0 %1034 }
 0x1cc   : > { %5779 = vst [vmem:[#allocation116_spill] sm:$0xff] %v3934_v8  ;;  %5780 = vst [vmem:[#allocation117_spill] sm:$0xff] %v3936_v23  ;;  %1324 = vperm.xlu1 %3035, %v3855_v47  }
 0x1cf   : > { %v3939_v43 = vpop.permute.xlu1 %1019  ;;  %1650 = vperm.xlu0 %3059, %v3848_v24   ;;  %v3942_v5 = vpop.permute.xlu0 %1040  ;;  %v3143_v24 = vld [vmem:[%s3204_s15 + $0x48] sm:$0xff] }
 0x1d0   : > { %5781 = vst [vmem:[#allocation118_spill] sm:$0xff] %v3939_v43  ;;  %5782 = vst [vmem:[#allocation119_spill] sm:$0xff] %v3942_v5  ;;  %3036 = vset.pattern.permute.xlu1 %v5767_v37  ;;  %v3964_v43 = vld [vmem:[%s3204_s15 + $0xc0] sm:$0xff] }
 0x1d1   : > { %1710 = vperm.xlu1 %3036, %v3838_v36  }
 0x1d3   : > { %v3946_v12 = vpop.permute.xlu1 %1025  ;;  %1654 = vperm.xlu0 %3059, %v3142_v49  }
 0x1d4   : > { %5783 = vst [vmem:[#allocation120_spill] sm:$0xff] %v3946_v12  ;;  %v3949_v30 = vpop.permute.xlu0 %1209  ;;  %v3144_v12 = vld [vmem:[%s3204_s15 + $0xd0] sm:$0xff] }
 0x1d5   : > { %3037 = vset.pattern.permute.xlu1 %v5755_v18 }
 0x1d6   : > { %1521 = vperm.xlu1 %3037, %v3141_v17  }
 0x1d7   : > { %v3952_v23 = vpop.permute.xlu1 %1031  ;;  %1662 = vperm.xlu0 %3059, %v3143_v24  }
 0x1d8   : > { %5784 = vst [vmem:[#allocation121_spill] sm:$0xff] %v3952_v23  ;;  %v3955_v5 = vpop.permute.xlu0 %1224 }
 0x1da   : > { %1461 = vperm.xlu1 %3037, %v3142_v49  }
 0x1db   : > { %v3957_v36 = vpop.permute.xlu1 %1037  ;;  %1730 = vperm.xlu0 %3059, %v3144_v12   ;;  %v3977_v12 = vld [vmem:[%s3204_s15 + $0x68] sm:$0xff] }
 0x1dc   : > { %5785 = vst [vmem:[#allocation122_spill] sm:$0xff] %v3957_v36  ;;  %v3960_v46 = vpop.permute.xlu0 %1234 }
 0x1dd   : > { %5786 = vst [vmem:[#allocation123_spill] sm:$0xff] %v3960_v46  ;;  %v4014_v46 = vand.u32 127, %v211_v51  ;;  %v5801_v51 = vld [vmem:[#allocation49_spill] sm:$0xff] }
 0x1de   : > { %3038 = vset.pattern.permute.xlu1 %v5765_v20 }
 0x1df   : > { %1329 = vperm.xlu1 %3038, %v3964_v43   ;;  %v3967_v23 = vpop.permute.xlu1 %1043  ;;  %1670 = vperm.xlu0 %3059, %v3970_v56   ;;  %vm309_vm0 = vcmp.eq.s32.totalorder %v4014_v46, %v3430_v22  ;;  %vm485_vm5 = vcmp.eq.s32.totalorder %v4014_v46, %v5801_v51  ;;  %vm661_vm7 = vcmp.eq.s32.totalorder %v4014_v46, %v3620_v15  ;;  %v4034_v22 = vld [vmem:[%s3204_s15 + $0x50] sm:$0xff] }
 0x1e0   : > { %5787 = vst [vmem:[#allocation124_spill] sm:$0xff] %v3967_v23  ;;  %v3973_v49 = vpop.permute.xlu0 %1244  ;;  %vm853_vm9 = vcmp.eq.s32.totalorder %v4014_v46, %v3712_v21  ;;  %vm1045_vm11 = vcmp.eq.s32.totalorder %v4014_v46, %v3858_v27  ;;  %vm677_vm13 = vcmp.eq.s32.totalorder %v4014_v46, %v3664_v11  ;;  %vm869_vm15 = vcmp.eq.s32.totalorder %v4014_v46, %v3771_v55 }
 0x1e1   : > { %5788 = vst [vmem:[#allocation125_spill] sm:$0xff] %v3973_v49 }
 0x1e3   : > { %3039 = vset.pattern.permute.xlu1 %v5767_v37  ;;  %1678 = vperm.xlu0 %3059, %v3977_v12  }
 0x1e4   : > { %1714 = vperm.xlu1 %3039, %v3141_v17   ;;  %v3980_v36 = vpop.permute.xlu1 %1214  ;;  %v3982_v63 = vpop.permute.xlu0 %1254 }
 0x1e5   : > { %5789 = vst [vmem:[#allocation126_spill] sm:$0xff] %v3982_v63 }
 0x1e7   : > { %1682 = vperm.xlu0 %3059, %v3985_v28  }
 0x1e8   : > { %3040 = vset.pattern.permute.xlu1 %v5765_v20  ;;  %v3989_v23 = vpop.permute.xlu1 %1219  ;;  %v3991_v49 = vpop.permute.xlu0 %1294 }
 0x1e9   : > { %1334 = vperm.xlu1 %3040, %v3874_v26  }
 0x1eb   : > { %1750 = vperm.xlu0 %3059, %v3995_v25  }
 0x1ec   : > { %v3998_v17 = vpop.permute.xlu1 %1229  ;;  %v4000_v9 = vpop.permute.xlu0 %1299 }
 0x1ed   : > { %5792 = vst [vmem:[#allocation129_spill] sm:$0xff] %v3998_v17  ;;  %3041 = vset.pattern.permute.xlu1 %v5767_v37  ;;  %v5799_v17 = vld [vmem:[#allocation33_spill] sm:$0xff] }
 0x1ee   : > { %1718 = vperm.xlu1 %3041, %v3855_v47   ;;  %v5797_v47 = vld [vmem:[#allocation34_spill] sm:$0xff]  ;;  %vm470_vm3 = vcmp.eq.s32.totalorder %v4014_v46, %v5799_v17  ;;  %v4088_v17 = vld [vmem:[%s3204_s15 + $0xd8] sm:$0xff] }
 0x1ef   : > { %vm469_vm1 = vcmp.eq.s32.totalorder %v4014_v46, %v5797_v47 }
 0x1f0   : > { %v4004_v63 = vpop.permute.xlu1 %1239  ;;  %v4006_v0 = vpop.permute.xlu0 %1304  ;;  %vm501_vm6 = vmor %vm309_vm0, %vm469_vm1 }
 0x1f1   : > { %5793 = vst [vmem:[#allocation130_spill] sm:$0xff] %v4004_v63  ;;  %v5798_v63 = vld [vmem:[#allocation4_spill] sm:$0xff]  ;;  %vm693_vm12 = vmor %vm501_vm6, %vm661_vm7  ;;  %vm5661_vm6 = vcmp.eq.s32.totalorder %v4014_v46, 59  ;;  %vm854_vm7 = vcmp.eq.s32.totalorder %v4014_v46, %v3722_v52  ;;  %v5655_v52 = vmov 0.0  }
 0x1f2   : > { %3042 = vset.pattern.permute.xlu1 %v5755_v18  ;;  %vm310_vm2 = vcmp.eq.s32.totalorder %v4014_v46, %v5798_v63  ;;  %vm885_vm14 = vmor %vm693_vm12, %vm853_vm9 }
 0x1f3   : > { %1529 = vperm.xlu1 %3042, %v3964_v43   ;;  %vm4039_vm8 = vmor %vm310_vm2, %vm470_vm3  ;;  %vm1061_vm2 = vcmp.eq.s32.totalorder %v4014_v46, %v3901_v48  ;;  %vm5660_vm3 = vcmp.eq.s32.totalorder %v4014_v46, 56 }
 0x1f4   : > { %v4010_v6 = vpop.permute.xlu1 %1249  ;;  %v4012_v25 = vpop.permute.xlu0 %1339  ;;  %vm1077_vm0 = vmor %vm885_vm14, %vm1045_vm11  ;;  %vm5659_vm11 = vcmp.eq.s32.totalorder %v4014_v46, 57  ;;  %v1367_v55 = vsel %vm5660_vm3, %v3949_v30, 0.0 }
 0x1f5   : > { %5794 = vst [vmem:[#allocation131_spill] sm:$0xff] %v4010_v6  ;;  %5795 = vst [vmem:[#allocation132_spill] sm:$0xff] %v4012_v25  ;;  %v5800_v6 = vld [vmem:[#allocation18_spill] sm:$0xff] }
 0x1f6   : > { %vm325_vm4 = vcmp.eq.s32.totalorder %v4014_v46, %v5800_v6  ;;  %vm1110_vm9 = vmor %vm1077_vm0, %vm5661_vm6  ;;  %vm5658_vm0 = vcmp.eq.s32.totalorder %v4014_v46, 58  ;;  %v5828_v25 = vld [vmem:[#allocation22_spill] sm:$0xff] }
 0x1f7   : > { %1469 = vperm.xlu1 %3042, %v3143_v24   ;;  %vm517_vm10 = vmor %vm325_vm4, %vm485_vm5  ;;  %vm662_vm4 = vcmp.eq.s32.totalorder %v4014_v46, %v3622_v59  ;;  %v2736_v27 = vsel %vm1110_vm9, 1.0, %v5655_v52 }
 0x1f8   : > { %v1290_v28 = vpop.permute.xlu1 %1289  ;;  %v4016_v8 = vpop.permute.xlu0 %1264  ;;  %vm709_vm1 = vmor %vm517_vm10, %vm677_vm13  ;;  %vm1046_vm13 = vcmp.eq.s32.totalorder %v4014_v46, %v3842_v60  ;;  %v1399_v48 = vadd.f32 %v2736_v27, %v1367_v55  ;;  %v1368_v27 = vsel %vm5660_vm3, %v3980_v36, 0.0 }
 0x1f9   : > { %5796 = vst [vmem:[#allocation133_spill] sm:$0xff] %v4016_v8  ;;  %vm901_vm5 = vmor %vm709_vm1, %vm869_vm15  ;;  %v5827_v8 = vld [vmem:[#allocation5_spill] sm:$0xff] }
 0x1fa   : > { %vm1093_vm10 = vmor %vm901_vm5, %vm1061_vm2 }
 0x1fb   : > { %3043 = vset.pattern.permute.xlu1 %v5765_v20  ;;  %vm694_vm12 = vmor %vm4039_vm8, %vm662_vm4  ;;  %vm5657_vm8 = vcmask 523264  }
 0x1fc   : > { %1259 = vperm.xlu1 %3043, %v4034_v22   ;;  %v4037_v63 = vpop.permute.xlu0 %1269  ;;  %vm886_vm14 = vmor %vm694_vm12, %vm854_vm7 }
 0x1fd   : > { %5802 = vst [vmem:[#allocation34_spill] sm:$0xff] %v4037_v63  ;;  %v1434_v6 = vpop.permute.xlu1 %1433  ;;  %vm1126_vm15 = vmor %vm1093_vm10, %vm5661_vm6 }
 0x1fe   : > { %vm1078_vm1 = vmor %vm886_vm14, %vm1046_vm13  ;;  %v2752_v51 = vsel %vm1126_vm15, 1.0, %v5655_v52 }
 0x1ff   : > { %vm1111_vm2 = vmor %vm1078_vm1, %vm5661_vm6 }
 0x200   : > { %3044 = vset.pattern.permute.xlu1 %v5767_v37  ;;  %v4052_v15 = vpop.permute.xlu0 %1359 }
 0x201   : > { %5805 = vst [vmem:[#allocation4_spill] sm:$0xff] %v4052_v15  ;;  %1658 = vperm.xlu1 %3044, %v3864_v32   ;;  %v1438_v21 = vpop.permute.xlu1 %1437  ;;  %v1560_v32 = vsel %vm5659_vm11, %v1434_v6, 0.0 }
 0x202   : > { %v1592_v30 = vadd.f32 %v1560_v32, %v1399_v48 }
 0x204   : > { %v4066_v11 = vpop.permute.xlu0 %1284 }
 0x205   : > { %5806 = vst [vmem:[#allocation33_spill] sm:$0xff] %v4066_v11  ;;  %1722 = vperm.xlu1 %3044, %v3964_v43   ;;  %v4072_v59 = vpop.permute.xlu1 %1501  ;;  %v1383_v43 = vsel %vm5660_vm3, %v1290_v28, 0.0  ;;  %v1561_v11 = vsel %vm5659_vm11, %v1438_v21, 0.0 }
 0x206   : > { %v1415_v28 = vadd.f32 %v2752_v51, %v1383_v43 }
 0x209   : > { %3045 = vset.pattern.permute.xlu1 %v5765_v20  ;;  %v1498_v60 = vpop.permute.xlu0 %1497 }
 0x20a   : > { %1344 = vperm.xlu1 %3045, %v4088_v17   ;;  %v1627_v47 = vpop.permute.xlu1 %1626  ;;  %v1576_v24 = vsel %vm5659_vm11, %v1498_v60, 0.0  ;;  %v5807_v60 = vmov 0.0  }
 0x20b   : > { %v1753_v6 = vsel %vm5658_vm0, %v1627_v47, 0.0  ;;  %v1608_v48 = vadd.f32 %v1576_v24, %v1415_v28  ;;  %v2737_v47 = vsel %vm1111_vm2, 1.0, %v5807_v60 }
 0x20c   : > { %v1785_v55 = vadd.f32 %v1753_v6, %v1592_v30  ;;  %v1400_v30 = vadd.f32 %v2737_v47, %v1368_v27 }
 0x20d   : > { %v4101_v32 = vpop.permute.xlu0 %1445 }
 0x20e   : > { %3046 = vset.pattern.permute.xlu1 %v5767_v37  ;;  %v1691_v52 = vpop.permute.xlu1 %1690  ;;  %2860 = vmatprep.mubr.msk.f32.mxu0 %vm5657_vm8, %v1785_v55  ;;  %v1593_v24 = vadd.f32 %v1561_v11, %v1400_v30  ;;  %v5810_v30 = vld [vmem:[#allocation2_spill] sm:$0xff] }
 0x20f   : > { %v1769_v43 = vsel %vm5658_vm0, %v1691_v52, 0.0  ;;  %1726 = vperm.xlu1 %3046, %v3874_v26   ;;  %vm311_vm7 = vcmp.eq.s32.totalorder %v4014_v46, %v5810_v30 }
 0x210   : > { %v1801_v36 = vadd.f32 %v1769_v43, %v1608_v48  ;;  %v5808_v48 = vld [vmem:[#allocation35_spill] sm:$0xff]  ;;  %v5809_v43 = vld [vmem:[#allocation36_spill] sm:$0xff] }
 0x211   : > { %v4111_v51 = vpop.permute.xlu0 %1449  ;;  %vm471_vm4 = vcmp.eq.s32.totalorder %v4014_v46, %v5808_v48  ;;  %vm472_vm5 = vcmp.eq.s32.totalorder %v4014_v46, %v5809_v43  ;;  %v5817_v48 = vld [vmem:[#allocation50_spill] sm:$0xff]  ;;  %v5818_v43 = vld [vmem:[#allocation20_spill] sm:$0xff] }
 0x212   : > { %v1631_v6 = vpop.permute.xlu1 %1630  ;;  %2884 = vmatprep.mubr.msk.f32.mxu1 %vm5657_vm8, %v1801_v36  ;;  %v5812_v36 = vld [vmem:[#allocation37_spill] sm:$0xff]  ;;  %vm4152_vm13 = vmor %vm311_vm7, %vm471_vm4  ;;  %vm486_vm14 = vcmp.eq.s32.totalorder %v4014_v46, %v5817_v48  ;;  %vm327_vm15 = vcmp.eq.s32.totalorder %v4014_v46, %v5818_v43  ;;  %v5826_v48 = vld [vmem:[#allocation52_spill] sm:$0xff] }
 0x213   : > { %v1754_v28 = vsel %vm5658_vm0, %v1631_v6, 0.0  ;;  %3047 = vset.pattern.permute.xlu1 %v5755_v18  ;;  %vm473_vm10 = vcmp.eq.s32.totalorder %v4014_v46, %v5812_v36  ;;  %v5822_v36 = vld [vmem:[#allocation51_spill] sm:$0xff]  ;;  %vm664_vm0 = vcmp.eq.s32.totalorder %v4014_v46, %v3632_v45  ;;  %v5844_v45 = vld [vmem:[#allocation8_spill] sm:$0xff] }
 0x214   : > { %v1786_v55 = vadd.f32 %v1754_v28, %v1593_v24  ;;  %1473 = vperm.xlu1 %3047, %v4034_v22   ;;  %v4145_v24 = vld [vmem:[%s3204_s15 + $0xe0] sm:$0xff]  ;;  %v5814_v28 = vld [vmem:[#allocation3_spill] sm:$0xff] }
 0x215   : > { %v4118_v21 = vpop.permute.xlu0 %1517  ;;  %vm312_vm12 = vcmp.eq.s32.totalorder %v4014_v46, %v5814_v28  ;;  %v5823_v28 = vld [vmem:[#allocation17_spill] sm:$0xff] }
 0x216   : > { %2861 = vmatmul.mubr.msk.f32.vlgmr.msra.gmra.mrb[0].mxu0 %vm5657_vm8, %v1786_v55  ;;  %vm4160_vm1 = vmor %vm312_vm12, %vm472_vm5  ;;  %vm487_vm8 = vcmp.eq.s32.totalorder %v4014_v46, %v5822_v36  ;;  %vm326_vm4 = vcmp.eq.s32.totalorder %v4014_v46, %v5823_v28  ;;  %vm314_vm5 = vcmp.eq.s32.totalorder %v4014_v46, %v5827_v8  ;;  %vm329_vm12 = vcmp.eq.s32.totalorder %v4014_v46, %v5828_v25  ;;  %v5831_v36 = vld [vmem:[#allocation53_spill] sm:$0xff] }
 0x217   : > { %v4121_v26 = vpop.permute.xlu1 %1441  ;;  %vm4182_vm11 = vmor %vm326_vm4, %vm486_vm14  ;;  %v5833_v8 = vmov 0  ;;  %vm665_vm4 = vcmp.eq.s32.totalorder %v4014_v46, %v3628_v14  ;;  %v5871_v25 = vmov 0  ;;  %v5939_v14 = vld [vmem:[#allocation129_spill] sm:$0xff] }
 0x218   : > { %1477 = vperm.xlu1 %3047, %v3970_v56   ;;  %v5811_v56 = vld [vmem:[#allocation6_spill] sm:$0xff]  ;;  %vm4202_vm14 = vmor %vm327_vm15, %vm487_vm8  ;;  %vm679_vm8 = vcmp.eq.s32.totalorder %v4014_v46, %v3670_v13  ;;  %v5846_v13 = vmov 0 }
 0x219   : > { %v4124_v11 = vpop.permute.xlu0 %1457  ;;  %vm313_vm9 = vcmp.eq.s32.totalorder %v4014_v46, %v5811_v56  ;;  %v5821_v56 = vld [vmem:[#allocation38_spill] sm:$0xff] }
 0x21a   : > { %vm474_vm2 = vcmp.eq.s32.totalorder %v4014_v46, %v5821_v56  ;;  %vm4170_vm7 = vmor %vm313_vm9, %vm473_vm10  ;;  %v5829_v56 = vmov 0  ;;  %vm489_vm9 = vcmp.eq.s32.totalorder %v4014_v46, %v5831_v36  ;;  %vm663_vm10 = vcmp.eq.s32.totalorder %v4014_v46, %v3626_v34 }
 0x21b   : > { %v4126_v52 = vpop.permute.xlu1 %1505  ;;  %v5830_v56 = vsel %vm4182_vm11, 4294967295, %v5829_v56  ;;  %vm4195_vm6 = vmor %vm314_vm5, %vm474_vm2  ;;  %vm5837_vm2 = vcmp.eq.s32.totalorder %v4014_v46, %v5826_v48  ;;  %vm678_vm11 = vcmp.eq.s32.totalorder %v4014_v46, %v3674_v38  ;;  %v5862_v48 = vld [vmem:[#allocation21_spill] sm:$0xff]  ;;  %v5866_v36 = vmov 0 }
 0x21c   : > { %1541 = vperm.xlu1 %3047, %v4088_v17   ;;  %v5834_v8 = vsel %vm4195_vm6, 4294967295, %v5833_v8  ;;  %vm4220_vm15 = vmor %vm329_vm12, %vm489_vm9  ;;  %vm680_vm9 = vcmp.eq.s32.totalorder %v4014_v46, %v3680_v44  ;;  %v5853_v44 = vmov 0 }
 0x21d   : > { %v4129_v27 = vpop.permute.xlu0 %1525  ;;  %vm4226_vm6 = vmor %vm4152_vm13, %vm663_vm10 }
 0x21e   : > { %vm4238_vm12 = vmor %vm4170_vm7, %vm665_vm4  ;;  %vm855_vm7 = vcmp.eq.s32.totalorder %v4014_v46, %v3727_v2  ;;  %vm870_vm4 = vcmp.eq.s32.totalorder %v4014_v46, %v3760_v54  ;;  %v5857_v54 = vld [vmem:[#allocation54_spill] sm:$0xff] }
 0x21f   : > { %v4133_v47 = vpop.permute.xlu1 %1509  ;;  %v5847_v13 = vsel %vm4238_vm12, 4294967295, %v5846_v13  ;;  %vm4244_vm13 = vmor %vm4160_vm1, %vm664_vm0  ;;  %vm5852_vm0 = vnez %v5830_v56  ;;  %v5864_v56 = vmov 0 }
 0x220   : > { %3048 = vset.pattern.permute.xlu1 %v5765_v20  ;;  %vm4256_vm10 = vmor %vm4202_vm14, %vm679_vm8  ;;  %vm666_vm14 = vcmp.eq.s32.totalorder %v4014_v46, %v3638_v58 }
 0x221   : > { %1349 = vperm.xlu1 %3048, %v4145_v24   ;;  %v4148_v6 = vpop.permute.xlu0 %1465  ;;  %vm710_vm1 = vmor %vm5852_vm0, %vm678_vm11  ;;  %vm856_vm11 = vcmp.eq.s32.totalorder %v4014_v46, %v3718_v40  ;;  %vm872_vm0 = vcmp.eq.s32.totalorder %v4014_v46, %v3766_v53 }
 0x222   : > { %5813 = vst [vmem:[#allocation18_spill] sm:$0xff] %v4148_v6  ;;  %v5832_v6 = vld [vmem:[#allocation19_spill] sm:$0xff] }
 0x223   : > { %vm328_vm3 = vcmp.eq.s32.totalorder %v4014_v46, %v5832_v6 }
 0x224   : > { %v4176_v63 = vpop.permute.xlu1 %1309  ;;  %vm4214_vm5 = vmor %vm328_vm3, %vm5837_vm2  ;;  %vm315_vm3 = vcmp.eq.s32.totalorder %v4014_v46, %v5844_v45 }
 0x225   : > { %3049 = vset.pattern.permute.xlu1 %v5767_v37  ;;  %v4191_v28 = vpop.permute.xlu0 %1533  ;;  %vm4276_vm8 = vmor %vm4214_vm5, %vm680_vm9 }
 0x226   : > { %1666 = vperm.xlu1 %3049, %v4034_v22   ;;  %v5845_v22 = vld [vmem:[#allocation39_spill] sm:$0xff]  ;;  %vm4324_vm9 = vmor %vm4276_vm8, %vm872_vm0  ;;  %vm5873_vm8 = vcmp.eq.s32.totalorder %v4014_v46, %v3777_v29 }
 0x227   : > { %vm475_vm2 = vcmp.eq.s32.totalorder %v4014_v46, %v5845_v22  ;;  %vm903_vm0 = vmor %vm4256_vm10, %vm5873_vm8  ;;  %vm667_vm10 = vcmp.eq.s32.totalorder %v4014_v46, %v3634_v42 }
 0x228   : > { %vm4268_vm12 = vmor %vm315_vm3, %vm475_vm2  ;;  %vm1062_vm3 = vcmp.eq.s32.totalorder %v4014_v46, %v3922_v33 }
 0x229   : > { %v4250_v38 = vpop.permute.xlu1 %1698  ;;  %v4252_v43 = vpop.permute.xlu0 %1537  ;;  %v5854_v44 = vsel %vm4268_vm12, 4294967295, %v5853_v44  ;;  %vm4288_vm2 = vmor %vm4226_vm6, %vm855_vm7  ;;  %vm330_vm6 = vcmp.eq.s32.totalorder %v4014_v46, %v5862_v48  ;;  %vm5863_vm7 = vnez %v5834_v8  ;;  %v4331_v8 = vld [vmem:[%s3204_s15 + $0xe8] sm:$0xff] }
 0x22a   : > { %3050 = vset.pattern.permute.xlu1 %v5765_v20  ;;  %vm4298_vm12 = vmor %vm710_vm1, %vm870_vm4  ;;  %vm857_vm4 = vcmp.eq.s32.totalorder %v4014_v46, %v3734_v3 }
 0x22b   : > { %1274 = vperm.xlu1 %3050, %v3977_v12   ;;  %vm4310_vm5 = vmor %vm5863_vm7, %vm666_vm14  ;;  %vm1063_vm14 = vcmp.eq.s32.totalorder %v4014_v46, %v3906_v31  ;;  %vm1047_vm7 = vcmp.eq.s32.totalorder %v4014_v46, %v3867_v1  ;;  %v5962_v31 = vld [vmem:[#allocation106_spill] sm:$0xff] }
 0x22c   : > { %v5865_v56 = vsel %vm4310_vm5, 4294967295, %v5864_v56  ;;  %vm4316_vm1 = vmor %vm4244_vm13, %vm856_vm11  ;;  %vm5870_vm13 = vcmp.eq.s32.totalorder %v4014_v46, %v5857_v54 }
 0x22d   : > { %v4294_v30 = vpop.permute.xlu0 %1481  ;;  %v5867_v36 = vsel %vm4316_vm1, 4294967295, %v5866_v36  ;;  %vm4337_vm11 = vmor %vm330_vm6, %vm5870_vm13  ;;  %vm5874_vm1 = vcmp.eq.s32.totalorder %v4014_v46, %v3676_v19  ;;  %vm5877_vm13 = vnez %v5847_v13 }
 0x22e   : > { %v4304_v53 = vpop.permute.xlu1 %1314  ;;  %v5872_v25 = vsel %vm4337_vm11, 4294967295, %v5871_v25  ;;  %vm4353_vm5 = vmor %vm4220_vm15, %vm5874_vm1 }
 0x22f   : > { %1354 = vperm.xlu1 %3050, %v4331_v8   ;;  %vm1094_vm6 = vmor %vm4298_vm12, %vm1062_vm3  ;;  %vm1064_vm12 = vcmp.eq.s32.totalorder %v4014_v46, %v3928_v62  ;;  %vm5882_vm3 = vcmp.eq.s32.totalorder %v4014_v46, 59 }
 0x230   : > { %vm4365_vm8 = vmor %vm5877_vm13, %vm857_vm4  ;;  %vm5883_vm4 = vnez %v5854_v44 }
 0x231   : > { %v4359_v3 = vpop.permute.xlu0 %1549  ;;  %vm1095_vm11 = vmor %vm903_vm0, %vm1063_vm14  ;;  %vm1048_vm0 = vcmp.eq.s32.totalorder %v4014_v46, %v3877_v4 }
 0x232   : > { %vm4371_vm15 = vmor %vm4288_vm2, %vm1047_vm7  ;;  %vm858_vm2 = vcmp.eq.s32.totalorder %v4014_v46, %v3724_v57 }
 0x233   : > { %3051 = vset.pattern.permute.xlu1 %v5767_v37  ;;  %v1703_v29 = vpop.permute.xlu1 %1702  ;;  %vm1127_vm1 = vmor %vm1094_vm6, %vm5882_vm3  ;;  %vm5887_vm6 = vcmp.eq.s32.totalorder %v4014_v46, 56 }
 0x234   : > { %1734 = vperm.xlu1 %3051, %v4088_v17   ;;  %vm4383_vm14 = vmor %vm5883_vm4, %vm667_vm10  ;;  %v1384_v62 = vsel %vm5887_vm6, %v3991_v49, 0.0  ;;  %vm682_vm10 = vcmp.eq.s32.totalorder %v4014_v46, %v3686_v50  ;;  %v2753_v49 = vsel %vm1127_vm1, 1.0, %v5807_v60 }
 0x235   : > { %vm5886_vm7 = vmmov %vm5882_vm3  ;;  %v4396_v17 = vpop.permute.xlu0 %1553  ;;  %v1416_v45 = vadd.f32 %v2753_v49, %v1384_v62 }
 0x236   : > { %vm1128_vm13 = vmor %vm1095_vm11, %vm5886_vm7  ;;  %vm1049_vm11 = vcmp.eq.s32.totalorder %v4014_v46, %v3851_v41  ;;  %v5990_v41 = vld [vmem:[#allocation56_spill] sm:$0xff] }
 0x237   : > { %vm4402_vm3 = vmor %vm4324_vm9, %vm1064_vm12  ;;  %vm5893_vm9 = vcmp.eq.s32.totalorder %v4014_v46, 57  ;;  %vm5894_vm12 = vnez %v5865_v56  ;;  %v2754_v22 = vsel %vm1128_vm13, 1.0, %v5807_v60  ;;  %vm5904_vm13 = vcmp.eq.s32.totalorder %v4014_v46, 59 }
 0x238   : > { %vm5890_vm4 = vmmov %vm5887_vm6  ;;  %v1577_v6 = vsel %vm5893_vm9, %v4072_v59, 0.0  ;;  %3052 = vset.pattern.permute.xlu1 %v5755_v18  ;;  %v1514_v13 = vpop.permute.xlu1 %1513 }
 0x239   : > { %v1385_v4 = vsel %vm5890_vm4, %v4000_v9, 0.0  ;;  %vm4415_vm6 = vmor %vm4371_vm15, %vm5886_vm7  ;;  %vm5897_vm15 = vnez %v5867_v36  ;;  %1545 = vperm.xlu1 %3052, %v4145_v24   ;;  %v5944_v9 = vld [vmem:[#allocation116_spill] sm:$0xff] }
 0x23a   : > { %vm4425_vm4 = vmor %vm5894_vm12, %vm858_vm2  ;;  %vm5901_vm2 = vnez %v5872_v25  ;;  %v1417_v15 = vadd.f32 %v2754_v22, %v1385_v4  ;;  %v1695_v58 = vpop.permute.xlu0 %1694  ;;  %v2738_v40 = vsel %vm4415_vm6, 1.0, %v5807_v60 }
 0x23b   : > { %vm4433_vm7 = vmor %vm5897_vm15, %vm1048_vm0  ;;  %vm859_vm0 = vcmp.eq.s32.totalorder %v4014_v46, %v3740_v16  ;;  %vm5907_vm15 = vcmp.eq.s32.totalorder %v4014_v46, 56 }
 0x23c   : > { %vm5900_vm1 = vmmov %vm5893_vm9  ;;  %v1369_v50 = vsel %vm5907_vm15, %v3989_v23, 0.0  ;;  %v1609_v23 = vadd.f32 %v1577_v6, %v1416_v45  ;;  %v1454_v25 = vpop.permute.xlu1 %1453 }
 0x23d   : > { %v1578_v59 = vsel %vm5900_vm1, %v4126_v52, 0.0  ;;  %vm4447_vm9 = vmor %vm5901_vm2, %vm682_vm10  ;;  %vm5908_vm10 = vcmp.eq.s32.totalorder %v4014_v46, %v3789_v39  ;;  %v1401_v56 = vadd.f32 %v2738_v40, %v1369_v50  ;;  %1485 = vperm.xlu1 %3052, %v3977_v12  }
 0x23e   : > { %vm4457_vm12 = vmor %vm4402_vm3, %vm5904_vm13  ;;  %vm1065_vm3 = vcmp.eq.s32.totalorder %v4014_v46, %v3913_v35  ;;  %vm5912_vm13 = vcmp.eq.s32.totalorder %v4014_v46, 58  ;;  %v1610_v48 = vadd.f32 %v1578_v59, %v1417_v15  ;;  %v1635_v12 = vpop.permute.xlu0 %1634  ;;  %v5945_v15 = vld [vmem:[#allocation127_spill] sm:$0xff]  ;;  %v5964_v35 = vld [vmem:[#allocation130_spill] sm:$0xff] }
 0x23f   : > { %vm4470_vm1 = vmor %vm4353_vm5, %vm5908_vm10  ;;  %v1771_v54 = vsel %vm5912_vm13, %v4250_v38, 0.0  ;;  %v2755_v36 = vsel %vm4457_vm12, 1.0, %v5807_v60 }
 0x240   : > { %vm5911_vm2 = vmmov %vm5907_vm15  ;;  %vm5915_vm15 = vcmp.eq.s32.totalorder %v4014_v46, 57  ;;  %v1803_v62 = vadd.f32 %v1771_v54, %v1610_v48 }
 0x241   : > { %v1386_v2 = vsel %vm5911_vm2, %v4006_v0, 0.0  ;;  %vm4487_vm5 = vmor %vm4365_vm8, %vm1049_vm11  ;;  %v1562_v0 = vsel %vm5915_vm15, %v4121_v26, 0.0  ;;  %vm5917_vm2 = vcmp.eq.s32.totalorder %v4014_v46, 59  ;;  %3053 = vset.pattern.permute.xlu1 %v5765_v20  ;;  %v4585_v52 = vpop.permute.xlu1 %1319 }
 0x242   : > { %vm5916_vm10 = vmmov %vm5912_vm13  ;;  %v1418_v19 = vadd.f32 %v2755_v36, %v1386_v2  ;;  %1279 = vperm.xlu1 %3053, %v5945_v15   ;;  %v1639_v44 = vpop.permute.xlu0 %1638 }
 0x243   : > { %v1770_v38 = vsel %vm5916_vm10, %v1695_v58, 0.0  ;;  %vm4503_vm8 = vmor %vm4433_vm7, %vm5917_vm2  ;;  %vm5923_vm7 = vcmp.eq.s32.totalorder %v4014_v46, 56 }
 0x244   : > { %vm5920_vm11 = vmmov %vm5915_vm15  ;;  %v1802_v33 = vadd.f32 %v1770_v38, %v1609_v23  ;;  %v1370_v1 = vsel %vm5923_vm7, %v3955_v5, 0.0  ;;  %v1594_v5 = vadd.f32 %v1562_v0, %v1401_v56  ;;  %vm5927_vm15 = vcmask 523264  }
 0x245   : > { %v1579_v26 = vsel %vm5920_vm11, %v4133_v47, 0.0  ;;  %vm4518_vm6 = vmor %vm4470_vm1, %vm1065_vm3  ;;  %vm874_vm1 = vcmp.eq.s32.totalorder %v4014_v46, %v3773_v61  ;;  %vm1050_vm3 = vcmp.eq.s32.totalorder %v4014_v46, %v3883_v7  ;;  %v2739_v42 = vsel %vm4503_vm8, 1.0, %v5807_v60 }
 0x246   : > { %vm4531_vm12 = vmor %vm4383_vm14, %vm859_vm0  ;;  %2885 = vmatmul.mubr.msk.f32.vlgmr.msra.gmra.mrb[0].mxu1 %vm5927_vm15, %v1802_v33  ;;  %v1402_v49 = vadd.f32 %v2739_v42, %v1370_v1  ;;  %3054 = vset.pattern.permute.xlu1 %v5767_v37  ;;  %v1707_v48 = vpop.permute.xlu1 %1706  ;;  %v1643_v38 = vpop.permute.xlu0 %1642 }
 0x247   : > { %vm5926_vm13 = vmmov %vm5916_vm10  ;;  %1674 = vperm.xlu1 %3054, %v5962_v31  }
 0x248   : > { %v1772_v47 = vsel %vm5926_vm13, %v1703_v29, 0.0  ;;  %vm5928_vm10 = vmmov %vm5917_vm2  ;;  %v1611_v29 = vadd.f32 %v1579_v26, %v1418_v19 }
 0x249   : > { %vm4546_vm14 = vmor %vm4487_vm5, %vm5928_vm10  ;;  %vm1051_vm5 = vcmp.eq.s32.totalorder %v4014_v46, %v3860_v10 }
 0x24a   : > { %vm5931_vm0 = vmmov %vm5920_vm11  ;;  %v1804_v59 = vadd.f32 %v1772_v47, %v1611_v29 }
 0x24b   : > { %v1563_v34 = vsel %vm5931_vm0, %v4101_v32, 0.0  ;;  %vm5932_vm2 = vmmov %vm5926_vm13  ;;  %1738 = vperm.xlu1 %3054, %v4145_v24   ;;  %v5971_v32 = vld [vmem:[#allocation66_spill] sm:$0xff] }
 0x24c   : > { %v1755_v4 = vsel %vm5932_vm2, %v1635_v12, 0.0  ;;  %vm5933_vm11 = vmmov %vm5927_vm15  ;;  %vm5940_vm15 = vcmp.eq.s32.totalorder %v4014_v46, 56  ;;  %v1595_v50 = vadd.f32 %v1563_v34, %v1402_v49  ;;  %v1756_v10 = vsel %vm5932_vm2, %v1639_v44, 0.0  ;;  %v1647_v12 = vpop.permute.xlu0 %1646 }
 0x24d   : > { %2887 = vmatprep.mubr.msk.f32.mxu1 %vm5933_vm11, %v1803_v62  ;;  %vm5934_vm7 = vmmov %vm5928_vm10  ;;  %v1787_v6 = vadd.f32 %v1755_v4, %v1594_v5  ;;  %v1371_v45 = vsel %vm5940_vm15, %v5939_v14, 0.0  ;;  %v5970_v4 = vld [vmem:[#allocation40_spill] sm:$0xff]  ;;  %v5973_v14 = vld [vmem:[#allocation7_spill] sm:$0xff] }
 0x24e   : > { %vm4565_vm13 = vmor %vm4518_vm6, %vm5934_vm7 }
 0x24f   : > { %vm4574_vm8 = vmor %vm4425_vm4, %vm1050_vm3  ;;  %vm1066_vm3 = vcmp.eq.s32.totalorder %v4014_v46, %v5944_v9  ;;  %v2756_v2 = vsel %vm4565_vm13, 1.0, %v5807_v60  ;;  %3056 = vset.pattern.permute.xlu1 %v5765_v20  ;;  %v5978_v9 = vld [vmem:[#allocation128_spill] sm:$0xff]  ;;  %v5983_v20 = vld [vmem:[#allocation74_spill] sm:$0xff] }
 0x250   : > { %vm5941_vm6 = vmmov %vm5940_vm15  ;;  %1364 = vperm.xlu1 %3056, %v5978_v9  }
 0x251   : > { %v1387_v22 = vsel %vm5941_vm6, %v4176_v63, 0.0  ;;  %vm4592_vm4 = vmor %vm4447_vm9, %vm874_vm1  ;;  %v2740_v63 = vsel %vm4546_vm14, 1.0, %v5807_v60 }
 0x252   : > { %vm5946_vm10 = vmmov %vm5933_vm11  ;;  %v1403_v54 = vadd.f32 %v2740_v63, %v1371_v45  ;;  %v1419_v58 = vadd.f32 %v2756_v2, %v1387_v22  ;;  %v5974_v45 = vld [vmem:[#allocation84_spill] sm:$0xff]  ;;  %v1651_v22 = vpop.permute.xlu0 %1650  ;;  %v5981_v2 = vld [vmem:[#allocation55_spill] sm:$0xff] }
 0x253   : > { %2863 = vmatprep.mubr.msk.f32.mxu0 %vm5946_vm10, %v1787_v6  ;;  %vm4608_vm9 = vmor %vm4531_vm12, %vm1051_vm5 }
 0x254   : > { %vm5949_vm1 = vmmov %vm5931_vm0  ;;  %3057 = vset.pattern.permute.xlu1 %v5767_v37 }
 0x255   : > { %v1564_v55 = vsel %vm5949_vm1, %v4111_v51, 0.0  ;;  %vm5950_vm14 = vmmov %vm5931_vm0  ;;  %v1788_v51 = vadd.f32 %v1756_v10, %v1595_v50  ;;  %1742 = vperm.xlu1 %3057, %v4331_v8   ;;  %v5985_v10 = vld [vmem:[#allocation95_spill] sm:$0xff] }
 0x256   : > { %v1580_v23 = vsel %vm5950_vm14, %v1514_v13, 0.0  ;;  %vm5951_vm0 = vmmov %vm5946_vm10  ;;  %v5953_v13 = vld [vmem:[#allocation123_spill] sm:$0xff]  ;;  %v1596_v40 = vadd.f32 %v1564_v55, %v1403_v54  ;;  %v5980_v55 = vld [vmem:[#allocation24_spill] sm:$0xff] }
 0x257   : > { %2888 = vmatmul.mubr.msk.f32.gmra.mrb[2].mxu1 %vm5951_vm0, %v1804_v59  ;;  %vm5952_vm12 = vmmov %vm5934_vm7  ;;  %v1612_v0 = vadd.f32 %v1580_v23, %v1419_v58  ;;  %v5976_v59 = vld [vmem:[#allocation107_spill] sm:$0xff]  ;;  %v5986_v54 = vld [vmem:[#allocation125_spill] sm:$0xff] }
 0x258   : > { %vm1115_vm11 = vmor %vm4574_vm8, %vm5952_vm12 }
 0x259   : > { %vm1098_vm5 = vmor %vm4592_vm4, %vm1066_vm3  ;;  %v2741_v56 = vsel %vm1115_vm11, 1.0, %v5807_v60  ;;  %3058 = vset.pattern.permute.xlu1 %v5755_v18 }
 0x25a   : > { %vm5954_vm7 = vmmov %vm5941_vm6  ;;  %1489 = vperm.xlu1 %3058, %v5945_v15  }
 0x25b   : > { %v1372_v39 = vsel %vm5954_vm7, %v5953_v13, 0.0  ;;  %vm5955_vm13 = vmmov %vm5951_vm0 }
 0x25c   : > { %2864 = vmatmul.mubr.msk.f32.gmra.mrb[2].mxu0 %vm5955_vm13, %v1788_v51  ;;  %vm5956_vm8 = vmmov %vm5952_vm12  ;;  %v1404_v1 = vadd.f32 %v2741_v56, %v1372_v39  ;;  %v5988_v51 = vld [vmem:[#allocation113_spill] sm:$0xff]  ;;  %v5991_v56 = vld [vmem:[#allocation76_spill] sm:$0xff] }
 0x25d   : > { %vm4641_vm15 = vmor %vm4608_vm9, %vm5956_vm8 }
 0x25e   : > { %vm5959_vm6 = vmmov %vm5949_vm1  ;;  %v2742_v16 = vsel %vm4641_vm15, 1.0, %v5807_v60  ;;  %vm860_vm15 = vcmp.eq.s32.totalorder %v4014_v46, %v5974_v45 }
 0x25f   : > { %v1565_v36 = vsel %vm5959_vm6, %v1454_v25, 0.0  ;;  %vm5960_vm4 = vmmov %vm5932_vm2 }
 0x260   : > { %v1773_v26 = vsel %vm5960_vm4, %v1707_v48, 0.0  ;;  %vm5961_vm3 = vmmov %vm5932_vm2  ;;  %v1597_v47 = vadd.f32 %v1565_v36, %v1404_v1  ;;  %v5993_v36 = vld [vmem:[#allocation23_spill] sm:$0xff]  ;;  %v5996_v1 = vld [vmem:[#allocation118_spill] sm:$0xff] }
 0x261   : > { %v1757_v33 = vsel %vm5961_vm3, %v1643_v38, 0.0  ;;  %vm5963_vm10 = vmmov %vm5956_vm8  ;;  %v1805_v19 = vadd.f32 %v1773_v26, %v1612_v0  ;;  %vm316_vm8 = vcmp.eq.s32.totalorder %v4014_v46, %v5973_v14  ;;  %v5994_v26 = vld [vmem:[#allocation93_spill] sm:$0xff] }
 0x262   : > { %vm1131_vm1 = vmor %vm1098_vm5, %vm5963_vm10  ;;  %v1789_v62 = vadd.f32 %v1757_v33, %v1596_v40  ;;  %vm476_vm5 = vcmp.eq.s32.totalorder %v4014_v46, %v5970_v4  ;;  %v1655_v40 = vpop.permute.xlu0 %1654  ;;  %v3154_v33 = vld [vmem:[%s3204_s15 + $0x78] sm:$0xff] }
 0x263   : > { %vm5965_vm9 = vmmov %vm5954_vm7  ;;  %v2757_v34 = vsel %vm1131_vm1, 1.0, %v5807_v60  ;;  %1493 = vperm.xlu1 %3058, %v3154_v33   ;;  %v6008_v14 = vld [vmem:[#allocation9_spill] sm:$0xff] }
 0x264   : > { %v1373_v5 = vsel %vm5965_vm9, %v5964_v35, 0.0  ;;  %vm5966_vm14 = vmmov %vm5954_vm7  ;;  %2866 = vmatprep.mubr.msk.f32.mxu0 %vm5951_vm0, %v1789_v62  ;;  %vm668_vm7 = vcmp.eq.s32.totalorder %v4014_v46, %v5971_v32 }
 0x265   : > { %v1388_v25 = vsel %vm5966_vm14, %v4304_v53, 0.0  ;;  %vm5967_vm2 = vmmov %vm5951_vm0  ;;  %v4673_v53 = vpop.permute.xlu1 %1324  ;;  %v1405_v57 = vadd.f32 %v2742_v16, %v1373_v5  ;;  %v3155_v16 = vld [vmem:[%s3204_s15 + $0xf0] sm:$0xff] }
 0x266   : > { %2890 = vmatprep.mubr.msk.f32.mxu1 %vm5967_vm2, %v1805_v19  ;;  %vm5968_vm12 = vmmov %vm5959_vm6  ;;  %v1420_v49 = vadd.f32 %v2757_v34, %v1388_v25 }
 0x267   : > { %v1566_v42 = vsel %vm5968_vm12, %v4124_v11, 0.0  ;;  %vm5969_vm11 = vmmov %vm5961_vm3  ;;  %vm1052_vm3 = vcmp.eq.s32.totalorder %v4014_v46, %v5976_v59  ;;  %vm331_vm12 = vcmp.eq.s32.totalorder %v4014_v46, %v5980_v55  ;;  %1557 = vperm.xlu1 %3058, %v5978_v9   ;;  %v6012_v59 = vld [vmem:[#allocation75_spill] sm:$0xff]  ;;  %v6019_v55 = vld [vmem:[#allocation114_spill] sm:$0xff] }
 0x268   : > { %v1758_v29 = vsel %vm5969_vm11, %v1647_v12, 0.0  ;;  %vm5972_vm13 = vmmov %vm5959_vm6  ;;  %v1598_v24 = vadd.f32 %v1566_v42, %v1405_v57  ;;  %v6003_v57 = vld [vmem:[#allocation10_spill] sm:$0xff] }
 0x269   : > { %v1790_v6 = vadd.f32 %v1758_v29, %v1597_v47  ;;  %v1581_v11 = vsel %vm5972_vm13, %v4118_v21, 0.0  ;;  %vm5975_vm6 = vmmov %vm5951_vm0  ;;  %v1711_v63 = vpop.permute.xlu1 %1710  ;;  %vm5984_vm13 = vcmp.eq.s32.totalorder %v4014_v46, 59 }
 0x26a   : > { %vm508_vm4 = vmor %vm316_vm8, %vm476_vm5  ;;  %v1613_v50 = vadd.f32 %v1581_v11, %v1420_v49  ;;  %v6004_v49 = vld [vmem:[#allocation41_spill] sm:$0xff] }
 0x26b   : > { %2867 = vmatmul.mubr.msk.f32.gmra.mrb[4].mxu0 %vm5975_vm6, %v1790_v6  ;;  %vm5977_vm10 = vmmov %vm5969_vm11  ;;  %vm491_vm11 = vcmp.eq.s32.totalorder %v4014_v46, %v5981_v2  ;;  %vm5987_vm6 = vcmp.eq.s32.totalorder %v4014_v46, 56  ;;  %3060 = vset.pattern.permute.xlu1 %v5767_v37  ;;  %v6005_v37 = vld [vmem:[#allocation42_spill] sm:$0xff]  ;;  %v6007_v6 = vld [vmem:[#allocation57_spill] sm:$0xff] }
 0x26c   : > { %v1759_v7 = vsel %vm5977_vm10, %v1651_v22, 0.0  ;;  %vm700_vm1 = vmor %vm508_vm4, %vm668_vm7  ;;  %vm683_vm7 = vcmp.eq.s32.totalorder %v4014_v46, %v5983_v20  ;;  %v1374_v58 = vsel %vm5987_vm6, %v5986_v54, 0.0  ;;  %1746 = vperm.xlu1 %3060, %v3155_v16   ;;  %v6021_v2 = vld [vmem:[#allocation58_spill] sm:$0xff]  ;;  %v6026_v54 = vld [vmem:[#allocation131_spill] sm:$0xff] }
 0x26d   : > { %v1791_v21 = vadd.f32 %v1759_v7, %v1598_v24  ;;  %vm892_vm9 = vmor %vm700_vm1, %vm860_vm15  ;;  %v1522_v23 = vpop.permute.xlu1 %1521  ;;  %vm875_vm15 = vcmp.eq.s32.totalorder %v4014_v46, %v5985_v10  ;;  %v6011_v24 = vld [vmem:[#allocation68_spill] sm:$0xff]  ;;  %v6013_v7 = vld [vmem:[#allocation85_spill] sm:$0xff] }
 0x26e   : > { %vm5979_vm14 = vmmov %vm5977_vm10  ;;  %v6023_v20 = vld [vmem:[#allocation126_spill] sm:$0xff]  ;;  %v6025_v10 = vld [vmem:[#allocation25_spill] sm:$0xff] }
 0x26f   : > { %v1774_v44 = vsel %vm5979_vm14, %v1711_v63, 0.0  ;;  %vm1084_vm0 = vmor %vm892_vm9, %vm1052_vm3  ;;  %2869 = vmatprep.mubr.msk.f32.mxu0 %vm5967_vm2, %v1791_v21  ;;  %vm1067_vm3 = vcmp.eq.s32.totalorder %v4014_v46, %v5988_v51  ;;  %v1760_v0 = vsel %vm5979_vm14, %v1655_v40, 0.0  ;;  %v6015_v21 = vld [vmem:[#allocation87_spill] sm:$0xff]  ;;  %v6016_v63 = vld [vmem:[#allocation109_spill] sm:$0xff] }
 0x270   : > { %v1806_v61 = vadd.f32 %v1774_v44, %v1613_v50  ;;  %vm5982_vm5 = vmmov %vm5967_vm2  ;;  %vm492_vm2 = vcmp.eq.s32.totalorder %v4014_v46, %v5990_v41  ;;  %1686 = vperm.xlu1 %3060, %v3154_v33   ;;  %v6017_v50 = vld [vmem:[#allocation103_spill] sm:$0xff]  ;;  %v6018_v44 = vld [vmem:[#allocation97_spill] sm:$0xff]  ;;  %v1663_v33 = vpop.permute.xlu0 %1662 }
 0x271   : > { %vm1117_vm8 = vmor %vm1084_vm0, %vm5984_vm13  ;;  %v1462_v8 = vpop.permute.xlu1 %1461  ;;  %vm5989_vm0 = vcmp.eq.s32.totalorder %v4014_v46, 57 }
 0x272   : > { %2891 = vmatmul.mubr.msk.f32.gmra.mrb[4].mxu1 %vm5982_vm5, %v1806_v61  ;;  %vm523_vm4 = vmor %vm331_vm12, %vm491_vm11  ;;  %v2743_v13 = vsel %vm1117_vm8, 1.0, %v5807_v60  ;;  %v1567_v48 = vsel %vm5989_vm0, %v1462_v8, 0.0  ;;  %vm684_vm12 = vcmp.eq.s32.totalorder %v4014_v46, %v5991_v56  ;;  %v6034_v56 = vld [vmem:[#allocation18_spill] sm:$0xff] }
 0x273   : > { %vm715_vm10 = vmor %vm523_vm4, %vm683_vm7  ;;  %v1406_v39 = vadd.f32 %v2743_v13, %v1374_v58  ;;  %vm332_vm7 = vcmp.eq.s32.totalorder %v4014_v46, %v5993_v36  ;;  %vm5997_vm4 = vcmask 523264   ;;  %v6028_v13 = vld [vmem:[#allocation28_spill] sm:$0xff]  ;;  %v6036_v36 = vld [vmem:[#allocation78_spill] sm:$0xff] }
 0x274   : > { %vm907_vm1 = vmor %vm715_vm10, %vm875_vm15 }
 0x275   : > { %vm1099_vm9 = vmor %vm907_vm1, %vm1067_vm3  ;;  %v1599_v38 = vadd.f32 %v1567_v48, %v1406_v39  ;;  %v4735_v31 = vpop.permute.xlu1 %1329  ;;  %v6029_v39 = vld [vmem:[#allocation59_spill] sm:$0xff]  ;;  %v6033_v48 = vld [vmem:[#allocation77_spill] sm:$0xff] }
 0x276   : > { %vm5992_vm11 = vmmov %vm5984_vm13  ;;  %vm876_vm13 = vcmp.eq.s32.totalorder %v4014_v46, %v5994_v26 }
 0x277   : > { %vm1132_vm5 = vmor %vm1099_vm9, %vm5992_vm11  ;;  %v1792_v18 = vadd.f32 %v1760_v0, %v1599_v38  ;;  %v6071_v0 = vld [vmem:[#allocation104_spill] sm:$0xff] }
 0x278   : > { %vm5995_vm8 = vmmov %vm5987_vm6  ;;  %vm1068_vm6 = vcmp.eq.s32.totalorder %v4014_v46, %v5996_v1  ;;  %v2758_v19 = vsel %vm1132_vm5, 1.0, %v5807_v60 }
 0x279   : > { %v1389_v15 = vsel %vm5995_vm8, %v4585_v52, 0.0  ;;  %vm524_vm15 = vmor %vm332_vm7, %vm492_vm2  ;;  %2870 = vmatmul.mubr.msk.f32.gmra.mrb[6].mxu0 %vm5997_vm4, %v1792_v18  ;;  %v1715_v5 = vpop.permute.xlu1 %1714  ;;  %vm317_vm7 = vcmp.eq.s32.totalorder %v4014_v46, %v6003_v57 }
 0x27a   : > { %vm716_vm3 = vmor %vm524_vm15, %vm684_vm12  ;;  %v1421_v35 = vadd.f32 %v2758_v19, %v1389_v15  ;;  %v1775_v25 = vsel %vm5979_vm14, %v1715_v5, 0.0  ;;  %v6037_v15 = vld [vmem:[#allocation94_spill] sm:$0xff] }
 0x27b   : > { %vm5998_vm10 = vmmov %vm5989_vm0 }
 0x27c   : > { %v1582_v62 = vsel %vm5998_vm10, %v1522_v23, 0.0  ;;  %vm908_vm1 = vmor %vm716_vm3, %vm876_vm13  ;;  %vm477_vm13 = vcmp.eq.s32.totalorder %v4014_v46, %v6004_v49 }
 0x27d   : > { %vm1100_vm9 = vmor %vm908_vm1, %vm1068_vm6  ;;  %v1614_v52 = vadd.f32 %v1582_v62, %v1421_v35  ;;  %v4755_v34 = vpop.permute.xlu1 %1334  ;;  %vm493_vm6 = vcmp.eq.s32.totalorder %v4014_v46, %v6007_v6  ;;  %v6041_v35 = vld [vmem:[#allocation120_spill] sm:$0xff] }
 0x27e   : > { %vm5999_vm0 = vmmov %vm5992_vm11 }
 0x27f   : > { %vm1133_vm2 = vmor %vm1100_vm9, %vm5999_vm0  ;;  %v1807_v47 = vadd.f32 %v1775_v25, %v1614_v52 }
 0x280   : > { %vm6000_vm12 = vmmov %vm5995_vm8  ;;  %v2759_v42 = vsel %vm1133_vm2, 1.0, %v5807_v60  ;;  %vm478_vm8 = vcmp.eq.s32.totalorder %v4014_v46, %v6005_v37  ;;  %vm685_vm2 = vcmp.eq.s32.totalorder %v4014_v46, %v6012_v59  ;;  %v1731_v59 = vpop.permute.xlu0 %1730 }
 0x281   : > { %v1390_v12 = vsel %vm6000_vm12, %v4673_v53, 0.0  ;;  %vm6001_vm11 = vmmov %vm5997_vm4  ;;  %v6006_v53 = vld [vmem:[#allocation26_spill] sm:$0xff]  ;;  %v1719_v32 = vpop.permute.xlu1 %1718  ;;  %vm318_vm4 = vcmp.eq.s32.totalorder %v4014_v46, %v6008_v14 }
 0x282   : > { %2893 = vmatprep.mubr.msk.f32.mxu1 %vm6001_vm11, %v1807_v47  ;;  %v1422_v29 = vadd.f32 %v2759_v42, %v1390_v12  ;;  %vm6002_vm5 = vmmov %vm5998_vm10  ;;  %vm333_vm15 = vcmp.eq.s32.totalorder %v4014_v46, %v6006_v53  ;;  %vm862_vm11 = vcmp.eq.s32.totalorder %v4014_v46, %v6013_v7  ;;  %v6043_v47 = vld [vmem:[#allocation99_spill] sm:$0xff] }
 0x283   : > { %v1583_v4 = vsel %vm6002_vm5, %v4129_v27, 0.0  ;;  %vm509_vm3 = vmor %vm317_vm7, %vm477_vm13  ;;  %v6009_v27 = vld [vmem:[#allocation65_spill] sm:$0xff]  ;;  %vm6014_vm5 = vcmask 523264   ;;  %vm861_vm13 = vcmp.eq.s32.totalorder %v4014_v46, %v6015_v21  ;;  %v6046_v42 = vld [vmem:[#allocation115_spill] sm:$0xff] }
 0x284   : > { %v1615_v11 = vadd.f32 %v1583_v4, %v1422_v29  ;;  %vm669_vm10 = vcmp.eq.s32.totalorder %v4014_v46, %v6009_v27  ;;  %vm6010_vm1 = vmmov %vm5979_vm14  ;;  %vm670_vm14 = vcmp.eq.s32.totalorder %v4014_v46, %v6011_v24  ;;  %v6054_v27 = vld [vmem:[#allocation132_spill] sm:$0xff] }
 0x285   : > { %v1776_v45 = vsel %vm6010_vm1, %v1719_v32, 0.0  ;;  %vm510_vm9 = vmor %vm318_vm4, %vm478_vm8  ;;  %v1530_v9 = vpop.permute.xlu1 %1529  ;;  %vm1054_vm4 = vcmp.eq.s32.totalorder %v4014_v46, %v6016_v63 }
 0x286   : > { %v1808_v22 = vadd.f32 %v1776_v45, %v1615_v11  ;;  %vm525_vm0 = vmor %vm333_vm15, %vm493_vm6  ;;  %vm1053_vm15 = vcmp.eq.s32.totalorder %v4014_v46, %v6017_v50 }
 0x287   : > { %vm701_vm12 = vmor %vm509_vm3, %vm669_vm10  ;;  %vm877_vm3 = vcmp.eq.s32.totalorder %v4014_v46, %v6018_v44 }
 0x288   : > { %2894 = vmatmul.mubr.msk.f32.gmra.mrb[6].mxu1 %vm6014_vm5, %v1808_v22  ;;  %vm702_vm7 = vmor %vm510_vm9, %vm670_vm14  ;;  %vm1069_vm14 = vcmp.eq.s32.totalorder %v4014_v46, %v6019_v55 }
 0x289   : > { %vm717_vm8 = vmor %vm525_vm0, %vm685_vm2  ;;  %v1470_v61 = vpop.permute.xlu1 %1469  ;;  %vm6020_vm0 = vcmp.eq.s32.totalorder %v4014_v46, 59 }
 0x28a   : > { %vm894_vm1 = vmor %vm702_vm7, %vm862_vm11  ;;  %vm494_vm11 = vcmp.eq.s32.totalorder %v4014_v46, %v6021_v2 }
 0x28b   : > { %vm893_vm6 = vmor %vm701_vm12, %vm861_vm13  ;;  %vm6024_vm13 = vcmp.eq.s32.totalorder %v4014_v46, 56 }
 0x28c   : > { %vm1086_vm10 = vmor %vm894_vm1, %vm1054_vm4  ;;  %v1376_v23 = vsel %vm6024_vm13, %v6023_v20, 0.0  ;;  %vm334_vm4 = vcmp.eq.s32.totalorder %v4014_v46, %v6025_v10  ;;  %v6061_v20 = vld [vmem:[#allocation43_spill] sm:$0xff] }
 0x28d   : > { %vm1085_vm5 = vmor %vm893_vm6, %vm1053_vm15  ;;  %v4807_v51 = vpop.permute.xlu1 %1259  ;;  %vm335_vm15 = vcmp.eq.s32.totalorder %v4014_v46, %v6028_v13  ;;  %vm495_vm6 = vcmp.eq.s32.totalorder %v4014_v46, %v6029_v39  ;;  %v6065_v10 = vld [vmem:[#allocation67_spill] sm:$0xff]  ;;  %v6068_v13 = vld [vmem:[#allocation86_spill] sm:$0xff] }
 0x28e   : > { %vm909_vm9 = vmor %vm717_vm8, %vm877_vm3  ;;  %vm6030_vm3 = vcmp.eq.s32.totalorder %v4014_v46, 57  ;;  %v6069_v39 = vld [vmem:[#allocation89_spill] sm:$0xff] }
 0x28f   : > { %vm1119_vm2 = vmor %vm1086_vm10, %vm6020_vm0  ;;  %v1569_v8 = vsel %vm6030_vm3, %v1470_v61, 0.0 }
 0x290   : > { %vm6022_vm7 = vmmov %vm6020_vm0  ;;  %v2745_v40 = vsel %vm1119_vm2, 1.0, %v5807_v60 }
 0x291   : > { %vm1118_vm12 = vmor %vm1085_vm5, %vm6022_vm7  ;;  %vm687_vm5 = vcmp.eq.s32.totalorder %v4014_v46, %v6033_v48  ;;  %v1408_v38 = vadd.f32 %v2745_v40, %v1376_v23  ;;  %vm878_vm7 = vcmp.eq.s32.totalorder %v4014_v46, %v6037_v15  ;;  %v1659_v25 = vpop.permute.xlu1 %1658 }
 0x292   : > { %vm1101_vm8 = vmor %vm909_vm9, %vm1069_vm14  ;;  %v2744_v41 = vsel %vm1118_vm12, 1.0, %v5807_v60  ;;  %vm686_vm14 = vcmp.eq.s32.totalorder %v4014_v46, %v6036_v36 }
 0x293   : > { %vm6027_vm1 = vmmov %vm6024_vm13  ;;  %v1601_v19 = vadd.f32 %v1569_v8, %v1408_v38  ;;  %v6070_v8 = vld [vmem:[#allocation110_spill] sm:$0xff]  ;;  %v6074_v38 = vld [vmem:[#allocation133_spill] sm:$0xff] }
 0x294   : > { %v1375_v58 = vsel %vm6027_vm1, %v6026_v54, 0.0  ;;  %vm4816_vm10 = vmor %vm334_vm4, %vm494_vm11  ;;  %vm1070_vm4 = vcmp.eq.s32.totalorder %v4014_v46, %v6041_v35  ;;  %v6066_v54 = vld [vmem:[#allocation11_spill] sm:$0xff]  ;;  %v6079_v35 = vld [vmem:[#allocation60_spill] sm:$0xff] }
 0x295   : > { %vm6035_vm9 = vmmov %vm6030_vm3  ;;  %v1407_v26 = vadd.f32 %v2744_v41, %v1375_v58  ;;  %v1723_v37 = vpop.permute.xlu1 %1722  ;;  %v6067_v58 = vld [vmem:[#allocation70_spill] sm:$0xff] }
 0x296   : > { %v1568_v18 = vsel %vm6035_vm9, %v6034_v56, 0.0  ;;  %vm1134_vm2 = vmor %vm1101_vm8, %vm6020_vm0  ;;  %vm6042_vm8 = vcmp.eq.s32.totalorder %v4014_v46, 58  ;;  %vm1071_vm9 = vcmp.eq.s32.totalorder %v4014_v46, %v6046_v42  ;;  %v6085_v42 = vld [vmem:[#allocation121_spill] sm:$0xff] }
 0x297   : > { %vm527_vm11 = vmor %vm335_vm15, %vm495_vm6  ;;  %v1600_v52 = vadd.f32 %v1568_v18, %v1407_v26  ;;  %v1762_v5 = vsel %vm6042_vm8, %v1663_v33, 0.0  ;;  %vm879_vm15 = vcmp.eq.s32.totalorder %v4014_v46, %v6043_v47 }
 0x298   : > { %vm6038_vm13 = vmmov %vm6027_vm1  ;;  %v1794_v57 = vadd.f32 %v1762_v5, %v1601_v19  ;;  %v1671_v19 = vpop.permute.xlu0 %1670 }
 0x299   : > { %v1391_v1 = vsel %vm6038_vm13, %v4735_v31, 0.0  ;;  %vm4835_vm12 = vmor %vm527_vm11, %vm687_vm5  ;;  %v2760_v31 = vsel %vm1134_vm2, 1.0, %v5807_v60  ;;  %v4869_v14 = vpop.permute.xlu1 %1344 }
 0x29a   : > { %vm718_vm1 = vmor %vm4816_vm10, %vm686_vm14  ;;  %v1423_v29 = vadd.f32 %v2760_v31, %v1391_v1  ;;  %vm6047_vm14 = vcmask 523264   ;;  %v6082_v31 = vld [vmem:[#allocation27_spill] sm:$0xff] }
 0x29b   : > { %vm6044_vm6 = vmmov %vm6030_vm3 }
 0x29c   : > { %v1584_v12 = vsel %vm6044_vm6, %v1530_v9, 0.0  ;;  %vm6045_vm3 = vmmov %vm6042_vm8 }
 0x29d   : > { %v1761_v16 = vsel %vm6045_vm3, %v1659_v25, 0.0  ;;  %vm910_vm5 = vmor %vm718_vm1, %vm878_vm7  ;;  %v1616_v49 = vadd.f32 %v1584_v12, %v1423_v29  ;;  %vm6050_vm7 = vcmp.eq.s32.totalorder %v4014_v46, 59  ;;  %v1727_v63 = vpop.permute.xlu1 %1726  ;;  %v6083_v12 = vld [vmem:[#allocation96_spill] sm:$0xff] }
 0x29e   : > { %v1793_v4 = vadd.f32 %v1761_v16, %v1600_v52  ;;  %vm1102_vm0 = vmor %vm910_vm5, %vm1070_vm4  ;;  %vm6051_vm4 = vcmp.eq.s32.totalorder %v4014_v46, 56 }
 0x29f   : > { %vm911_vm10 = vmor %vm4835_vm12, %vm879_vm15  ;;  %v1392_v32 = vsel %vm6051_vm4, %v4755_v34, 0.0 }
 0x2a0   : > { %2872 = vmatprep.mubr.msk.f32.mxu0 %vm6047_vm14, %v1793_v4  ;;  %vm1103_vm2 = vmor %vm911_vm10, %vm1071_vm9 }
 0x2a1   : > { %vm6048_vm11 = vmmov %vm6045_vm3  ;;  %vm6056_vm3 = vcmp.eq.s32.totalorder %v4014_v46, 57  ;;  %v1474_v23 = vpop.permute.xlu1 %1473 }
 0x2a2   : > { %v1777_v53 = vsel %vm6048_vm11, %v1723_v37, 0.0  ;;  %vm6049_vm13 = vmmov %vm6047_vm14  ;;  %v1585_v22 = vsel %vm6056_vm3, %v4191_v28, 0.0  ;;  %v6060_v28 = vld [vmem:[#allocation12_spill] sm:$0xff]  ;;  %vm479_vm14 = vcmp.eq.s32.totalorder %v4014_v46, %v6061_v20  ;;  %v6106_v20 = vld [vmem:[#allocation101_spill] sm:$0xff] }
 0x2a3   : > { %2873 = vmatmul.mubr.msk.f32.gmra.mrb[8].mxu0 %vm6049_vm13, %v1794_v57  ;;  %vm1135_vm8 = vmor %vm1102_vm0, %vm6050_vm7  ;;  %v1809_v6 = vadd.f32 %v1777_v53, %v1616_v49  ;;  %vm319_vm10 = vcmp.eq.s32.totalorder %v4014_v46, %v6060_v28  ;;  %v6105_v28 = vld [vmem:[#allocation105_spill] sm:$0xff] }
 0x2a4   : > { %vm6052_vm1 = vmmov %vm6049_vm13  ;;  %v2761_v11 = vsel %vm1135_vm8, 1.0, %v5807_v60  ;;  %vm320_vm8 = vcmp.eq.s32.totalorder %v4014_v46, %v6066_v54  ;;  %v6111_v54 = vld [vmem:[#allocation34_spill] sm:$0xff] }
 0x2a5   : > { %2896 = vmatprep.mubr.msk.f32.mxu1 %vm6052_vm1, %v1809_v6  ;;  %vm6053_vm12 = vmmov %vm6050_vm7  ;;  %v1424_v24 = vadd.f32 %v2761_v11, %v1392_v32  ;;  %vm671_vm7 = vcmp.eq.s32.totalorder %v4014_v46, %v6065_v10  ;;  %v1478_v40 = vpop.permute.xlu1 %1477  ;;  %v6091_v32 = vld [vmem:[#allocation14_spill] sm:$0xff]  ;;  %v6092_v11 = vld [vmem:[#allocation45_spill] sm:$0xff] }
 0x2a6   : > { %vm1136_vm15 = vmor %vm1103_vm2, %vm6053_vm12 }
 0x2a7   : > { %vm6055_vm6 = vmmov %vm6051_vm4  ;;  %v2762_v34 = vsel %vm1136_vm15, 1.0, %v5807_v60  ;;  %v1617_v50 = vadd.f32 %v1585_v22, %v1424_v24  ;;  %vm864_vm15 = vcmp.eq.s32.totalorder %v4014_v46, %v6068_v13  ;;  %v6094_v24 = vld [vmem:[#allocation30_spill] sm:$0xff] }
 0x2a8   : > { %v1393_v45 = vsel %vm6055_vm6, %v6054_v27, 0.0  ;;  %vm6057_vm5 = vmmov %vm6056_vm3  ;;  %vm863_vm3 = vcmp.eq.s32.totalorder %v4014_v46, %v6069_v39 }
 0x2a9   : > { %v1586_v7 = vsel %vm6057_vm5, %v4252_v43, 0.0  ;;  %v1425_v21 = vadd.f32 %v2762_v34, %v1393_v45  ;;  %vm6058_vm9 = vmmov %vm6048_vm11  ;;  %v6063_v43 = vld [vmem:[#allocation44_spill] sm:$0xff]  ;;  %v1542_v48 = vpop.permute.xlu1 %1541  ;;  %v6093_v45 = vld [vmem:[#allocation46_spill] sm:$0xff] }
 0x2aa   : > { %v1779_v9 = vsel %vm6058_vm9, %v1731_v59, 0.0  ;;  %vm6059_vm0 = vmmov %vm6058_vm9  ;;  %vm480_vm11 = vcmp.eq.s32.totalorder %v4014_v46, %v6063_v43  ;;  %vm1056_vm9 = vcmp.eq.s32.totalorder %v4014_v46, %v6070_v8  ;;  %v6096_v34 = vld [vmem:[#allocation13_spill] sm:$0xff]  ;;  %v6114_v8 = vld [vmem:[#allocation62_spill] sm:$0xff] }
 0x2ab   : > { %v1618_v44 = vadd.f32 %v1586_v7, %v1425_v21  ;;  %v1778_v61 = vsel %vm6059_vm0, %v1727_v63, 0.0  ;;  %vm6062_vm2 = vmmov %vm6052_vm1  ;;  %v6097_v7 = vld [vmem:[#allocation69_spill] sm:$0xff] }
 0x2ac   : > { %v1810_v55 = vadd.f32 %v1778_v61, %v1617_v50  ;;  %vm6064_vm13 = vmmov %vm6052_vm1  ;;  %vm672_vm1 = vcmp.eq.s32.totalorder %v4014_v46, %v6067_v58  ;;  %v6100_v50 = vld [vmem:[#allocation79_spill] sm:$0xff] }
 0x2ad   : > { %v1811_v2 = vadd.f32 %v1779_v9, %v1618_v44  ;;  %vm511_vm4 = vmor %vm319_vm10, %vm479_vm14  ;;  %vm1055_vm10 = vcmp.eq.s32.totalorder %v4014_v46, %v6071_v0  ;;  %v4917_v18 = vpop.permute.xlu1 %1349  ;;  %v6099_v9 = vld [vmem:[#allocation72_spill] sm:$0xff]  ;;  %v6103_v61 = vld [vmem:[#allocation91_spill] sm:$0xff] }
 0x2ae   : > { %2897 = vmatmul.mubr.msk.f32.gmra.mrb[8].mxu1 %vm6062_vm2, %v1810_v55  ;;  %vm512_vm12 = vmor %vm320_vm8, %vm480_vm11  ;;  %v6101_v44 = vld [vmem:[#allocation88_spill] sm:$0xff] }
 0x2af   : > { %2899 = vmatprep.mubr.msk.f32.mxu1 %vm6064_vm13, %v1811_v2  ;;  %vm703_vm6 = vmor %vm511_vm4, %vm671_vm7  ;;  %vm6072_vm13 = vcmp.eq.s32.totalorder %v4014_v46, 59  ;;  %v6104_v2 = vld [vmem:[#allocation111_spill] sm:$0xff] }
 0x2b0   : > { %vm704_vm5 = vmor %vm512_vm12, %vm672_vm1  ;;  %vm6075_vm1 = vcmp.eq.s32.totalorder %v4014_v46, 56 }
 0x2b1   : > { %vm896_vm0 = vmor %vm704_vm5, %vm864_vm15  ;;  %v1378_v41 = vsel %vm6075_vm1, %v6074_v38, 0.0  ;;  %vm6077_vm15 = vcmp.eq.s32.totalorder %v4014_v46, 57  ;;  %v1667_v47 = vpop.permute.xlu1 %1666 }
 0x2b2   : > { %vm895_vm14 = vmor %vm703_vm6, %vm863_vm3  ;;  %v1571_v26 = vsel %vm6077_vm15, %v1478_v40, 0.0  ;;  %vm496_vm3 = vcmp.eq.s32.totalorder %v4014_v46, %v6079_v35 }
 0x2b3   : > { %vm1088_vm2 = vmor %vm896_vm0, %vm1056_vm9  ;;  %vm6081_vm9 = vcmp.eq.s32.totalorder %v4014_v46, 58  ;;  %vm336_vm0 = vcmp.eq.s32.totalorder %v4014_v46, %v6082_v31 }
 0x2b4   : > { %vm1087_vm11 = vmor %vm895_vm14, %vm1055_vm10  ;;  %v1764_v25 = vsel %vm6081_vm9, %v1671_v19, 0.0  ;;  %vm880_vm10 = vcmp.eq.s32.totalorder %v4014_v46, %v6083_v12 }
 0x2b5   : > { %vm1121_vm8 = vmor %vm1088_vm2, %vm6072_vm13  ;;  %v1275_v57 = vpop.permute.xlu1 %1274 }
 0x2b6   : > { %vm6073_vm7 = vmmov %vm6072_vm13  ;;  %v2747_v36 = vsel %vm1121_vm8, 1.0, %v5807_v60 }
 0x2b7   : > { %vm1120_vm4 = vmor %vm1087_vm11, %vm6073_vm7  ;;  %v1410_v15 = vadd.f32 %v2747_v36, %v1378_v41  ;;  %vm1072_vm11 = vcmp.eq.s32.totalorder %v4014_v46, %v6085_v42  ;;  %vm6086_vm7 = vcmask 523264   ;;  %v6116_v41 = vld [vmem:[#allocation82_spill] sm:$0xff]  ;;  %v6118_v36 = vld [vmem:[#allocation29_spill] sm:$0xff] }
 0x2b8   : > { %vm6076_vm12 = vmmov %vm6075_vm1  ;;  %v2746_v33 = vsel %vm1120_vm4, 1.0, %v5807_v60  ;;  %v6128_v42 = vld [vmem:[#allocation16_spill] sm:$0xff] }
 0x2b9   : > { %v1377_v56 = vsel %vm6076_vm12, %v4807_v51, 0.0  ;;  %vm6078_vm6 = vmmov %vm6077_vm15  ;;  %v1603_v52 = vadd.f32 %v1571_v26, %v1410_v15  ;;  %v6080_v51 = vld [vmem:[#allocation80_spill] sm:$0xff]  ;;  %vm6088_vm12 = vcmp.eq.s32.totalorder %v4014_v46, 59  ;;  %v4946_v37 = vpop.permute.xlu1 %1354  ;;  %v6119_v26 = vld [vmem:[#allocation98_spill] sm:$0xff] }
 0x2ba   : > { %v1570_v1 = vsel %vm6078_vm6, %v1474_v23, 0.0  ;;  %v1409_v62 = vadd.f32 %v2746_v33, %v1377_v56  ;;  %vm688_vm5 = vcmp.eq.s32.totalorder %v4014_v46, %v6080_v51  ;;  %vm6084_vm14 = vmmov %vm6081_vm9  ;;  %vm6089_vm6 = vcmp.eq.s32.totalorder %v4014_v46, 56  ;;  %v6107_v23 = vld [vmem:[#allocation117_spill] sm:$0xff]  ;;  %v1679_v33 = vpop.permute.xlu0 %1678 }
 0x2bb   : > { %v1763_v16 = vsel %vm6084_vm14, %v1667_v47, 0.0  ;;  %vm528_vm2 = vmor %vm336_vm0, %vm496_vm3  ;;  %v1796_v4 = vadd.f32 %v1764_v25, %v1603_v52  ;;  %v1394_v49 = vsel %vm6089_vm6, %v4869_v14, 0.0  ;;  %vm6090_vm3 = vcmp.eq.s32.totalorder %v4014_v46, 57  ;;  %v6095_v14 = vld [vmem:[#allocation61_spill] sm:$0xff] }
 0x2bc   : > { %v1602_v5 = vadd.f32 %v1570_v1, %v1409_v62  ;;  %vm720_vm13 = vmor %vm528_vm2, %vm688_vm5  ;;  %v1587_v6 = vsel %vm6090_vm3, %v1542_v48, 0.0  ;;  %vm321_vm5 = vcmp.eq.s32.totalorder %v4014_v46, %v6091_v32  ;;  %vm481_vm9 = vcmp.eq.s32.totalorder %v4014_v46, %v6092_v11  ;;  %v6121_v1 = vld [vmem:[#allocation122_spill] sm:$0xff] }
 0x2bd   : > { %vm912_vm8 = vmor %vm720_vm13, %vm880_vm10  ;;  %vm482_vm0 = vcmp.eq.s32.totalorder %v4014_v46, %v6093_v45  ;;  %vm337_vm10 = vcmp.eq.s32.totalorder %v4014_v46, %v6094_v24  ;;  %vm497_vm14 = vcmp.eq.s32.totalorder %v4014_v46, %v6095_v14  ;;  %v1735_v59 = vpop.permute.xlu1 %1734  ;;  %vm322_vm2 = vcmp.eq.s32.totalorder %v4014_v46, %v6096_v34  ;;  %v6137_v24 = vld [vmem:[#allocation32_spill] sm:$0xff]  ;;  %v6139_v14 = vld [vmem:[#allocation15_spill] sm:$0xff] }
 0x2be   : > { %v1795_v29 = vadd.f32 %v1763_v16, %v1602_v5  ;;  %vm1104_vm4 = vmor %vm912_vm8, %vm1072_vm11  ;;  %vm673_vm13 = vcmp.eq.s32.totalorder %v4014_v46, %v6097_v7  ;;  %vm6098_vm8 = vcmp.eq.s32.totalorder %v4014_v46, 58  ;;  %vm866_vm6 = vcmp.eq.s32.totalorder %v4014_v46, %v6101_v44  ;;  %v6144_v7 = vld [vmem:[#allocation73_spill] sm:$0xff] }
 0x2bf   : > { %vm6087_vm1 = vmmov %vm6086_vm7  ;;  %v1780_v21 = vsel %vm6098_vm8, %v1735_v59, 0.0  ;;  %vm6102_vm3 = vcmask 523264   ;;  %v6142_v59 = vld [vmem:[#allocation64_spill] sm:$0xff] }
 0x2c0   : > { %2875 = vmatprep.mubr.msk.f32.mxu0 %vm6086_vm7, %v1795_v29  ;;  %vm1137_vm15 = vmor %vm1104_vm4, %vm6088_vm12  ;;  %vm674_vm4 = vcmp.eq.s32.totalorder %v4014_v46, %v6099_v9  ;;  %vm689_vm12 = vcmp.eq.s32.totalorder %v4014_v46, %v6100_v50  ;;  %v6129_v29 = vld [vmem:[#allocation47_spill] sm:$0xff]  ;;  %v6146_v50 = vld [vmem:[#allocation81_spill] sm:$0xff] }
 0x2c1   : > { %2876 = vmatmul.mubr.msk.f32.gmra.mrb[10].mxu0 %vm6087_vm1, %v1796_v4  ;;  %v2763_v53 = vsel %vm1137_vm15, 1.0, %v5807_v60  ;;  %vm513_vm11 = vmor %vm321_vm5, %vm481_vm9  ;;  %vm865_vm9 = vcmp.eq.s32.totalorder %v4014_v46, %v6103_v61  ;;  %v1546_v55 = vpop.permute.xlu1 %1545 }
 0x2c2   : > { %v1426_v27 = vadd.f32 %v2763_v53, %v1394_v49  ;;  %vm514_vm7 = vmor %vm322_vm2, %vm482_vm0  ;;  %vm1058_vm2 = vcmp.eq.s32.totalorder %v4014_v46, %v6104_v2  ;;  %v6133_v53 = vld [vmem:[#allocation92_spill] sm:$0xff] }
 0x2c3   : > { %vm529_vm1 = vmor %vm337_vm10, %vm497_vm14  ;;  %vm1057_vm10 = vcmp.eq.s32.totalorder %v4014_v46, %v6105_v28  ;;  %v6153_v28 = vld [vmem:[#allocation100_spill] sm:$0xff] }
 0x2c4   : > { %v1619_v22 = vadd.f32 %v1587_v6, %v1426_v27  ;;  %vm705_vm15 = vmor %vm513_vm11, %vm673_vm13  ;;  %vm881_vm11 = vcmp.eq.s32.totalorder %v4014_v46, %v6106_v20  ;;  %v6135_v6 = vld [vmem:[#allocation108_spill] sm:$0xff]  ;;  %v6154_v20 = vld [vmem:[#allocation102_spill] sm:$0xff] }
 0x2c5   : > { %vm706_vm5 = vmor %vm514_vm7, %vm674_vm4  ;;  %v1486_v43 = vpop.permute.xlu1 %1485  ;;  %vm1073_vm4 = vcmp.eq.s32.totalorder %v4014_v46, %v6107_v23  ;;  %v6136_v27 = vld [vmem:[#allocation48_spill] sm:$0xff] }
 0x2c6   : > { %v1812_v63 = vadd.f32 %v1780_v21, %v1619_v22  ;;  %vm721_vm0 = vmor %vm529_vm1, %vm689_vm12  ;;  %vm6108_vm1 = vcmp.eq.s32.totalorder %v4014_v46, 59  ;;  %v6156_v23 = vld [vmem:[#allocation124_spill] sm:$0xff] }
 0x2c7   : > { %vm898_vm8 = vmor %vm706_vm5, %vm866_vm6 }
 0x2c8   : > { %2900 = vmatmul.mubr.msk.f32.gmra.mrb[10].mxu1 %vm6102_vm3, %v1812_v63  ;;  %vm897_vm14 = vmor %vm705_vm15, %vm865_vm9  ;;  %vm6110_vm9 = vcmp.eq.s32.totalorder %v4014_v46, 56  ;;  %v6145_v63 = vld [vmem:[#allocation31_spill] sm:$0xff] }
 0x2c9   : > { %vm1090_vm13 = vmor %vm898_vm8, %vm1058_vm2  ;;  %v1380_v10 = vsel %vm6110_vm9, %v1275_v57, 0.0  ;;  %v4993_v13 = vpop.permute.xlu1 %1279  ;;  %vm498_vm8 = vcmp.eq.s32.totalorder %v4014_v46, %v6114_v8  ;;  %v6131_v57 = vld [vmem:[#allocation71_spill] sm:$0xff] }
 0x2ca   : > { %vm1089_vm3 = vmor %vm897_vm14, %vm1057_vm10  ;;  %vm690_vm14 = vcmp.eq.s32.totalorder %v4014_v46, %v6116_v41  ;;  %v6161_v41 = vld [vmem:[#allocation112_spill] sm:$0xff] }
 0x2cb   : > { %vm913_vm7 = vmor %vm721_vm0, %vm881_vm11  ;;  %vm6113_vm0 = vcmp.eq.s32.totalorder %v4014_v46, 57 }
 0x2cc   : > { %vm1123_vm12 = vmor %vm1090_vm13, %vm6108_vm1  ;;  %v1573_v40 = vsel %vm6113_vm0, %v1486_v43, 0.0 }
 0x2cd   : > { %vm6109_vm5 = vmmov %vm6108_vm1  ;;  %v2749_v39 = vsel %vm1123_vm12, 1.0, %v5807_v60  ;;  %vm1074_vm12 = vcmp.eq.s32.totalorder %v4014_v46, %v6121_v1  ;;  %v1675_v35 = vpop.permute.xlu1 %1674 }
 0x2ce   : > { %vm1122_vm6 = vmor %vm1089_vm3, %vm6109_vm5  ;;  %v1412_v38 = vadd.f32 %v2749_v39, %v1380_v10  ;;  %vm338_vm3 = vcmp.eq.s32.totalorder %v4014_v46, %v6118_v36  ;;  %vm6122_vm5 = vcmp.eq.s32.totalorder %v4014_v46, 58  ;;  %v6159_v39 = vld [vmem:[#allocation90_spill] sm:$0xff]  ;;  %v6166_v36 = vld [vmem:[#allocation4_spill] sm:$0xff] }
 0x2cf   : > { %vm1105_vm15 = vmor %vm913_vm7, %vm1073_vm4  ;;  %v2748_v0 = vsel %vm1122_vm6, 1.0, %v5807_v60  ;;  %vm882_vm7 = vcmp.eq.s32.totalorder %v4014_v46, %v6119_v26  ;;  %v1766_v62 = vsel %vm6122_vm5, %v1679_v33, 0.0 }
 0x2d0   : > { %vm6112_vm2 = vmmov %vm6110_vm9 }
 0x2d1   : > { %v1379_v58 = vsel %vm6112_vm2, %v6111_v54, 0.0  ;;  %vm6115_vm10 = vmmov %vm6113_vm0  ;;  %v1739_v12 = vpop.permute.xlu1 %1738 }
 0x2d2   : > { %v1572_v48 = vsel %vm6115_vm10, %v4294_v30, 0.0  ;;  %v1411_v56 = vadd.f32 %v2748_v0, %v1379_v58  ;;  %vm6117_vm11 = vmmov %vm6108_vm1  ;;  %v1605_v30 = vadd.f32 %v1573_v40, %v1412_v38  ;;  %v6157_v58 = vld [vmem:[#allocation119_spill] sm:$0xff]  ;;  %v1683_v40 = vpop.permute.xlu0 %1682 }
 0x2d3   : > { %vm1138_vm13 = vmor %vm1105_vm15, %vm6117_vm11  ;;  %vm323_vm11 = vcmp.eq.s32.totalorder %v4014_v46, %v6128_v42 }
 0x2d4   : > { %vm6120_vm4 = vmmov %vm6112_vm2  ;;  %v1604_v19 = vadd.f32 %v1572_v48, %v1411_v56  ;;  %v2764_v52 = vsel %vm1138_vm13, 1.0, %v5807_v60  ;;  %v1798_v47 = vadd.f32 %v1766_v62, %v1605_v30  ;;  %vm483_vm13 = vcmp.eq.s32.totalorder %v4014_v46, %v6129_v29 }
 0x2d5   : > { %v1395_v15 = vsel %vm6120_vm4, %v4917_v18, 0.0  ;;  %vm530_vm1 = vmor %vm338_vm3, %vm498_vm8  ;;  %vm6125_vm8 = vcmask 523264   ;;  %vm6130_vm3 = vcmp.eq.s32.totalorder %v4014_v46, 59  ;;  %vm675_vm4 = vcmp.eq.s32.totalorder %v4014_v46, %v6131_v57  ;;  %v1365_v11 = vpop.permute.xlu1 %1364 }
 0x2d6   : > { %vm722_vm6 = vmor %vm530_vm1, %vm690_vm14  ;;  %v1427_v5 = vadd.f32 %v2764_v52, %v1395_v15  ;;  %vm6132_vm1 = vcmp.eq.s32.totalorder %v4014_v46, 56  ;;  %v6171_v52 = vld [vmem:[#allocation33_spill] sm:$0xff] }
 0x2d7   : > { %vm6123_vm9 = vmmov %vm6113_vm0  ;;  %v1396_v49 = vsel %vm6132_vm1, %v4946_v37, 0.0  ;;  %v6138_v37 = vld [vmem:[#allocation63_spill] sm:$0xff]  ;;  %vm676_vm1 = vcmp.eq.s32.totalorder %v4014_v46, %v6144_v7 }
 0x2d8   : > { %v1588_v51 = vsel %vm6123_vm9, %v1546_v55, 0.0  ;;  %vm6124_vm15 = vmmov %vm6122_vm5  ;;  %vm1059_vm9 = vcmp.eq.s32.totalorder %v4014_v46, %v6135_v6 }
 0x2d9   : > { %v1765_v18 = vsel %vm6124_vm15, %v1675_v35, 0.0  ;;  %vm914_vm2 = vmor %vm722_vm6, %vm882_vm7  ;;  %v1620_v31 = vadd.f32 %v1588_v51, %v1427_v5  ;;  %vm484_vm15 = vcmp.eq.s32.totalorder %v4014_v46, %v6136_v27  ;;  %v1743_v21 = vpop.permute.xlu1 %1742 }
 0x2da   : > { %v1797_v25 = vadd.f32 %v1765_v18, %v1604_v19  ;;  %vm1106_vm0 = vmor %vm914_vm2, %vm1074_vm12  ;;  %vm867_vm12 = vcmp.eq.s32.totalorder %v4014_v46, %v6133_v53  ;;  %v1751_v18 = vpop.permute.xlu0 %1750 }
 0x2db   : > { %vm6126_vm10 = vmmov %vm6122_vm5 }
 0x2dc   : > { %2878 = vmatprep.mubr.msk.f32.mxu0 %vm6125_vm8, %v1797_v25  ;;  %v1781_v16 = vsel %vm6126_vm10, %v1739_v12, 0.0  ;;  %vm6127_vm14 = vmmov %vm6125_vm8 }
 0x2dd   : > { %2879 = vmatmul.mubr.msk.f32.gmra.mrb[12].mxu0 %vm6127_vm14, %v1798_v47  ;;  %vm1139_vm7 = vmor %vm1106_vm0, %vm6130_vm3  ;;  %v1813_v4 = vadd.f32 %v1781_v16, %v1620_v31  ;;  %vm339_vm0 = vcmp.eq.s32.totalorder %v4014_v46, %v6137_v24  ;;  %vm324_vm14 = vcmp.eq.s32.totalorder %v4014_v46, %v6139_v14  ;;  %vm500_vm3 = vcmp.eq.s32.totalorder %v4014_v46, %v6142_v59  ;;  %v1490_v54 = vpop.permute.xlu1 %1489 }
 0x2de   : > { %vm6134_vm5 = vmmov %vm6125_vm8  ;;  %v2765_v32 = vsel %vm1139_vm7, 1.0, %v5807_v60  ;;  %vm499_vm8 = vcmp.eq.s32.totalorder %v4014_v46, %v6138_v37  ;;  %vm6143_vm7 = vcmp.eq.s32.totalorder %v4014_v46, 57 }
 0x2df   : > { %2902 = vmatprep.mubr.msk.f32.mxu1 %vm6134_vm5, %v1813_v4  ;;  %vm515_vm6 = vmor %vm323_vm11, %vm483_vm13  ;;  %v1428_v45 = vadd.f32 %v2765_v32, %v1396_v49  ;;  %v1589_v34 = vsel %vm6143_vm7, %v4359_v3, 0.0  ;;  %vm691_vm5 = vcmp.eq.s32.totalorder %v4014_v46, %v6146_v50  ;;  %v6149_v3 = vld [vmem:[#allocation83_spill] sm:$0xff]  ;;  %vm6155_vm7 = vcmask 523264  }
 0x2e0   : > { %vm707_vm2 = vmor %vm515_vm6, %vm675_vm4  ;;  %vm6147_vm6 = vcmp.eq.s32.totalorder %v4014_v46, 59 }
 0x2e1   : > { %vm899_vm10 = vmor %vm707_vm2, %vm867_vm12  ;;  %v1621_v9 = vadd.f32 %v1589_v34, %v1428_v45  ;;  %vm340_vm12 = vcmp.eq.s32.totalorder %v4014_v46, %v6145_v63 }
 0x2e2   : > { %vm1091_vm11 = vmor %vm899_vm10, %vm1059_vm9  ;;  %v1494_v38 = vpop.permute.xlu1 %1493 }
 0x2e3   : > { %vm5053_vm13 = vmor %vm324_vm14, %vm484_vm15  ;;  %vm6148_vm15 = vcmp.eq.s32.totalorder %v4014_v46, 58  ;;  %vm884_vm14 = vcmp.eq.s32.totalorder %v4014_v46, %v6153_v28 }
 0x2e4   : > { %vm531_vm4 = vmor %vm339_vm0, %vm499_vm8  ;;  %v1782_v44 = vsel %vm6148_vm15, %v1743_v21, 0.0  ;;  %vm692_vm0 = vcmp.eq.s32.totalorder %v4014_v46, %v6149_v3  ;;  %vm6150_vm8 = vcmp.eq.s32.totalorder %v4014_v46, 56  ;;  %vm6158_vm15 = vcmp.eq.s32.totalorder %v4014_v46, 57 }
 0x2e5   : > { %vm1124_vm9 = vmor %vm1091_vm11, %vm6147_vm6  ;;  %v1381_v61 = vsel %vm6150_vm8, %v4993_v13, 0.0  ;;  %v1814_v55 = vadd.f32 %v1782_v44, %v1621_v9  ;;  %vm1076_vm6 = vcmp.eq.s32.totalorder %v4014_v46, %v6156_v23  ;;  %v1574_v13 = vsel %vm6158_vm15, %v1490_v54, 0.0 }
 0x2e6   : > { %vm532_vm2 = vmor %vm340_vm12, %vm500_vm3  ;;  %vm883_vm3 = vcmp.eq.s32.totalorder %v4014_v46, %v6154_v20  ;;  %v2750_v43 = vsel %vm1124_vm9, 1.0, %v5807_v60  ;;  %vm6163_vm15 = vcmask 523264   ;;  %v1558_v15 = vpop.permute.xlu1 %1557 }
 0x2e7   : > { %vm5079_vm10 = vmor %vm5053_vm13, %vm676_vm1  ;;  %2903 = vmatmul.mubr.msk.f32.gmra.mrb[12].mxu1 %vm6155_vm7, %v1814_v55  ;;  %v1413_v10 = vadd.f32 %v2750_v43, %v1381_v61  ;;  %vm1075_vm1 = vcmp.eq.s32.totalorder %v4014_v46, %v6157_v58  ;;  %vm6162_vm7 = vcmp.eq.s32.totalorder %v4014_v46, 59 }
 0x2e8   : > { %vm723_vm11 = vmor %vm531_vm4, %vm691_vm5  ;;  %vm868_vm4 = vcmp.eq.s32.totalorder %v4014_v46, %v6159_v39 }
 0x2e9   : > { %vm724_vm12 = vmor %vm532_vm2, %vm692_vm0  ;;  %v1606_v8 = vadd.f32 %v1574_v13, %v1413_v10  ;;  %vm6160_vm2 = vcmp.eq.s32.totalorder %v4014_v46, 58  ;;  %v5132_v57 = vpop.f32.mrb[0].mxu0 }
 0x2ea   : > { %vm916_vm13 = vmor %vm724_vm12, %vm884_vm14  ;;  %v1767_v0 = vsel %vm6160_vm2, %v1683_v40, 0.0  ;;  %vm1060_vm14 = vcmp.eq.s32.totalorder %v4014_v46, %v6161_v41  ;;  %v5134_v6 = vpop.f32.mrb[1].mxu0 }
 0x2eb   : > { %vm915_vm5 = vmor %vm723_vm11, %vm883_vm3  ;;  %v1799_v48 = vadd.f32 %v1767_v0, %v1606_v8  ;;  %v1747_v47 = vpop.permute.xlu1 %1746 }
 0x2ec   : > { %vm1108_vm9 = vmor %vm916_vm13, %vm1076_vm6  ;;  %vm6165_vm6 = vcmp.eq.s32.totalorder %v4014_v46, 56 }
 0x2ed   : > { %vm1107_vm0 = vmor %vm915_vm5, %vm1075_vm1  ;;  %2881 = vmatprep.mubr.msk.f32.mxu0 %vm6163_vm15, %v1799_v48  ;;  %v1398_v56 = vsel %vm6165_vm6, %v1365_v11, 0.0 }
 0x2ee   : > { %vm900_vm8 = vmor %vm5079_vm10, %vm868_vm4  ;;  %vm6168_vm10 = vcmp.eq.s32.totalorder %v4014_v46, 57 }
 0x2ef   : > { %vm1141_vm12 = vmor %vm1108_vm9, %vm6162_vm7  ;;  %v1591_v30 = vsel %vm6168_vm10, %v1558_v15, 0.0  ;;  %v1687_v53 = vpop.permute.xlu1 %1686 }
 0x2f0   : > { %vm6164_vm11 = vmmov %vm6162_vm7  ;;  %v2767_v33 = vsel %vm1141_vm12, 1.0, %v5807_v60 }
 0x2f1   : > { %vm1140_vm3 = vmor %vm1107_vm0, %vm6164_vm11  ;;  %v1430_v62 = vadd.f32 %v2767_v33, %v1398_v56 }
 0x2f2   : > { %vm1092_vm13 = vmor %vm900_vm8, %vm1060_vm14  ;;  %v2766_v1 = vsel %vm1140_vm3, 1.0, %v5807_v60  ;;  %vm6174_vm8 = vcmp.eq.s32.totalorder %v4014_v46, 58  ;;  %vm2147_vm14 = vcmask 261120  }
 0x2f3   : > { %vm6167_vm1 = vmmov %vm6165_vm6  ;;  %v1623_v5 = vadd.f32 %v1591_v30, %v1430_v62  ;;  %v2148_v11 = vsel %vm2147_vm14, %v5134_v6, 0.0 }
 0x2f4   : > { %v1397_v26 = vsel %vm6167_vm1, %v6166_v36, 0.0  ;;  %vm6169_vm4 = vmmov %vm6168_vm10  ;;  %2149 = vadd.xlane.f32.xlu1 %v2148_v11 }
 0x2f5   : > { %v1590_v19 = vsel %vm6169_vm4, %v4396_v17, 0.0  ;;  %vm6170_vm5 = vmmov %vm6162_vm7  ;;  %v1429_v35 = vadd.f32 %v2766_v1, %v1397_v26  ;;  %v1783_v17 = vsel %vm6174_vm8, %v1747_v47, 0.0 }
 0x2f6   : > { %vm1125_vm9 = vmor %vm1092_vm13, %vm6170_vm5 }
 0x2f7   : > { %vm6172_vm2 = vmmov %vm6167_vm1  ;;  %v1622_v25 = vadd.f32 %v1590_v19, %v1429_v35  ;;  %v2751_v31 = vsel %vm1125_vm9, 1.0, %v5807_v60  ;;  %v2151_v60 = vsel %vm2147_vm14, %v5132_v57, 0.0 }
 0x2f8   : > { %v1382_v51 = vsel %vm6172_vm2, %v6171_v52, 0.0  ;;  %vm6173_vm0 = vmmov %vm6169_vm4  ;;  %2152 = vadd.xlane.f32.xlu0 %v2151_v60 }
 0x2f9   : > { %v1575_v12 = vsel %vm6173_vm0, %v1494_v38, 0.0  ;;  %v1414_v16 = vadd.f32 %v2751_v31, %v1382_v51  ;;  %vm6175_vm7 = vmmov %vm6174_vm8  ;;  %v1815_v29 = vadd.f32 %v1783_v17, %v1622_v25 }
 0x2fa   : > { %v1784_v42 = vsel %vm6175_vm7, %v1751_v18, 0.0  ;;  %vm6176_vm12 = vmmov %vm6163_vm15 }
 0x2fb   : > { %v1816_v4 = vadd.f32 %v1784_v42, %v1623_v5  ;;  %v1607_v49 = vadd.f32 %v1575_v12, %v1414_v16  ;;  %2905 = vmatprep.mubr.msk.f32.mxu1 %vm6176_vm12, %v1815_v29  ;;  %vm6177_vm15 = vmmov %vm6175_vm7 }
 0x2fc   : > { %v1768_v32 = vsel %vm6177_vm15, %v1687_v53, 0.0  ;;  %vm6178_vm11 = vmmov %vm6176_vm12 }
 0x2fd   : > { %2906 = vmatmul.mubr.msk.f32.gmra.mrb[14].mxu1 %vm6178_vm11, %v1816_v4  ;;  %v1800_v27 = vadd.f32 %v1768_v32, %v1607_v49  ;;  %vm6179_vm3 = vmmov %vm6178_vm11 }
 0x2ff   : > { %2882 = vmatmul.mubr.msk.f32.gmra.mrb[14].mxu0 %vm6179_vm3, %v1800_v27 }
 0x319   : > { %v5145_v45 = vpop.f32.mrb[0].mxu1 }
 0x31a   : > { %v5147_v24 = vpop.f32.mrb[1].mxu1  ;;  %v2199_v51 = vsel %vm2147_vm14, %v5145_v45, 0.0 }
 0x31b   : > { %v2196_v18 = vsel %vm2147_vm14, %v5147_v24, 0.0 }
 0x32a   : > { %v5149_v37 = vpop.f32.mrb[2].mxu1 }
 0x32b   : > { %v5151_v14 = vpop.f32.mrb[3].mxu1  ;;  %v2205_v5 = vsel %vm2147_vm14, %v5149_v37, 0.0 }
 0x32c   : > { %v2202_v25 = vsel %vm2147_vm14, %v5151_v14, 0.0 }
 0x32f   : > { %v5153_v46 = vpop.f32.mrb[2].mxu0 }
 0x330   : > { %v5155_v22 = vpop.f32.mrb[3].mxu0  ;;  %v2157_v59 = vsel %vm2147_vm14, %v5153_v46, 0.0 }
 0x331   : > { %2158 = vadd.xlane.f32.xlu1 %v2157_v59  ;;  %v2154_v34 = vsel %vm2147_vm14, %v5155_v22, 0.0 }
 0x332   : > { %2155 = vadd.xlane.f32.xlu0 %v2154_v34 }
 0x33e   : > { %v5161_v7 = vpop.f32.mrb[4].mxu0 }
 0x33f   : > { %v5163_v21 = vpop.f32.mrb[5].mxu0  ;;  %v2163_v9 = vsel %vm2147_vm14, %v5161_v7, 0.0 }
 0x340   : > { %2164 = vadd.xlane.f32.xlu1 %v2163_v9  ;;  %v2160_v63 = vsel %vm2147_vm14, %v5163_v21, 0.0 }
 0x341   : > { %2161 = vadd.xlane.f32.xlu0 %v2160_v63 }
 0x345   : > { %v5169_v50 = vpop.f32.mrb[4].mxu1 }
 0x346   : > { %v5171_v44 = vpop.f32.mrb[5].mxu1  ;;  %v2211_v47 = vsel %vm2147_vm14, %v5169_v50, 0.0 }
 0x347   : > { %v2208_v31 = vsel %vm2147_vm14, %v5171_v44, 0.0 }
 0x34c   : > { %v5173_v3 = vpop.f32.mrb[6].mxu0 }
 0x34d   : > { %v5175_v61 = vpop.f32.mrb[7].mxu0  ;;  %v2169_v55 = vsel %vm2147_vm14, %v5173_v3, 0.0 }
 0x34e   : > { %2170 = vadd.xlane.f32.xlu1 %v2169_v55  ;;  %v2166_v2 = vsel %vm2147_vm14, %v5175_v61, 0.0 }
 0x34f   : > { %2167 = vadd.xlane.f32.xlu0 %v2166_v2 }
 0x35b   : > { %v5181_v28 = vpop.f32.mrb[6].mxu1 }
 0x35c   : > { %v5183_v20 = vpop.f32.mrb[7].mxu1  ;;  %v2217_v12 = vsel %vm2147_vm14, %v5181_v28, 0.0 }
 0x35d   : > { %v2214_v17 = vsel %vm2147_vm14, %v5183_v20, 0.0 }
 0x376   : > { %v5185_v43 = vpop.f32.mrb[8].mxu0 }
 0x377   : > { %v5187_v23 = vpop.f32.mrb[9].mxu0  ;;  %v2175_v10 = vsel %vm2147_vm14, %v5185_v43, 0.0 }
 0x378   : > { %2176 = vadd.xlane.f32.xlu1 %v2175_v10  ;;  %v2172_v54 = vsel %vm2147_vm14, %v5187_v23, 0.0 }
 0x379   : > { %2173 = vadd.xlane.f32.xlu0 %v2172_v54 }
 0x381   : > { %v5193_v58 = vpop.f32.mrb[8].mxu1  ;;  %v2150_v29 = vpop.xlane.xlu1 %2149 }
 0x382   : > { %v5195_v13 = vpop.f32.mrb[9].mxu1  ;;  %v2223_v16 = vsel %vm2147_vm14, %v5193_v58, 0.0  ;;  %v2245_v60 = vmul.f32 0.03125, %v2150_v29 }
 0x383   : > { %v2220_v4 = vsel %vm2147_vm14, %v5195_v13, 0.0 }
 0x384   : > { %v5263_v63 = vsub.f32 %v5134_v6, %v2245_v60 }
 0x385   : > { %v2153_v42 = vpop.xlane.xlu0 %2152 }
 0x386   : > { %v2246_v49 = vmul.f32 0.03125, %v2153_v42 }
 0x388   : > { %v5258_v59 = vsub.f32 %v5132_v57, %v2246_v49 }
 0x394   : > { %v5197_v39 = vpop.f32.mrb[10].mxu0 }
 0x395   : > { %v5199_v40 = vpop.f32.mrb[11].mxu0  ;;  %v2181_v8 = vsel %vm2147_vm14, %v5197_v39, 0.0 }
 0x396   : > { %2182 = vadd.xlane.f32.xlu1 %v2181_v8  ;;  %v2178_v0 = vsel %vm2147_vm14, %v5199_v40, 0.0 }
 0x397   : > { %2179 = vadd.xlane.f32.xlu0 %v2178_v0 }
 0x39b   : > { %v5205_v48 = vpop.f32.mrb[10].mxu1 }
 0x39c   : > { %v5207_v38 = vpop.f32.mrb[11].mxu1  ;;  %v2229_v53 = vsel %vm2147_vm14, %v5205_v48, 0.0 }
 0x39d   : > { %v2226_v11 = vsel %vm2147_vm14, %v5207_v38, 0.0 }
 0x3b0   : > { %v5209_v41 = vpop.f32.mrb[12].mxu0 }
 0x3b1   : > { %v5211_v56 = vpop.f32.mrb[13].mxu0  ;;  %v2187_v36 = vsel %vm2147_vm14, %v5209_v41, 0.0 }
 0x3b2   : > { %2188 = vadd.xlane.f32.xlu1 %v2187_v36  ;;  %v2184_v26 = vsel %vm2147_vm14, %v5211_v56, 0.0  ;;  %v2310_v36 = vmul.f32 %v5258_v59, %v5258_v59 }
 0x3b3   : > { %2185 = vadd.xlane.f32.xlu0 %v2184_v26 }
 0x3ba   : > { %v5217_v15 = vpop.f32.mrb[12].mxu1 }
 0x3bb   : > { %v5219_v33 = vpop.f32.mrb[13].mxu1  ;;  %v2235_v9 = vsel %vm2147_vm14, %v5217_v15, 0.0 }
 0x3bc   : > { %v2232_v10 = vsel %vm2147_vm14, %v5219_v33, 0.0 }
 0x3be   : > { %v2159_v32 = vpop.xlane.xlu1 %2158 }
 0x3bf   : > { %v2156_v27 = vpop.xlane.xlu0 %2155  ;;  %v2248_v34 = vmul.f32 0.03125, %v2159_v32 }
 0x3c0   : > { %v2247_v55 = vmul.f32 0.03125, %v2156_v27 }
 0x3c1   : > { %v5268_v8 = vsub.f32 %v5153_v46, %v2248_v34  ;;  %v2309_v46 = vmul.f32 %v5263_v63, %v5263_v63 }
 0x3c2   : > { %v5275_v6 = vsub.f32 %v5155_v22, %v2247_v55 }
 0x3c3   : > { %v2312_v22 = vmul.f32 %v5268_v8, %v5268_v8 }
 0x3cd   : > { %v2165_v2 = vpop.xlane.xlu1 %2164 }
 0x3ce   : > { %v2162_v54 = vpop.xlane.xlu0 %2161  ;;  %v2250_v57 = vmul.f32 0.03125, %v2165_v2 }
 0x3cf   : > { %v2249_v26 = vmul.f32 0.03125, %v2162_v54 }
 0x3d0   : > { %v5221_v30 = vpop.f32.mrb[14].mxu1 }
 0x3d1   : > { %v5223_v1 = vpop.f32.mrb[15].mxu1  ;;  %v2241_v0 = vsel %vm2147_vm14, %v5221_v30, 0.0 }
 0x3d2   : > { %v5225_v19 = vpop.f32.mrb[14].mxu0 }
 0x3d3   : > { %v5227_v62 = vpop.f32.mrb[15].mxu0  ;;  %v2193_v35 = vsel %vm2147_vm14, %v5225_v19, 0.0 }
 0x3d4   : > { %v2190_v52 = vsel %vm2147_vm14, %v5227_v62, 0.0  ;;  %2194 = vadd.xlane.f32.xlu1 %v2193_v35  ;;  %v2238_v35 = vsel %vm2147_vm14, %v5223_v1, 0.0 }
 0x3d5   : > { %2191 = vadd.xlane.f32.xlu0 %v2190_v52 }
 0x3d8   : > { %2200 = vadd.xlane.f32.xlu1 %v2199_v51 }
 0x3d9   : > { %2197 = vadd.xlane.f32.xlu0 %v2196_v18  ;;  %v5282_v18 = vsub.f32 %v5161_v7, %v2250_v57 }
 0x3db   : > { %v2171_v52 = vpop.xlane.xlu1 %2170 }
 0x3dc   : > { %2206 = vadd.xlane.f32.xlu1 %v2205_v5  ;;  %v2168_v51 = vpop.xlane.xlu0 %2167  ;;  %v2252_v5 = vmul.f32 0.03125, %v2171_v52 }
 0x3dd   : > { %2203 = vadd.xlane.f32.xlu0 %v2202_v25  ;;  %v2344_v25 = vsel %vm2147_vm14, %v2310_v36, 0.0 }
 0x3de   : > { %v5294_v42 = vsub.f32 %v5173_v3, %v2252_v5 }
 0x3e0   : > { %2212 = vadd.xlane.f32.xlu1 %v2211_v47  ;;  %v5288_v47 = vsub.f32 %v5163_v21, %v2249_v26  ;;  %v2314_v21 = vmul.f32 %v5282_v18, %v5282_v18  ;;  %v2316_v27 = vmul.f32 %v5294_v42, %v5294_v42 }
 0x3e1   : > { %2209 = vadd.xlane.f32.xlu0 %v2208_v31  ;;  %v2251_v31 = vmul.f32 0.03125, %v2168_v51 }
 0x3e2   : > { %v2313_v32 = vmul.f32 %v5288_v47, %v5288_v47  ;;  %v2362_v55 = vsel %vm2147_vm14, %v2316_v27, 0.0 }
 0x3e3   : > { %v5300_v49 = vsub.f32 %v5175_v61, %v2251_v31 }
 0x3e4   : > { %2218 = vadd.xlane.f32.xlu1 %v2217_v12  ;;  %v2353_v61 = vsel %vm2147_vm14, %v2313_v32, 0.0 }
 0x3e5   : > { %2215 = vadd.xlane.f32.xlu0 %v2214_v17  ;;  %v2341_v17 = vsel %vm2147_vm14, %v2309_v46, 0.0 }
 0x3e8   : > { %2224 = vadd.xlane.f32.xlu1 %v2223_v16  ;;  %v2311_v16 = vmul.f32 %v5275_v6, %v5275_v6 }
 0x3e9   : > { %2221 = vadd.xlane.f32.xlu0 %v2220_v4  ;;  %v2350_v4 = vsel %vm2147_vm14, %v2312_v22, 0.0 }
 0x3ea   : > { %v2347_v60 = vsel %vm2147_vm14, %v2311_v16, 0.0 }
 0x3ec   : > { %2230 = vadd.xlane.f32.xlu1 %v2229_v53 }
 0x3ed   : > { %2227 = vadd.xlane.f32.xlu0 %v2226_v11  ;;  %v2356_v11 = vsel %vm2147_vm14, %v2314_v21, 0.0 }
 0x3f0   : > { %2236 = vadd.xlane.f32.xlu1 %v2235_v9  ;;  %v2315_v9 = vmul.f32 %v5300_v49, %v5300_v49 }
 0x3f1   : > { %2233 = vadd.xlane.f32.xlu0 %v2232_v10 }
 0x3f2   : > { %v2359_v2 = vsel %vm2147_vm14, %v2315_v9, 0.0 }
 0x3f4   : > { %2242 = vadd.xlane.f32.xlu1 %v2241_v0 }
 0x3f5   : > { %2239 = vadd.xlane.f32.xlu0 %v2238_v35 }
 0x3f8   : > { %2345 = vadd.xlane.f32.xlu1 %v2344_v25 }
 0x3f9   : > { %2342 = vadd.xlane.f32.xlu0 %v2341_v17 }
 0x3fc   : > { %2351 = vadd.xlane.f32.xlu1 %v2350_v4 }
 0x3fd   : > { %2348 = vadd.xlane.f32.xlu0 %v2347_v60 }
 0x400   : > { %2357 = vadd.xlane.f32.xlu1 %v2356_v11 }
 0x401   : > { %2354 = vadd.xlane.f32.xlu0 %v2353_v61 }
 0x404   : > { %2363 = vadd.xlane.f32.xlu1 %v2362_v55 }
 0x405   : > { %v2177_v12 = vpop.xlane.xlu1 %2176  ;;  %2360 = vadd.xlane.f32.xlu0 %v2359_v2 }
 0x406   : > { %v2174_v7 = vpop.xlane.xlu0 %2173  ;;  %v2254_v29 = vmul.f32 0.03125, %v2177_v12 }
 0x407   : > { %v2253_v53 = vmul.f32 0.03125, %v2174_v7 }
 0x408   : > { %v5306_v3 = vsub.f32 %v5185_v43, %v2254_v29 }
 0x409   : > { %v5312_v34 = vsub.f32 %v5187_v23, %v2253_v53 }
 0x40a   : > { %v2318_v43 = vmul.f32 %v5306_v3, %v5306_v3 }
 0x40b   : > { %v2317_v10 = vmul.f32 %v5312_v34, %v5312_v34 }
 0x40c   : > { %v2368_v23 = vsel %vm2147_vm14, %v2318_v43, 0.0 }
 0x40d   : > { %2369 = vadd.xlane.f32.xlu1 %v2368_v23  ;;  %v2365_v54 = vsel %vm2147_vm14, %v2317_v10, 0.0 }
 0x40e   : > { %2366 = vadd.xlane.f32.xlu0 %v2365_v54 }
 0x423   : > { %v2183_v57 = vpop.xlane.xlu1 %2182 }
 0x424   : > { %v2256_v0 = vmul.f32 0.03125, %v2183_v57  ;;  %v2180_v36 = vpop.xlane.xlu0 %2179 }
 0x425   : > { %v2255_v26 = vmul.f32 0.03125, %v2180_v36 }
 0x426   : > { %v5326_v35 = vsub.f32 %v5197_v39, %v2256_v0 }
 0x427   : > { %v5329_v52 = vsub.f32 %v5199_v40, %v2255_v26 }
 0x428   : > { %v2320_v46 = vmul.f32 %v5326_v35, %v5326_v35 }
 0x429   : > { %v2319_v51 = vmul.f32 %v5329_v52, %v5329_v52 }
 0x42a   : > { %v2374_v5 = vsel %vm2147_vm14, %v2320_v46, 0.0 }
 0x42b   : > { %2375 = vadd.xlane.f32.xlu1 %v2374_v5  ;;  %v2371_v25 = vsel %vm2147_vm14, %v2319_v51, 0.0 }
 0x42c   : > { %2372 = vadd.xlane.f32.xlu0 %v2371_v25 }
 0x43f   : > { %v2189_v22 = vpop.xlane.xlu1 %2188 }
 0x440   : > { %v2258_v31 = vmul.f32 0.03125, %v2189_v22  ;;  %v2186_v12 = vpop.xlane.xlu0 %2185 }
 0x441   : > { %v2257_v39 = vmul.f32 0.03125, %v2186_v12 }
 0x442   : > { %v5338_v17 = vsub.f32 %v5209_v41, %v2258_v31 }
 0x443   : > { %v5341_v40 = vsub.f32 %v5211_v56, %v2257_v39 }
 0x444   : > { %v2322_v16 = vmul.f32 %v5338_v17, %v5338_v17 }
 0x445   : > { %v2321_v7 = vmul.f32 %v5341_v40, %v5341_v40 }
 0x446   : > { %v2380_v29 = vsel %vm2147_vm14, %v2322_v16, 0.0 }
 0x447   : > { %2381 = vadd.xlane.f32.xlu1 %v2380_v29  ;;  %v2377_v4 = vsel %vm2147_vm14, %v2321_v7, 0.0 }
 0x448   : > { %2378 = vadd.xlane.f32.xlu0 %v2377_v4 }
 0x461   : > { %v2195_v21 = vpop.xlane.xlu1 %2194 }
 0x462   : > { %v2260_v53 = vmul.f32 0.03125, %v2195_v21  ;;  %v2192_v60 = vpop.xlane.xlu0 %2191 }
 0x463   : > { %v2259_v41 = vmul.f32 0.03125, %v2192_v60 }
 0x464   : > { %v5350_v32 = vsub.f32 %v5225_v19, %v2260_v53 }
 0x465   : > { %v5353_v56 = vsub.f32 %v5227_v62, %v2259_v41  ;;  %v2201_v11 = vpop.xlane.xlu1 %2200 }
 0x466   : > { %v2262_v27 = vmul.f32 0.03125, %v2201_v11  ;;  %v2198_v61 = vpop.xlane.xlu0 %2197  ;;  %v2324_v9 = vmul.f32 %v5350_v32, %v5350_v32 }
 0x467   : > { %v2261_v55 = vmul.f32 0.03125, %v2198_v61  ;;  %v2323_v43 = vmul.f32 %v5353_v56, %v5353_v56 }
 0x468   : > { %v5360_v2 = vsub.f32 %v5145_v45, %v2262_v27  ;;  %v2386_v10 = vsel %vm2147_vm14, %v2324_v9, 0.0 }
 0x469   : > { %v5364_v19 = vsub.f32 %v5147_v24, %v2261_v55  ;;  %v2207_v62 = vpop.xlane.xlu1 %2206  ;;  %2387 = vadd.xlane.f32.xlu1 %v2386_v10  ;;  %v2383_v23 = vsel %vm2147_vm14, %v2323_v43, 0.0 }
 0x46a   : > { %v2264_v54 = vmul.f32 0.03125, %v2207_v62  ;;  %2384 = vadd.xlane.f32.xlu0 %v2383_v23  ;;  %v2204_v57 = vpop.xlane.xlu0 %2203  ;;  %v2326_v0 = vmul.f32 %v5360_v2, %v5360_v2 }
 0x46b   : > { %v2263_v36 = vmul.f32 0.03125, %v2204_v57  ;;  %v2325_v45 = vmul.f32 %v5364_v19, %v5364_v19 }
 0x46c   : > { %v5372_v26 = vsub.f32 %v5149_v37, %v2264_v54  ;;  %v2392_v24 = vsel %vm2147_vm14, %v2326_v0, 0.0 }
 0x46d   : > { %v5376_v46 = vsub.f32 %v5151_v14, %v2263_v36  ;;  %v2213_v51 = vpop.xlane.xlu1 %2212  ;;  %2393 = vadd.xlane.f32.xlu1 %v2392_v24  ;;  %v2389_v5 = vsel %vm2147_vm14, %v2325_v45, 0.0 }
 0x46e   : > { %v2266_v25 = vmul.f32 0.03125, %v2213_v51  ;;  %2390 = vadd.xlane.f32.xlu0 %v2389_v5  ;;  %v2210_v22 = vpop.xlane.xlu0 %2209  ;;  %v2328_v31 = vmul.f32 %v5372_v26, %v5372_v26 }
 0x46f   : > { %v2265_v12 = vmul.f32 0.03125, %v2210_v22  ;;  %v2327_v37 = vmul.f32 %v5376_v46, %v5376_v46 }
 0x470   : > { %v5384_v39 = vsub.f32 %v5169_v50, %v2266_v25  ;;  %v2398_v14 = vsel %vm2147_vm14, %v2328_v31, 0.0 }
 0x471   : > { %v5388_v16 = vsub.f32 %v5171_v44, %v2265_v12  ;;  %v2219_v7 = vpop.xlane.xlu1 %2218  ;;  %2399 = vadd.xlane.f32.xlu1 %v2398_v14  ;;  %v2395_v29 = vsel %vm2147_vm14, %v2327_v37, 0.0 }
 0x472   : > { %v2268_v4 = vmul.f32 0.03125, %v2219_v7  ;;  %2396 = vadd.xlane.f32.xlu0 %v2395_v29  ;;  %v2216_v21 = vpop.xlane.xlu0 %2215  ;;  %v2330_v53 = vmul.f32 %v5384_v39, %v5384_v39 }
 0x473   : > { %v2267_v60 = vmul.f32 0.03125, %v2216_v21  ;;  %v2329_v50 = vmul.f32 %v5388_v16, %v5388_v16 }
 0x474   : > { %v5396_v41 = vsub.f32 %v5181_v28, %v2268_v4  ;;  %v2404_v44 = vsel %vm2147_vm14, %v2330_v53, 0.0 }
 0x475   : > { %v5400_v11 = vsub.f32 %v5183_v20, %v2267_v60  ;;  %v2225_v27 = vpop.xlane.xlu1 %2224  ;;  %2405 = vadd.xlane.f32.xlu1 %v2404_v44  ;;  %v2401_v61 = vsel %vm2147_vm14, %v2329_v50, 0.0 }
 0x476   : > { %v2270_v9 = vmul.f32 0.03125, %v2225_v27  ;;  %2402 = vadd.xlane.f32.xlu0 %v2401_v61  ;;  %v2222_v55 = vpop.xlane.xlu0 %2221  ;;  %v2332_v43 = vmul.f32 %v5396_v41, %v5396_v41 }
 0x477   : > { %v2269_v10 = vmul.f32 0.03125, %v2222_v55  ;;  %v2331_v28 = vmul.f32 %v5400_v11, %v5400_v11 }
 0x478   : > { %v5408_v62 = vsub.f32 %v5193_v58, %v2270_v9  ;;  %v2410_v20 = vsel %vm2147_vm14, %v2332_v43, 0.0 }
 0x479   : > { %v5412_v23 = vsub.f32 %v5195_v13, %v2269_v10  ;;  %v2231_v54 = vpop.xlane.xlu1 %2230  ;;  %2411 = vadd.xlane.f32.xlu1 %v2410_v20  ;;  %v2407_v57 = vsel %vm2147_vm14, %v2331_v28, 0.0 }
 0x47a   : > { %v2272_v0 = vmul.f32 0.03125, %v2231_v54  ;;  %2408 = vadd.xlane.f32.xlu0 %v2407_v57  ;;  %v2228_v36 = vpop.xlane.xlu0 %2227  ;;  %v2334_v45 = vmul.f32 %v5408_v62, %v5408_v62 }
 0x47b   : > { %v2271_v24 = vmul.f32 0.03125, %v2228_v36  ;;  %v2333_v58 = vmul.f32 %v5412_v23, %v5412_v23 }
 0x47c   : > { %v5420_v51 = vsub.f32 %v5205_v48, %v2272_v0  ;;  %v2416_v13 = vsel %vm2147_vm14, %v2334_v45, 0.0 }
 0x47d   : > { %v5424_v5 = vsub.f32 %v5207_v38, %v2271_v24  ;;  %v2237_v25 = vpop.xlane.xlu1 %2236  ;;  %2417 = vadd.xlane.f32.xlu1 %v2416_v13  ;;  %v2413_v22 = vsel %vm2147_vm14, %v2333_v58, 0.0 }
 0x47e   : > { %v2274_v31 = vmul.f32 0.03125, %v2237_v25  ;;  %2414 = vadd.xlane.f32.xlu0 %v2413_v22  ;;  %v2234_v12 = vpop.xlane.xlu0 %2233  ;;  %v2336_v37 = vmul.f32 %v5420_v51, %v5420_v51 }
 0x47f   : > { %v2273_v14 = vmul.f32 0.03125, %v2234_v12  ;;  %v2335_v48 = vmul.f32 %v5424_v5, %v5424_v5 }
 0x480   : > { %v5432_v7 = vsub.f32 %v5217_v15, %v2274_v31  ;;  %v2422_v38 = vsel %vm2147_vm14, %v2336_v37, 0.0 }
 0x481   : > { %v5436_v29 = vsub.f32 %v5219_v33, %v2273_v14  ;;  %v2243_v4 = vpop.xlane.xlu1 %2242  ;;  %2423 = vadd.xlane.f32.xlu1 %v2422_v38  ;;  %v2419_v21 = vsel %vm2147_vm14, %v2335_v48, 0.0 }
 0x482   : > { %v2276_v53 = vmul.f32 0.03125, %v2243_v4  ;;  %2420 = vadd.xlane.f32.xlu0 %v2419_v21  ;;  %v2240_v60 = vpop.xlane.xlu0 %2239  ;;  %v2338_v50 = vmul.f32 %v5432_v7, %v5432_v7  ;;  %v5460_v4 = vld [vmem:[%s5638_s1 + $0x3c] ss:$0 sm:$0xff] }
 0x483   : > { %v2275_v44 = vmul.f32 0.03125, %v2240_v60  ;;  %v2337_v15 = vmul.f32 %v5436_v29, %v5436_v29 }
 0x484   : > { %v5444_v27 = vsub.f32 %v5221_v30, %v2276_v53  ;;  %v2428_v33 = vsel %vm2147_vm14, %v2338_v50, 0.0 }
 0x485   : > { %v5448_v61 = vsub.f32 %v5223_v1, %v2275_v44  ;;  %2429 = vadd.xlane.f32.xlu1 %v2428_v33  ;;  %v2346_v9 = vpop.xlane.xlu1 %2345  ;;  %v2425_v55 = vsel %vm2147_vm14, %v2337_v15, 0.0 }
 0x486   : > { %v2438_v43 = vmul.f32 0.03125, %v2346_v9  ;;  %2426 = vadd.xlane.f32.xlu0 %v2425_v55  ;;  %v2343_v10 = vpop.xlane.xlu0 %2342  ;;  %v2340_v28 = vmul.f32 %v5444_v27, %v5444_v27 }
 0x487   : > { %v2437_v20 = vmul.f32 0.03125, %v2343_v10  ;;  %v2339_v30 = vmul.f32 %v5448_v61, %v5448_v61 }
 0x488   : > { %v2472_v54 = vadd.f32 1e-12, %v2438_v43  ;;  %v2434_v57 = vsel %vm2147_vm14, %v2340_v28, 0.0  ;;  %v5466_v43 = vld [vmem:[%s5638_s1 + $0x3d] ss:$0 sm:$0xff] }
 0x489   : > { %v2471_v0 = vadd.f32 1e-12, %v2437_v20  ;;  %2435 = vadd.xlane.f32.xlu1 %v2434_v57  ;;  %v2352_v1 = vpop.xlane.xlu1 %2351  ;;  %v2431_v36 = vsel %vm2147_vm14, %v2339_v30, 0.0 }
 0x48a   : > { %3061 = vrsqrt.f32 %v2472_v54  ;;  %v2440_v45 = vmul.f32 0.03125, %v2352_v1  ;;  %2432 = vadd.xlane.f32.xlu0 %v2431_v36  ;;  %v2349_v24 = vpop.xlane.xlu0 %2348 }
 0x48b   : > { %3063 = vrsqrt.f32 %v2471_v0  ;;  %v2439_v58 = vmul.f32 0.03125, %v2349_v24 }
 0x48c   : > { %v2474_v13 = vadd.f32 1e-12, %v2440_v45 }
 0x48d   : > { %v2473_v25 = vadd.f32 1e-12, %v2439_v58  ;;  %v2358_v22 = vpop.xlane.xlu1 %2357 }
 0x48e   : > { %3065 = vrsqrt.f32 %v2474_v13  ;;  %v2442_v31 = vmul.f32 0.03125, %v2358_v22  ;;  %v2355_v12 = vpop.xlane.xlu0 %2354 }
 0x48f   : > { %3067 = vrsqrt.f32 %v2473_v25  ;;  %v2441_v37 = vmul.f32 0.03125, %v2355_v12 }
 0x490   : > { %v2476_v14 = vadd.f32 1e-12, %v2442_v31 }
 0x491   : > { %v2475_v48 = vadd.f32 1e-12, %v2441_v37  ;;  %v2364_v38 = vpop.xlane.xlu1 %2363 }
 0x492   : > { %3069 = vrsqrt.f32 %v2476_v14  ;;  %v2444_v21 = vmul.f32 0.03125, %v2364_v38  ;;  %v2361_v53 = vpop.xlane.xlu0 %2360 }
 0x493   : > { %3071 = vrsqrt.f32 %v2475_v48  ;;  %v2443_v60 = vmul.f32 0.03125, %v2361_v53 }
 0x494   : > { %v3062_v50 = vpop.eup %3061  ;;  %v2478_v44 = vadd.f32 1e-12, %v2444_v21 }
 0x495   : > { %v3064_v15 = vpop.eup %3063  ;;  %v2540_v33 = vmul.f32 %v3062_v50, %v5460_v4  ;;  %v2477_v9 = vadd.f32 1e-12, %v2443_v60 }
 0x496   : > { %v2539_v10 = vmul.f32 %v3064_v15, %v5460_v4  ;;  %3073 = vrsqrt.f32 %v2478_v44 }
 0x497   : > { %v2572_v30 = vmul.f32 %v2540_v33, %v5258_v59  ;;  %3075 = vrsqrt.f32 %v2477_v9 }
 0x498   : > { %v3066_v57 = vpop.eup %3065  ;;  %v2571_v0 = vmul.f32 %v2539_v10, %v5263_v63 }
 0x499   : > { %v3068_v36 = vpop.eup %3067  ;;  %v2608_v45 = vadd.f32 %v5466_v43, %v2572_v30  ;;  %v2542_v24 = vmul.f32 %v3066_v57, %v5460_v4 }
 0x49a   : > { %v2370_v55 = vpop.xlane.xlu1 %2369  ;;  %v2607_v58 = vadd.f32 %v5466_v43, %v2571_v0  ;;  %v2541_v13 = vmul.f32 %v3068_v36, %v5460_v4 }
 0x49b   : > { %v2446_v28 = vmul.f32 0.03125, %v2370_v55  ;;  %v2367_v20 = vpop.xlane.xlu0 %2366  ;;  %2640 = vst.msk [vmem:[%s5475_s13 + $0x8] sm:$0xff] %vm2147_vm14, %v2608_v45  ;;  %v2574_v25 = vmul.f32 %v2542_v24, %v5268_v8 }
 0x49c   : > { %v2445_v54 = vmul.f32 0.03125, %v2367_v20  ;;  %v3070_v63 = vpop.eup %3069  ;;  %2639 = vst.msk [vmem:[%s5475_s13] sm:$0xff] %vm2147_vm14, %v2607_v58  ;;  %v2573_v22 = vmul.f32 %v2541_v13, %v5275_v6 }
 0x49d   : > { %v2480_v1 = vadd.f32 1e-12, %v2446_v28  ;;  %v3072_v31 = vpop.eup %3071  ;;  %v2610_v12 = vadd.f32 %v5466_v43, %v2574_v25  ;;  %v2544_v37 = vmul.f32 %v3070_v63, %v5460_v4 }
 0x49e   : > { %v2479_v59 = vadd.f32 1e-12, %v2445_v54  ;;  %v2609_v14 = vadd.f32 %v5466_v43, %v2573_v22  ;;  %v2543_v48 = vmul.f32 %v3072_v31, %v5460_v4 }
 0x49f   : > { %3077 = vrsqrt.f32 %v2480_v1  ;;  %2642 = vst.msk [vmem:[%s5475_s13 + $0x18] sm:$0xff] %vm2147_vm14, %v2610_v12  ;;  %v2576_v8 = vmul.f32 %v2544_v37, %v5282_v18 }
 0x4a0   : > { %3079 = vrsqrt.f32 %v2479_v59  ;;  %v3074_v38 = vpop.eup %3073  ;;  %2641 = vst.msk [vmem:[%s5475_s13 + $0x10] sm:$0xff] %vm2147_vm14, %v2609_v14  ;;  %v2575_v6 = vmul.f32 %v2543_v48, %v5288_v47 }
 0x4a1   : > { %v3076_v21 = vpop.eup %3075  ;;  %v2612_v53 = vadd.f32 %v5466_v43, %v2576_v8  ;;  %v2546_v60 = vmul.f32 %v3074_v38, %v5460_v4 }
 0x4a2   : > { %v2611_v50 = vadd.f32 %v5466_v43, %v2575_v6  ;;  %v2545_v44 = vmul.f32 %v3076_v21, %v5460_v4 }
 0x4a3   : > { %2644 = vst.msk [vmem:[%s5475_s13 + $0x28] sm:$0xff] %vm2147_vm14, %v2612_v53  ;;  %v2578_v18 = vmul.f32 %v2546_v60, %v5294_v42 }
 0x4a4   : > { %2643 = vst.msk [vmem:[%s5475_s13 + $0x20] sm:$0xff] %vm2147_vm14, %v2611_v50  ;;  %v2577_v47 = vmul.f32 %v2545_v44, %v5300_v49 }
 0x4a5   : > { %v2614_v9 = vadd.f32 %v5466_v43, %v2578_v18 }
 0x4a6   : > { %v2613_v10 = vadd.f32 %v5466_v43, %v2577_v47 }
 0x4a7   : > { %2646 = vst.msk [vmem:[%s5475_s13 + $0x38] sm:$0xff] %vm2147_vm14, %v2614_v9 }
 0x4a8   : > { %2645 = vst.msk [vmem:[%s5475_s13 + $0x30] sm:$0xff] %vm2147_vm14, %v2613_v10 }
 0x4a9   : > { %v3078_v15 = vpop.eup %3077 }
 0x4aa   : > { %v3080_v33 = vpop.eup %3079  ;;  %v2548_v55 = vmul.f32 %v3078_v15, %v5460_v4 }
 0x4ab   : > { %v2547_v28 = vmul.f32 %v3080_v33, %v5460_v4 }
 0x4ac   : > { %v2580_v20 = vmul.f32 %v2548_v55, %v5306_v3 }
 0x4ad   : > { %v2579_v42 = vmul.f32 %v2547_v28, %v5312_v34 }
 0x4ae   : > { %v2616_v30 = vadd.f32 %v5466_v43, %v2580_v20 }
 0x4af   : > { %v2615_v49 = vadd.f32 %v5466_v43, %v2579_v42 }
 0x4b0   : > { %2648 = vst.msk [vmem:[%s5475_s13 + $0x48] sm:$0xff] %vm2147_vm14, %v2616_v30 }
 0x4b1   : > { %2647 = vst.msk [vmem:[%s5475_s13 + $0x40] sm:$0xff] %vm2147_vm14, %v2615_v49 }
 0x4b8   : > { %v2376_v54 = vpop.xlane.xlu1 %2375 }
 0x4b9   : > { %v2448_v57 = vmul.f32 0.03125, %v2376_v54  ;;  %v2373_v0 = vpop.xlane.xlu0 %2372 }
 0x4ba   : > { %v2447_v1 = vmul.f32 0.03125, %v2373_v0 }
 0x4bb   : > { %v2482_v36 = vadd.f32 1e-12, %v2448_v57 }
 0x4bc   : > { %v2481_v3 = vadd.f32 1e-12, %v2447_v1 }
 0x4bd   : > { %3081 = vrsqrt.f32 %v2482_v36 }
 0x4be   : > { %3083 = vrsqrt.f32 %v2481_v3 }
 0x4c7   : > { %v3082_v45 = vpop.eup %3081 }
 0x4c8   : > { %v3084_v34 = vpop.eup %3083  ;;  %v2550_v24 = vmul.f32 %v3082_v45, %v5460_v4 }
 0x4c9   : > { %v2549_v59 = vmul.f32 %v3084_v34, %v5460_v4 }
 0x4ca   : > { %v2582_v58 = vmul.f32 %v2550_v24, %v5326_v35 }
 0x4cb   : > { %v2581_v13 = vmul.f32 %v2549_v59, %v5329_v52 }
 0x4cc   : > { %v2618_v25 = vadd.f32 %v5466_v43, %v2582_v58 }
 0x4cd   : > { %v2617_v63 = vadd.f32 %v5466_v43, %v2581_v13 }
 0x4ce   : > { %2650 = vst.msk [vmem:[%s5475_s13 + $0x58] sm:$0xff] %vm2147_vm14, %v2618_v25 }
 0x4cf   : > { %2649 = vst.msk [vmem:[%s5475_s13 + $0x50] sm:$0xff] %vm2147_vm14, %v2617_v63 }
 0x4d4   : > { %v2382_v22 = vpop.xlane.xlu1 %2381 }
 0x4d5   : > { %v2450_v31 = vmul.f32 0.03125, %v2382_v22  ;;  %v2379_v12 = vpop.xlane.xlu0 %2378 }
 0x4d6   : > { %v2449_v37 = vmul.f32 0.03125, %v2379_v12 }
 0x4d7   : > { %v2484_v14 = vadd.f32 1e-12, %v2450_v31 }
 0x4d8   : > { %v2483_v48 = vadd.f32 1e-12, %v2449_v37 }
 0x4d9   : > { %3085 = vrsqrt.f32 %v2484_v14 }
 0x4da   : > { %3087 = vrsqrt.f32 %v2483_v48 }
 0x4e3   : > { %v3086_v35 = vpop.eup %3085 }
 0x4e4   : > { %v3088_v52 = vpop.eup %3087  ;;  %v2552_v8 = vmul.f32 %v3086_v35, %v5460_v4 }
 0x4e5   : > { %v2551_v38 = vmul.f32 %v3088_v52, %v5460_v4 }
 0x4e6   : > { %v2584_v6 = vmul.f32 %v2552_v8, %v5338_v17 }
 0x4e7   : > { %v2583_v21 = vmul.f32 %v2551_v38, %v5341_v40 }
 0x4e8   : > { %v2620_v53 = vadd.f32 %v5466_v43, %v2584_v6 }
 0x4e9   : > { %v2619_v60 = vadd.f32 %v5466_v43, %v2583_v21 }
 0x4ea   : > { %2652 = vst.msk [vmem:[%s5475_s13 + $0x68] sm:$0xff] %vm2147_vm14, %v2620_v53 }
 0x4eb   : > { %2651 = vst.msk [vmem:[%s5475_s13 + $0x60] sm:$0xff] %vm2147_vm14, %v2619_v60 }
 0x4f6   : > { %v2388_v50 = vpop.xlane.xlu1 %2387 }
 0x4f7   : > { %v2452_v44 = vmul.f32 0.03125, %v2388_v50  ;;  %v2385_v18 = vpop.xlane.xlu0 %2384 }
 0x4f8   : > { %v2451_v15 = vmul.f32 0.03125, %v2385_v18 }
 0x4f9   : > { %v2486_v47 = vadd.f32 1e-12, %v2452_v44 }
 0x4fa   : > { %v2485_v33 = vadd.f32 1e-12, %v2451_v15  ;;  %v2394_v9 = vpop.xlane.xlu1 %2393 }
 0x4fb   : > { %3089 = vrsqrt.f32 %v2486_v47  ;;  %v2454_v55 = vmul.f32 0.03125, %v2394_v9  ;;  %v2391_v17 = vpop.xlane.xlu0 %2390 }
 0x4fc   : > { %3091 = vrsqrt.f32 %v2485_v33  ;;  %v2453_v40 = vmul.f32 0.03125, %v2391_v17 }
 0x4fd   : > { %v2488_v10 = vadd.f32 1e-12, %v2454_v55 }
 0x4fe   : > { %v2487_v28 = vadd.f32 1e-12, %v2453_v40  ;;  %v2400_v20 = vpop.xlane.xlu1 %2399 }
 0x4ff   : > { %3093 = vrsqrt.f32 %v2488_v10  ;;  %v2456_v42 = vmul.f32 0.03125, %v2400_v20  ;;  %v2397_v30 = vpop.xlane.xlu0 %2396 }
 0x500   : > { %3095 = vrsqrt.f32 %v2487_v28  ;;  %v2455_v49 = vmul.f32 0.03125, %v2397_v30 }
 0x501   : > { %v2490_v54 = vadd.f32 1e-12, %v2456_v42 }
 0x502   : > { %v2489_v57 = vadd.f32 1e-12, %v2455_v49  ;;  %v2406_v0 = vpop.xlane.xlu1 %2405 }
 0x503   : > { %3097 = vrsqrt.f32 %v2490_v54  ;;  %v2458_v1 = vmul.f32 0.03125, %v2406_v0  ;;  %v2403_v36 = vpop.xlane.xlu0 %2402 }
 0x504   : > { %3099 = vrsqrt.f32 %v2489_v57  ;;  %v2457_v3 = vmul.f32 0.03125, %v2403_v36 }
 0x505   : > { %v3090_v45 = vpop.eup %3089  ;;  %v2492_v34 = vadd.f32 1e-12, %v2458_v1 }
 0x506   : > { %v3092_v24 = vpop.eup %3091  ;;  %v2554_v59 = vmul.f32 %v3090_v45, %v5460_v4  ;;  %v2491_v58 = vadd.f32 1e-12, %v2457_v3  ;;  %v2412_v13 = vpop.xlane.xlu1 %2411 }
 0x507   : > { %v2553_v25 = vmul.f32 %v3092_v24, %v5460_v4  ;;  %3101 = vrsqrt.f32 %v2492_v34  ;;  %v2460_v63 = vmul.f32 0.03125, %v2412_v13  ;;  %v2409_v22 = vpop.xlane.xlu0 %2408 }
 0x508   : > { %v2586_v31 = vmul.f32 %v2554_v59, %v5350_v32  ;;  %3103 = vrsqrt.f32 %v2491_v58  ;;  %v2459_v12 = vmul.f32 0.03125, %v2409_v22 }
 0x509   : > { %v3094_v37 = vpop.eup %3093  ;;  %v2585_v14 = vmul.f32 %v2553_v25, %v5353_v56  ;;  %v2494_v48 = vadd.f32 1e-12, %v2460_v63 }
 0x50a   : > { %v3096_v35 = vpop.eup %3095  ;;  %v2622_v52 = vadd.f32 %v5466_v43, %v2586_v31  ;;  %v2556_v8 = vmul.f32 %v3094_v37, %v5460_v4  ;;  %v2493_v38 = vadd.f32 1e-12, %v2459_v12  ;;  %v2418_v6 = vpop.xlane.xlu1 %2417 }
 0x50b   : > { %v2621_v21 = vadd.f32 %v5466_v43, %v2585_v14  ;;  %v2555_v53 = vmul.f32 %v3096_v35, %v5460_v4  ;;  %3105 = vrsqrt.f32 %v2494_v48  ;;  %v2462_v32 = vmul.f32 0.03125, %v2418_v6  ;;  %v2415_v60 = vpop.xlane.xlu0 %2414 }
 0x50c   : > { %2654 = vst.msk [vmem:[%s5475_s13 + $0x78] sm:$0xff] %vm2147_vm14, %v2622_v52  ;;  %v2588_v56 = vmul.f32 %v2556_v8, %v5360_v2  ;;  %3107 = vrsqrt.f32 %v2493_v38  ;;  %v2461_v50 = vmul.f32 0.03125, %v2415_v60 }
 0x50d   : > { %v3098_v44 = vpop.eup %3097  ;;  %2653 = vst.msk [vmem:[%s5475_s13 + $0x70] sm:$0xff] %vm2147_vm14, %v2621_v21  ;;  %v2587_v18 = vmul.f32 %v2555_v53, %v5364_v19  ;;  %v2496_v15 = vadd.f32 1e-12, %v2462_v32 }
 0x50e   : > { %v3100_v47 = vpop.eup %3099  ;;  %v2624_v33 = vadd.f32 %v5466_v43, %v2588_v56  ;;  %v2558_v9 = vmul.f32 %v3098_v44, %v5460_v4  ;;  %v2495_v55 = vadd.f32 1e-12, %v2461_v50  ;;  %v2424_v17 = vpop.xlane.xlu1 %2423 }
 0x50f   : > { %v2623_v40 = vadd.f32 %v5466_v43, %v2587_v18  ;;  %v2557_v2 = vmul.f32 %v3100_v47, %v5460_v4  ;;  %3109 = vrsqrt.f32 %v2496_v15  ;;  %v2464_v10 = vmul.f32 0.03125, %v2424_v17  ;;  %v2421_v28 = vpop.xlane.xlu0 %2420 }
 0x510   : > { %2656 = vst.msk [vmem:[%s5475_s13 + $0x88] sm:$0xff] %vm2147_vm14, %v2624_v33  ;;  %v2590_v19 = vmul.f32 %v2558_v9, %v5372_v26  ;;  %3111 = vrsqrt.f32 %v2495_v55  ;;  %v2463_v20 = vmul.f32 0.03125, %v2421_v28 }
 0x511   : > { %v3102_v42 = vpop.eup %3101  ;;  %2655 = vst.msk [vmem:[%s5475_s13 + $0x80] sm:$0xff] %vm2147_vm14, %v2623_v40  ;;  %v2589_v30 = vmul.f32 %v2557_v2, %v5376_v46  ;;  %v2498_v49 = vadd.f32 1e-12, %v2464_v10 }
 0x512   : > { %v3104_v54 = vpop.eup %3103  ;;  %v2626_v57 = vadd.f32 %v5466_v43, %v2590_v19  ;;  %v2560_v0 = vmul.f32 %v3102_v42, %v5460_v4  ;;  %v2497_v1 = vadd.f32 1e-12, %v2463_v20  ;;  %v2430_v36 = vpop.xlane.xlu1 %2429 }
 0x513   : > { %v2625_v3 = vadd.f32 %v5466_v43, %v2589_v30  ;;  %v2559_v26 = vmul.f32 %v3104_v54, %v5460_v4  ;;  %3113 = vrsqrt.f32 %v2498_v49  ;;  %v2466_v45 = vmul.f32 0.03125, %v2430_v36  ;;  %v2427_v34 = vpop.xlane.xlu0 %2426 }
 0x514   : > { %2658 = vst.msk [vmem:[%s5475_s13 + $0x98] sm:$0xff] %vm2147_vm14, %v2626_v57  ;;  %v2592_v46 = vmul.f32 %v2560_v0, %v5384_v39  ;;  %3115 = vrsqrt.f32 %v2497_v1  ;;  %v2465_v24 = vmul.f32 0.03125, %v2427_v34 }
 0x515   : > { %v3106_v59 = vpop.eup %3105  ;;  %2657 = vst.msk [vmem:[%s5475_s13 + $0x90] sm:$0xff] %vm2147_vm14, %v2625_v3  ;;  %v2591_v58 = vmul.f32 %v2559_v26, %v5388_v16  ;;  %v2500_v13 = vadd.f32 1e-12, %v2466_v45 }
 0x516   : > { %v3108_v25 = vpop.eup %3107  ;;  %v2628_v63 = vadd.f32 %v5466_v43, %v2592_v46  ;;  %v2562_v22 = vmul.f32 %v3106_v59, %v5460_v4  ;;  %v2499_v31 = vadd.f32 1e-12, %v2465_v24  ;;  %v2436_v12 = vpop.xlane.xlu1 %2435 }
 0x517   : > { %v2627_v37 = vadd.f32 %v5466_v43, %v2591_v58  ;;  %v2561_v39 = vmul.f32 %v3108_v25, %v5460_v4  ;;  %3117 = vrsqrt.f32 %v2500_v13  ;;  %v2468_v14 = vmul.f32 0.03125, %v2436_v12  ;;  %v2433_v48 = vpop.xlane.xlu0 %2432 }
 0x518   : > { %2660 = vst.msk [vmem:[%s5475_s13 + $0xa8] sm:$0xff] %vm2147_vm14, %v2628_v63  ;;  %v2594_v16 = vmul.f32 %v2562_v22, %v5396_v41  ;;  %3119 = vrsqrt.f32 %v2499_v31  ;;  %v2467_v35 = vmul.f32 0.03125, %v2433_v48 }
 0x519   : > { %v3110_v52 = vpop.eup %3109  ;;  %2659 = vst.msk [vmem:[%s5475_s13 + $0xa0] sm:$0xff] %vm2147_vm14, %v2627_v37  ;;  %v2593_v8 = vmul.f32 %v2561_v39, %v5400_v11  ;;  %v2502_v38 = vadd.f32 1e-12, %v2468_v14 }
 0x51a   : > { %v3112_v6 = vpop.eup %3111  ;;  %v2630_v21 = vadd.f32 %v5466_v43, %v2594_v16  ;;  %v2564_v53 = vmul.f32 %v3110_v52, %v5460_v4  ;;  %v2501_v32 = vadd.f32 1e-12, %v2467_v35 }
 0x51b   : > { %v2629_v60 = vadd.f32 %v5466_v43, %v2593_v8  ;;  %v2563_v41 = vmul.f32 %v3112_v6, %v5460_v4  ;;  %3121 = vrsqrt.f32 %v2502_v38 }
 0x51c   : > { %2662 = vst.msk [vmem:[%s5475_s13 + $0xb8] sm:$0xff] %vm2147_vm14, %v2630_v21  ;;  %v2596_v56 = vmul.f32 %v2564_v53, %v5408_v62  ;;  %3123 = vrsqrt.f32 %v2501_v32 }
 0x51d   : > { %v3114_v11 = vpop.eup %3113  ;;  %2661 = vst.msk [vmem:[%s5475_s13 + $0xb0] sm:$0xff] %vm2147_vm14, %v2629_v60  ;;  %v2595_v50 = vmul.f32 %v2563_v41, %v5412_v23 }
 0x51e   : > { %v3116_v44 = vpop.eup %3115  ;;  %v2632_v18 = vadd.f32 %v5466_v43, %v2596_v56  ;;  %v2566_v15 = vmul.f32 %v3114_v11, %v5460_v4 }
 0x51f   : > { %v2631_v47 = vadd.f32 %v5466_v43, %v2595_v50  ;;  %v2565_v33 = vmul.f32 %v3116_v44, %v5460_v4 }
 0x520   : > { %2664 = vst.msk [vmem:[%s5475_s13 + $0xc8] sm:$0xff] %vm2147_vm14, %v2632_v18  ;;  %v2598_v62 = vmul.f32 %v2566_v15, %v5420_v51 }
 0x521   : > { %v3118_v9 = vpop.eup %3117  ;;  %2663 = vst.msk [vmem:[%s5475_s13 + $0xc0] sm:$0xff] %vm2147_vm14, %v2631_v47  ;;  %v2597_v23 = vmul.f32 %v2565_v33, %v5424_v5 }
 0x522   : > { %v3120_v55 = vpop.eup %3119  ;;  %v2634_v17 = vadd.f32 %v5466_v43, %v2598_v62  ;;  %v2568_v40 = vmul.f32 %v3118_v9, %v5460_v4 }
 0x523   : > { %v2633_v2 = vadd.f32 %v5466_v43, %v2597_v23  ;;  %v2567_v10 = vmul.f32 %v3120_v55, %v5460_v4 }
 0x524   : > { %2666 = vst.msk [vmem:[%s5475_s13 + $0xd8] sm:$0xff] %vm2147_vm14, %v2634_v17  ;;  %v2600_v51 = vmul.f32 %v2568_v40, %v5432_v7 }
 0x525   : > { %v3122_v28 = vpop.eup %3121  ;;  %2665 = vst.msk [vmem:[%s5475_s13 + $0xd0] sm:$0xff] %vm2147_vm14, %v2633_v2  ;;  %v2599_v5 = vmul.f32 %v2567_v10, %v5436_v29 }
 0x526   : > { %v3124_v19 = vpop.eup %3123  ;;  %v2636_v20 = vadd.f32 %v5466_v43, %v2600_v51  ;;  %v2570_v42 = vmul.f32 %v3122_v28, %v5460_v4 }
 0x527   : > { %v2635_v30 = vadd.f32 %v5466_v43, %v2599_v5  ;;  %v2569_v49 = vmul.f32 %v3124_v19, %v5460_v4 }
 0x528   : > { %2668 = vst.msk [vmem:[%s5475_s13 + $0xe8] sm:$0xff] %vm2147_vm14, %v2636_v20  ;;  %v2602_v54 = vmul.f32 %v2570_v42, %v5444_v27 }
 0x529   : > { %2667 = vst.msk [vmem:[%s5475_s13 + $0xe0] sm:$0xff] %vm2147_vm14, %v2635_v30  ;;  %v2601_v7 = vmul.f32 %v2569_v49, %v5448_v61 }
 0x52a   : > { %v2638_v57 = vadd.f32 %v5466_v43, %v2602_v54 }
 0x52b   : > { %v2637_v29 = vadd.f32 %v5466_v43, %v2601_v7 }
 0x52c   : > { %2670 = vst.msk [vmem:[%s5475_s13 + $0xf8] sm:$0xff] %vm2147_vm14, %v2638_v57 }
 0x52d   : > { %2669 = vst.msk [vmem:[%s5475_s13 + $0xf0] sm:$0xff] %vm2147_vm14, %v2637_v29 }
 0x52e PF: > { %s12_s9 = sadd.s32 1, %s3162_s9  }
 0x52f   : > { %p9_p4 = scmp.ge.s32.totalorder %s12_s9, 4  }
 0x531   :  { %11 = sbr.rel (!%p9_p4) target bundleno = 1 (0x1), region = 58 }

</bundles_post_ra>
